<compile_context>
chip_gen: v6e
topology: v6e:2x2x1
jax: 0.10.0
libtpu: 0.0.40
codegen_flags: <defaults>
</compile_context>

<pallas_src>
from functools import partial

import jax
import jax.numpy as jnp
from jax.experimental import pallas as pl
from jax.experimental.pallas import tpu as pltpu


def _rescal_chunk_kernel(margin, batch, chunk,
                         # scalar-prefetch index refs (SMEM)
                         hp_sm, rp_sm, tp_sm, hn_sm, rn_sm, tn_sm,
                         # VMEM-resident weight tables
                         e_ref,    # (n_e, 1, D)   entity rows, lane-dense
                         r_ref,    # (n_r, D, D)   relation matrices
                         # per-chunk output block (1, 1, 128): partial hinge sum
                         out_ref):
    chunk_start = pl.program_id(0) * chunk

    def emb_scale(sq_norm):
        # nn.Embedding(max_norm=1): scale = 1/(||x|| + 1e-7) if ||x|| > 1 else 1
        norm = jnp.sqrt(sq_norm)
        return jnp.where(norm > 1.0, 1.0 / (norm + 1e-7), 1.0)

    def neg_score(h_idx, r_idx, t_idx):
        # Dynamic leading-dim gathers from the VMEM-resident tables (no DMA).
        h = e_ref[h_idx].astype(jnp.float32)        # (1, D)
        t = e_ref[t_idx].astype(jnp.float32)        # (1, D)
        R = r_ref[r_idx].astype(jnp.float32)        # (D, D)
        # Fold the three max_norm renorm scales into one scalar.
        s = (emb_scale(jnp.sum(h * h, keepdims=True))
             * emb_scale(jnp.sum(R * R, keepdims=True))
             * emb_scale(jnp.sum(t * t, keepdims=True)))        # (1, 1)
        # raw = sum_{i,j} h[i] * R[i,j] * t[j]  ==  (h @ R) . t   (MXU matvec)
        hR = jnp.dot(h, R, preferred_element_type=jnp.float32)  # (1, D)
        raw = jnp.sum(hR * t, keepdims=True)                    # (1, 1)
        return -(s * raw)                                       # (1, 1)

    total = jnp.zeros((1, 1), jnp.float32)
    for j in range(chunk):          # unrolled: `chunk` samples per grid step
        b = chunk_start + j
        y_pos = neg_score(hp_sm[b], rp_sm[b], tp_sm[b])
        y_neg = neg_score(hn_sm[b], rn_sm[b], tn_sm[b])
        hinge = jnp.maximum(y_pos - y_neg + margin, 0.0)        # (1, 1)
        # Mask batch-padding samples (their indices are valid dummies).
        total = total + jnp.where(b < batch, hinge, 0.0)

    out_ref[...] = jnp.broadcast_to(total, out_ref.shape)       # lane-dense store


def rescal_hinge_loss(params, x_pos, x_neg, margin=1.0, chunk=8):
    e_w, r_w = params
    n_e, dim = e_w.shape
    n_r = r_w.shape[0]

    hp, rp, tp = (v.astype(jnp.int32) for v in x_pos)
    hn, rn, tn = (v.astype(jnp.int32) for v in x_neg)
    batch = hp.shape[0]

    num_chunks = pl.cdiv(batch, chunk)
    b_pad = num_chunks * chunk

    def pad(v):
        return jnp.pad(v, (0, b_pad - batch)) if b_pad > batch else v

    hp, rp, tp, hn, rn, tn = (pad(v) for v in (hp, rp, tp, hn, rn, tn))

    # Free metadata views (rows stay contiguous in HBM; nothing materialized):
    e_view = e_w.reshape(n_e, 1, dim)       # each row its own (1, D) tile
    r_view = r_w.reshape(n_r, dim, dim)     # each relation its own (D, D) tile

    kernel = partial(_rescal_chunk_kernel, float(margin), batch, chunk)

    grid_spec = pltpu.PrefetchScalarGridSpec(
        num_scalar_prefetch=6,
        grid=(num_chunks,),
        in_specs=[
            # Whole-table blocks with constant index_map -> VMEM-resident,
            # fetched from HBM exactly once.
            pl.BlockSpec((n_e, 1, dim),
                         lambda i, hp, rp, tp, hn, rn, tn: (0, 0, 0)),
            pl.BlockSpec((n_r, dim, dim),
                         lambda i, hp, rp, tp, hn, rn, tn: (0, 0, 0)),
        ],
        # One private lane-dense block per chunk -> chunk axis is parallel.
        out_specs=pl.BlockSpec((1, 1, 128),
                               lambda i, hp, rp, tp, hn, rn, tn: (i, 0, 0)),
    )

    out = pl.pallas_call(
        kernel,
        out_shape=jax.ShapeDtypeStruct((num_chunks, 1, 128), jnp.float32),
        grid_spec=grid_spec,
        compiler_params=pltpu.CompilerParams(
            dimension_semantics=("parallel",),
        ),
    )(hp, rp, tp, hn, rn, tn, e_view, r_view)

    # Final reduction over per-chunk partials (tiny, done in plain JAX).
    return jnp.sum(out[:, 0, 0])


if __name__ == "__main__":
    key = jax.random.PRNGKey(0)
    n_entitys, n_relations, dim, batch = 50, 10, 32, 8
    margin = 1.0

    k_e, k_r, k_idx = jax.random.split(key, 3)
    # nn.Embedding default init: N(0, 1)
    e_w = jax.random.normal(k_e, (n_entitys, dim), dtype=jnp.float32)
    r_w = jax.random.normal(k_r, (n_relations, dim * dim), dtype=jnp.float32)

    kh_p, kr_p, kt_p, kh_n, kr_n, kt_n = jax.random.split(k_idx, 6)
    x_pos = (
        jax.random.randint(kh_p, (batch,), 0, n_entitys),
        jax.random.randint(kr_p, (batch,), 0, n_relations),
        jax.random.randint(kt_p, (batch,), 0, n_entitys),
    )
    x_neg = (
        jax.random.randint(kh_n, (batch,), 0, n_entitys),
        jax.random.randint(kr_n, (batch,), 0, n_relations),
        jax.random.randint(kt_n, (batch,), 0, n_entitys),
    )

    loss = rescal_hinge_loss((e_w, r_w), x_pos, x_neg, margin=margin)
    jax.block_until_ready(loss)

    # Pure-JAX reference (same math, outside Pallas).
    def ref_renorm(rows, max_norm=1.0):
        norm = jnp.sqrt(jnp.sum(rows * rows, axis=-1, keepdims=True))
        scale = jnp.where(norm > max_norm, max_norm / (norm + 1e-7), 1.0)
        return rows * scale

    def ref_predict(x):
        h, r, t = x
        he = ref_renorm(e_w[h])
        re = ref_renorm(r_w[r]).reshape(-1, dim, dim)
        te = ref_renorm(e_w[t])
        tr = jnp.einsum("bij,bj->bi", re, te)
        return -jnp.sum(he * tr, axis=-1)

    ref = jnp.sum(jnp.maximum(ref_predict(x_pos) - ref_predict(x_neg) + margin, 0.0))
    assert jnp.allclose(loss, ref, rtol=1e-5, atol=1e-4), (loss, ref)

    print("KERNEL_OK")
</pallas_src>

<mosaic_0001>
module attributes {stable_mosaic.version = 11 : i64} {
  func.func @_rescal_chunk_kernel(%arg0: i32, %arg1: memref<8xi32, #tpu.memory_space<smem>>, %arg2: memref<8xi32, #tpu.memory_space<smem>>, %arg3: memref<8xi32, #tpu.memory_space<smem>>, %arg4: memref<8xi32, #tpu.memory_space<smem>>, %arg5: memref<8xi32, #tpu.memory_space<smem>>, %arg6: memref<8xi32, #tpu.memory_space<smem>>, %arg7: memref<50x1x32xf32, #tpu.memory_space<vmem>>, %arg8: memref<10x32x32xf32, #tpu.memory_space<vmem>>, %arg9: memref<1x1x128xf32, #tpu.memory_space<vmem>>) attributes {dimension_semantics = [#tpu.dimension_semantics<parallel>], iteration_bounds = array<i64: 1>, scalar_prefetch = 6 : i64, scratch_operands = 0 : i64, tpu.core_type = #tpu.core_type<tc>, window_params = [{pipeline_mode = #tpu.pipeline_mode<synchronous>, transform_indices = @transform_0, window_bounds = array<i64: 50, 1, 32>}, {pipeline_mode = #tpu.pipeline_mode<synchronous>, transform_indices = @transform_1, window_bounds = array<i64: 10, 32, 32>}, {transform_indices = @transform_2, window_bounds = array<i64: 1, 1, 128>}]} {
    %c8_i32 = arith.constant 8 : i32
    %0 = arith.muli %arg0, %c8_i32 : i32
    %cst = arith.constant 0.000000e+00 : f32
    %1 = vector.broadcast %cst : f32 to vector<1x1xf32>
    %c0_i32 = arith.constant 0 : i32
    %2 = arith.addi %0, %c0_i32 : i32
    %3 = arith.index_cast %2 : i32 to index
    %4 = memref.load %arg1[%3] : memref<8xi32, #tpu.memory_space<smem>>
    %5 = arith.index_cast %2 : i32 to index
    %6 = memref.load %arg2[%5] : memref<8xi32, #tpu.memory_space<smem>>
    %7 = arith.index_cast %2 : i32 to index
    %8 = memref.load %arg3[%7] : memref<8xi32, #tpu.memory_space<smem>>
    %9 = arith.index_cast %4 : i32 to index
    %c0 = arith.constant 0 : index
    %c0_0 = arith.constant 0 : index
    %10 = vector.load %arg7[%9, %c0, %c0_0] : memref<50x1x32xf32, #tpu.memory_space<vmem>>, vector<1x1x32xf32>
    %11 = vector.shape_cast %10 : vector<1x1x32xf32> to vector<1x32xf32>
    %12 = arith.index_cast %8 : i32 to index
    %c0_1 = arith.constant 0 : index
    %c0_2 = arith.constant 0 : index
    %13 = vector.load %arg7[%12, %c0_1, %c0_2] : memref<50x1x32xf32, #tpu.memory_space<vmem>>, vector<1x1x32xf32>
    %14 = vector.shape_cast %13 : vector<1x1x32xf32> to vector<1x32xf32>
    %15 = arith.index_cast %6 : i32 to index
    %c0_3 = arith.constant 0 : index
    %c0_4 = arith.constant 0 : index
    %16 = vector.load %arg8[%15, %c0_3, %c0_4] : memref<10x32x32xf32, #tpu.memory_space<vmem>>, vector<1x32x32xf32>
    %17 = vector.shape_cast %16 : vector<1x32x32xf32> to vector<32x32xf32>
    %18 = arith.mulf %11, %11 : vector<1x32xf32>
    %19 = vector.shape_cast %18 : vector<1x32xf32> to vector<1x1x32xf32>
    %cst_5 = arith.constant dense<0.000000e+00> : vector<1xf32>
    %20 = vector.multi_reduction <add>, %19, %cst_5 [1, 2] : vector<1x1x32xf32> to vector<1xf32>
    %21 = vector.shape_cast %20 : vector<1xf32> to vector<1x1x1xf32>
    %22 = vector.extract %21[0, 0, 0] : f32 from vector<1x1x1xf32>
    %23 = vector.broadcast %22 : f32 to vector<1x1xf32>
    %24 = math.sqrt %23 : vector<1x1xf32>
    %cst_6 = arith.constant 1.000000e+00 : f32
    %25 = vector.broadcast %cst_6 : f32 to vector<1x1xf32>
    %26 = arith.cmpf ogt, %24, %25 : vector<1x1xf32>
    %cst_7 = arith.constant 1.000000e-07 : f32
    %27 = vector.broadcast %cst_7 : f32 to vector<1x1xf32>
    %28 = arith.addf %24, %27 : vector<1x1xf32>
    %cst_8 = arith.constant 1.000000e+00 : f32
    %29 = vector.broadcast %cst_8 : f32 to vector<1x1xf32>
    %30 = arith.divf %29, %28 : vector<1x1xf32>
    %cst_9 = arith.constant 1.000000e+00 : f32
    %31 = vector.broadcast %cst_9 : f32 to vector<1x1xf32>
    %32 = arith.select %26, %30, %31 : vector<1x1xi1>, vector<1x1xf32>
    %33 = arith.mulf %17, %17 : vector<32x32xf32>
    %34 = vector.shape_cast %33 : vector<32x32xf32> to vector<1x32x32xf32>
    %cst_10 = arith.constant dense<0.000000e+00> : vector<1xf32>
    %35 = vector.multi_reduction <add>, %34, %cst_10 [1, 2] : vector<1x32x32xf32> to vector<1xf32>
    %36 = vector.shape_cast %35 : vector<1xf32> to vector<1x1x1xf32>
    %37 = vector.extract %36[0, 0, 0] : f32 from vector<1x1x1xf32>
    %38 = vector.broadcast %37 : f32 to vector<1x1xf32>
    %39 = math.sqrt %38 : vector<1x1xf32>
    %cst_11 = arith.constant 1.000000e+00 : f32
    %40 = vector.broadcast %cst_11 : f32 to vector<1x1xf32>
    %41 = arith.cmpf ogt, %39, %40 : vector<1x1xf32>
    %cst_12 = arith.constant 1.000000e-07 : f32
    %42 = vector.broadcast %cst_12 : f32 to vector<1x1xf32>
    %43 = arith.addf %39, %42 : vector<1x1xf32>
    %cst_13 = arith.constant 1.000000e+00 : f32
    %44 = vector.broadcast %cst_13 : f32 to vector<1x1xf32>
    %45 = arith.divf %44, %43 : vector<1x1xf32>
    %cst_14 = arith.constant 1.000000e+00 : f32
    %46 = vector.broadcast %cst_14 : f32 to vector<1x1xf32>
    %47 = arith.select %41, %45, %46 : vector<1x1xi1>, vector<1x1xf32>
    %48 = arith.mulf %32, %47 : vector<1x1xf32>
    %49 = arith.mulf %14, %14 : vector<1x32xf32>
    %50 = vector.shape_cast %49 : vector<1x32xf32> to vector<1x1x32xf32>
    %cst_15 = arith.constant dense<0.000000e+00> : vector<1xf32>
    %51 = vector.multi_reduction <add>, %50, %cst_15 [1, 2] : vector<1x1x32xf32> to vector<1xf32>
    %52 = vector.shape_cast %51 : vector<1xf32> to vector<1x1x1xf32>
    %53 = vector.extract %52[0, 0, 0] : f32 from vector<1x1x1xf32>
    %54 = vector.broadcast %53 : f32 to vector<1x1xf32>
    %55 = math.sqrt %54 : vector<1x1xf32>
    %cst_16 = arith.constant 1.000000e+00 : f32
    %56 = vector.broadcast %cst_16 : f32 to vector<1x1xf32>
    %57 = arith.cmpf ogt, %55, %56 : vector<1x1xf32>
    %cst_17 = arith.constant 1.000000e-07 : f32
    %58 = vector.broadcast %cst_17 : f32 to vector<1x1xf32>
    %59 = arith.addf %55, %58 : vector<1x1xf32>
    %cst_18 = arith.constant 1.000000e+00 : f32
    %60 = vector.broadcast %cst_18 : f32 to vector<1x1xf32>
    %61 = arith.divf %60, %59 : vector<1x1xf32>
    %cst_19 = arith.constant 1.000000e+00 : f32
    %62 = vector.broadcast %cst_19 : f32 to vector<1x1xf32>
    %63 = arith.select %57, %61, %62 : vector<1x1xi1>, vector<1x1xf32>
    %64 = arith.mulf %48, %63 : vector<1x1xf32>
    %cst_20 = arith.constant dense<0.000000e+00> : vector<1x32xf32>
    %65 = tpu.matmul %11, %17, %cst_20 {dimension_numbers = #tpu.dot_dimension_numbers<[1], [0], [0], [1], [0, 0, 1, 1], [], []>} : vector<1x32xf32>, vector<32x32xf32>, vector<1x32xf32> -> vector<1x32xf32>
    %66 = arith.mulf %65, %14 : vector<1x32xf32>
    %67 = vector.shape_cast %66 : vector<1x32xf32> to vector<1x1x32xf32>
    %cst_21 = arith.constant dense<0.000000e+00> : vector<1xf32>
    %68 = vector.multi_reduction <add>, %67, %cst_21 [1, 2] : vector<1x1x32xf32> to vector<1xf32>
    %69 = vector.shape_cast %68 : vector<1xf32> to vector<1x1x1xf32>
    %70 = vector.extract %69[0, 0, 0] : f32 from vector<1x1x1xf32>
    %71 = vector.broadcast %70 : f32 to vector<1x1xf32>
    %72 = arith.mulf %64, %71 : vector<1x1xf32>
    %cst_22 = arith.constant 0.000000e+00 : f32
    %73 = vector.broadcast %cst_22 : f32 to vector<1x1xf32>
    %74 = arith.subf %73, %72 : vector<1x1xf32>
    %75 = arith.index_cast %2 : i32 to index
    %76 = memref.load %arg4[%75] : memref<8xi32, #tpu.memory_space<smem>>
    %77 = arith.index_cast %2 : i32 to index
    %78 = memref.load %arg5[%77] : memref<8xi32, #tpu.memory_space<smem>>
    %79 = arith.index_cast %2 : i32 to index
    %80 = memref.load %arg6[%79] : memref<8xi32, #tpu.memory_space<smem>>
    %81 = arith.index_cast %76 : i32 to index
    %c0_23 = arith.constant 0 : index
    %c0_24 = arith.constant 0 : index
    %82 = vector.load %arg7[%81, %c0_23, %c0_24] : memref<50x1x32xf32, #tpu.memory_space<vmem>>, vector<1x1x32xf32>
    %83 = vector.shape_cast %82 : vector<1x1x32xf32> to vector<1x32xf32>
    %84 = arith.index_cast %80 : i32 to index
    %c0_25 = arith.constant 0 : index
    %c0_26 = arith.constant 0 : index
    %85 = vector.load %arg7[%84, %c0_25, %c0_26] : memref<50x1x32xf32, #tpu.memory_space<vmem>>, vector<1x1x32xf32>
    %86 = vector.shape_cast %85 : vector<1x1x32xf32> to vector<1x32xf32>
    %87 = arith.index_cast %78 : i32 to index
    %c0_27 = arith.constant 0 : index
    %c0_28 = arith.constant 0 : index
    %88 = vector.load %arg8[%87, %c0_27, %c0_28] : memref<10x32x32xf32, #tpu.memory_space<vmem>>, vector<1x32x32xf32>
    %89 = vector.shape_cast %88 : vector<1x32x32xf32> to vector<32x32xf32>
    %90 = arith.mulf %83, %83 : vector<1x32xf32>
    %91 = vector.shape_cast %90 : vector<1x32xf32> to vector<1x1x32xf32>
    %cst_29 = arith.constant dense<0.000000e+00> : vector<1xf32>
    %92 = vector.multi_reduction <add>, %91, %cst_29 [1, 2] : vector<1x1x32xf32> to vector<1xf32>
    %93 = vector.shape_cast %92 : vector<1xf32> to vector<1x1x1xf32>
    %94 = vector.extract %93[0, 0, 0] : f32 from vector<1x1x1xf32>
    %95 = vector.broadcast %94 : f32 to vector<1x1xf32>
    %96 = math.sqrt %95 : vector<1x1xf32>
    %cst_30 = arith.constant 1.000000e+00 : f32
    %97 = vector.broadcast %cst_30 : f32 to vector<1x1xf32>
    %98 = arith.cmpf ogt, %96, %97 : vector<1x1xf32>
    %cst_31 = arith.constant 1.000000e-07 : f32
    %99 = vector.broadcast %cst_31 : f32 to vector<1x1xf32>
    %100 = arith.addf %96, %99 : vector<1x1xf32>
    %cst_32 = arith.constant 1.000000e+00 : f32
    %101 = vector.broadcast %cst_32 : f32 to vector<1x1xf32>
    %102 = arith.divf %101, %100 : vector<1x1xf32>
    %cst_33 = arith.constant 1.000000e+00 : f32
    %103 = vector.broadcast %cst_33 : f32 to vector<1x1xf32>
    %104 = arith.select %98, %102, %103 : vector<1x1xi1>, vector<1x1xf32>
    %105 = arith.mulf %89, %89 : vector<32x32xf32>
    %106 = vector.shape_cast %105 : vector<32x32xf32> to vector<1x32x32xf32>
    %cst_34 = arith.constant dense<0.000000e+00> : vector<1xf32>
    %107 = vector.multi_reduction <add>, %106, %cst_34 [1, 2] : vector<1x32x32xf32> to vector<1xf32>
    %108 = vector.shape_cast %107 : vector<1xf32> to vector<1x1x1xf32>
    %109 = vector.extract %108[0, 0, 0] : f32 from vector<1x1x1xf32>
    %110 = vector.broadcast %109 : f32 to vector<1x1xf32>
    %111 = math.sqrt %110 : vector<1x1xf32>
    %cst_35 = arith.constant 1.000000e+00 : f32
    %112 = vector.broadcast %cst_35 : f32 to vector<1x1xf32>
    %113 = arith.cmpf ogt, %111, %112 : vector<1x1xf32>
    %cst_36 = arith.constant 1.000000e-07 : f32
    %114 = vector.broadcast %cst_36 : f32 to vector<1x1xf32>
    %115 = arith.addf %111, %114 : vector<1x1xf32>
    %cst_37 = arith.constant 1.000000e+00 : f32
    %116 = vector.broadcast %cst_37 : f32 to vector<1x1xf32>
    %117 = arith.divf %116, %115 : vector<1x1xf32>
    %cst_38 = arith.constant 1.000000e+00 : f32
    %118 = vector.broadcast %cst_38 : f32 to vector<1x1xf32>
    %119 = arith.select %113, %117, %118 : vector<1x1xi1>, vector<1x1xf32>
    %120 = arith.mulf %104, %119 : vector<1x1xf32>
    %121 = arith.mulf %86, %86 : vector<1x32xf32>
    %122 = vector.shape_cast %121 : vector<1x32xf32> to vector<1x1x32xf32>
    %cst_39 = arith.constant dense<0.000000e+00> : vector<1xf32>
    %123 = vector.multi_reduction <add>, %122, %cst_39 [1, 2] : vector<1x1x32xf32> to vector<1xf32>
    %124 = vector.shape_cast %123 : vector<1xf32> to vector<1x1x1xf32>
    %125 = vector.extract %124[0, 0, 0] : f32 from vector<1x1x1xf32>
    %126 = vector.broadcast %125 : f32 to vector<1x1xf32>
    %127 = math.sqrt %126 : vector<1x1xf32>
    %cst_40 = arith.constant 1.000000e+00 : f32
    %128 = vector.broadcast %cst_40 : f32 to vector<1x1xf32>
    %129 = arith.cmpf ogt, %127, %128 : vector<1x1xf32>
    %cst_41 = arith.constant 1.000000e-07 : f32
    %130 = vector.broadcast %cst_41 : f32 to vector<1x1xf32>
    %131 = arith.addf %127, %130 : vector<1x1xf32>
    %cst_42 = arith.constant 1.000000e+00 : f32
    %132 = vector.broadcast %cst_42 : f32 to vector<1x1xf32>
    %133 = arith.divf %132, %131 : vector<1x1xf32>
    %cst_43 = arith.constant 1.000000e+00 : f32
    %134 = vector.broadcast %cst_43 : f32 to vector<1x1xf32>
    %135 = arith.select %129, %133, %134 : vector<1x1xi1>, vector<1x1xf32>
    %136 = arith.mulf %120, %135 : vector<1x1xf32>
    %cst_44 = arith.constant dense<0.000000e+00> : vector<1x32xf32>
    %137 = tpu.matmul %83, %89, %cst_44 {dimension_numbers = #tpu.dot_dimension_numbers<[1], [0], [0], [1], [0, 0, 1, 1], [], []>} : vector<1x32xf32>, vector<32x32xf32>, vector<1x32xf32> -> vector<1x32xf32>
    %138 = arith.mulf %137, %86 : vector<1x32xf32>
    %139 = vector.shape_cast %138 : vector<1x32xf32> to vector<1x1x32xf32>
    %cst_45 = arith.constant dense<0.000000e+00> : vector<1xf32>
    %140 = vector.multi_reduction <add>, %139, %cst_45 [1, 2] : vector<1x1x32xf32> to vector<1xf32>
    %141 = vector.shape_cast %140 : vector<1xf32> to vector<1x1x1xf32>
    %142 = vector.extract %141[0, 0, 0] : f32 from vector<1x1x1xf32>
    %143 = vector.broadcast %142 : f32 to vector<1x1xf32>
    %144 = arith.mulf %136, %143 : vector<1x1xf32>
    %cst_46 = arith.constant 0.000000e+00 : f32
    %145 = vector.broadcast %cst_46 : f32 to vector<1x1xf32>
    %146 = arith.subf %145, %144 : vector<1x1xf32>
    %147 = arith.subf %74, %146 : vector<1x1xf32>
    %cst_47 = arith.constant 1.000000e+00 : f32
    %148 = vector.broadcast %cst_47 : f32 to vector<1x1xf32>
    %149 = arith.addf %147, %148 : vector<1x1xf32>
    %cst_48 = arith.constant 0.000000e+00 : f32
    %150 = vector.broadcast %cst_48 : f32 to vector<1x1xf32>
    %151 = arith.maximumf %149, %150 : vector<1x1xf32>
    %c8_i32_49 = arith.constant 8 : i32
    %152 = arith.cmpi slt, %2, %c8_i32_49 : i32
    %cst_50 = arith.constant 0.000000e+00 : f32
    %153 = vector.broadcast %cst_50 : f32 to vector<1x1xf32>
    %154 = arith.select %152, %151, %153 : vector<1x1xf32>
    %155 = arith.addf %1, %154 : vector<1x1xf32>
    %c1_i32 = arith.constant 1 : i32
    %156 = arith.addi %0, %c1_i32 : i32
    %157 = arith.index_cast %156 : i32 to index
    %158 = memref.load %arg1[%157] : memref<8xi32, #tpu.memory_space<smem>>
    %159 = arith.index_cast %156 : i32 to index
    %160 = memref.load %arg2[%159] : memref<8xi32, #tpu.memory_space<smem>>
    %161 = arith.index_cast %156 : i32 to index
    %162 = memref.load %arg3[%161] : memref<8xi32, #tpu.memory_space<smem>>
    %163 = arith.index_cast %158 : i32 to index
    %c0_51 = arith.constant 0 : index
    %c0_52 = arith.constant 0 : index
    %164 = vector.load %arg7[%163, %c0_51, %c0_52] : memref<50x1x32xf32, #tpu.memory_space<vmem>>, vector<1x1x32xf32>
    %165 = vector.shape_cast %164 : vector<1x1x32xf32> to vector<1x32xf32>
    %166 = arith.index_cast %162 : i32 to index
    %c0_53 = arith.constant 0 : index
    %c0_54 = arith.constant 0 : index
    %167 = vector.load %arg7[%166, %c0_53, %c0_54] : memref<50x1x32xf32, #tpu.memory_space<vmem>>, vector<1x1x32xf32>
    %168 = vector.shape_cast %167 : vector<1x1x32xf32> to vector<1x32xf32>
    %169 = arith.index_cast %160 : i32 to index
    %c0_55 = arith.constant 0 : index
    %c0_56 = arith.constant 0 : index
    %170 = vector.load %arg8[%169, %c0_55, %c0_56] : memref<10x32x32xf32, #tpu.memory_space<vmem>>, vector<1x32x32xf32>
    %171 = vector.shape_cast %170 : vector<1x32x32xf32> to vector<32x32xf32>
    %172 = arith.mulf %165, %165 : vector<1x32xf32>
    %173 = vector.shape_cast %172 : vector<1x32xf32> to vector<1x1x32xf32>
    %cst_57 = arith.constant dense<0.000000e+00> : vector<1xf32>
    %174 = vector.multi_reduction <add>, %173, %cst_57 [1, 2] : vector<1x1x32xf32> to vector<1xf32>
    %175 = vector.shape_cast %174 : vector<1xf32> to vector<1x1x1xf32>
    %176 = vector.extract %175[0, 0, 0] : f32 from vector<1x1x1xf32>
    %177 = vector.broadcast %176 : f32 to vector<1x1xf32>
    %178 = math.sqrt %177 : vector<1x1xf32>
    %cst_58 = arith.constant 1.000000e+00 : f32
    %179 = vector.broadcast %cst_58 : f32 to vector<1x1xf32>
    %180 = arith.cmpf ogt, %178, %179 : vector<1x1xf32>
    %cst_59 = arith.constant 1.000000e-07 : f32
    %181 = vector.broadcast %cst_59 : f32 to vector<1x1xf32>
    %182 = arith.addf %178, %181 : vector<1x1xf32>
    %cst_60 = arith.constant 1.000000e+00 : f32
    %183 = vector.broadcast %cst_60 : f32 to vector<1x1xf32>
    %184 = arith.divf %183, %182 : vector<1x1xf32>
    %cst_61 = arith.constant 1.000000e+00 : f32
    %185 = vector.broadcast %cst_61 : f32 to vector<1x1xf32>
    %186 = arith.select %180, %184, %185 : vector<1x1xi1>, vector<1x1xf32>
    %187 = arith.mulf %171, %171 : vector<32x32xf32>
    %188 = vector.shape_cast %187 : vector<32x32xf32> to vector<1x32x32xf32>
    %cst_62 = arith.constant dense<0.000000e+00> : vector<1xf32>
    %189 = vector.multi_reduction <add>, %188, %cst_62 [1, 2] : vector<1x32x32xf32> to vector<1xf32>
    %190 = vector.shape_cast %189 : vector<1xf32> to vector<1x1x1xf32>
    %191 = vector.extract %190[0, 0, 0] : f32 from vector<1x1x1xf32>
    %192 = vector.broadcast %191 : f32 to vector<1x1xf32>
    %193 = math.sqrt %192 : vector<1x1xf32>
    %cst_63 = arith.constant 1.000000e+00 : f32
    %194 = vector.broadcast %cst_63 : f32 to vector<1x1xf32>
    %195 = arith.cmpf ogt, %193, %194 : vector<1x1xf32>
    %cst_64 = arith.constant 1.000000e-07 : f32
    %196 = vector.broadcast %cst_64 : f32 to vector<1x1xf32>
    %197 = arith.addf %193, %196 : vector<1x1xf32>
    %cst_65 = arith.constant 1.000000e+00 : f32
    %198 = vector.broadcast %cst_65 : f32 to vector<1x1xf32>
    %199 = arith.divf %198, %197 : vector<1x1xf32>
    %cst_66 = arith.constant 1.000000e+00 : f32
    %200 = vector.broadcast %cst_66 : f32 to vector<1x1xf32>
    %201 = arith.select %195, %199, %200 : vector<1x1xi1>, vector<1x1xf32>
    %202 = arith.mulf %186, %201 : vector<1x1xf32>
    %203 = arith.mulf %168, %168 : vector<1x32xf32>
    %204 = vector.shape_cast %203 : vector<1x32xf32> to vector<1x1x32xf32>
    %cst_67 = arith.constant dense<0.000000e+00> : vector<1xf32>
    %205 = vector.multi_reduction <add>, %204, %cst_67 [1, 2] : vector<1x1x32xf32> to vector<1xf32>
    %206 = vector.shape_cast %205 : vector<1xf32> to vector<1x1x1xf32>
    %207 = vector.extract %206[0, 0, 0] : f32 from vector<1x1x1xf32>
    %208 = vector.broadcast %207 : f32 to vector<1x1xf32>
    %209 = math.sqrt %208 : vector<1x1xf32>
    %cst_68 = arith.constant 1.000000e+00 : f32
    %210 = vector.broadcast %cst_68 : f32 to vector<1x1xf32>
    %211 = arith.cmpf ogt, %209, %210 : vector<1x1xf32>
    %cst_69 = arith.constant 1.000000e-07 : f32
    %212 = vector.broadcast %cst_69 : f32 to vector<1x1xf32>
    %213 = arith.addf %209, %212 : vector<1x1xf32>
    %cst_70 = arith.constant 1.000000e+00 : f32
    %214 = vector.broadcast %cst_70 : f32 to vector<1x1xf32>
    %215 = arith.divf %214, %213 : vector<1x1xf32>
    %cst_71 = arith.constant 1.000000e+00 : f32
    %216 = vector.broadcast %cst_71 : f32 to vector<1x1xf32>
    %217 = arith.select %211, %215, %216 : vector<1x1xi1>, vector<1x1xf32>
    %218 = arith.mulf %202, %217 : vector<1x1xf32>
    %cst_72 = arith.constant dense<0.000000e+00> : vector<1x32xf32>
    %219 = tpu.matmul %165, %171, %cst_72 {dimension_numbers = #tpu.dot_dimension_numbers<[1], [0], [0], [1], [0, 0, 1, 1], [], []>} : vector<1x32xf32>, vector<32x32xf32>, vector<1x32xf32> -> vector<1x32xf32>
    %220 = arith.mulf %219, %168 : vector<1x32xf32>
    %221 = vector.shape_cast %220 : vector<1x32xf32> to vector<1x1x32xf32>
    %cst_73 = arith.constant dense<0.000000e+00> : vector<1xf32>
    %222 = vector.multi_reduction <add>, %221, %cst_73 [1, 2] : vector<1x1x32xf32> to vector<1xf32>
    %223 = vector.shape_cast %222 : vector<1xf32> to vector<1x1x1xf32>
    %224 = vector.extract %223[0, 0, 0] : f32 from vector<1x1x1xf32>
    %225 = vector.broadcast %224 : f32 to vector<1x1xf32>
    %226 = arith.mulf %218, %225 : vector<1x1xf32>
    %cst_74 = arith.constant 0.000000e+00 : f32
    %227 = vector.broadcast %cst_74 : f32 to vector<1x1xf32>
    %228 = arith.subf %227, %226 : vector<1x1xf32>
    %229 = arith.index_cast %156 : i32 to index
    %230 = memref.load %arg4[%229] : memref<8xi32, #tpu.memory_space<smem>>
    %231 = arith.index_cast %156 : i32 to index
    %232 = memref.load %arg5[%231] : memref<8xi32, #tpu.memory_space<smem>>
    %233 = arith.index_cast %156 : i32 to index
    %234 = memref.load %arg6[%233] : memref<8xi32, #tpu.memory_space<smem>>
    %235 = arith.index_cast %230 : i32 to index
    %c0_75 = arith.constant 0 : index
    %c0_76 = arith.constant 0 : index
    %236 = vector.load %arg7[%235, %c0_75, %c0_76] : memref<50x1x32xf32, #tpu.memory_space<vmem>>, vector<1x1x32xf32>
    %237 = vector.shape_cast %236 : vector<1x1x32xf32> to vector<1x32xf32>
    %238 = arith.index_cast %234 : i32 to index
    %c0_77 = arith.constant 0 : index
    %c0_78 = arith.constant 0 : index
    %239 = vector.load %arg7[%238, %c0_77, %c0_78] : memref<50x1x32xf32, #tpu.memory_space<vmem>>, vector<1x1x32xf32>
    %240 = vector.shape_cast %239 : vector<1x1x32xf32> to vector<1x32xf32>
    %241 = arith.index_cast %232 : i32 to index
    %c0_79 = arith.constant 0 : index
    %c0_80 = arith.constant 0 : index
    %242 = vector.load %arg8[%241, %c0_79, %c0_80] : memref<10x32x32xf32, #tpu.memory_space<vmem>>, vector<1x32x32xf32>
    %243 = vector.shape_cast %242 : vector<1x32x32xf32> to vector<32x32xf32>
    %244 = arith.mulf %237, %237 : vector<1x32xf32>
    %245 = vector.shape_cast %244 : vector<1x32xf32> to vector<1x1x32xf32>
    %cst_81 = arith.constant dense<0.000000e+00> : vector<1xf32>
    %246 = vector.multi_reduction <add>, %245, %cst_81 [1, 2] : vector<1x1x32xf32> to vector<1xf32>
    %247 = vector.shape_cast %246 : vector<1xf32> to vector<1x1x1xf32>
    %248 = vector.extract %247[0, 0, 0] : f32 from vector<1x1x1xf32>
    %249 = vector.broadcast %248 : f32 to vector<1x1xf32>
    %250 = math.sqrt %249 : vector<1x1xf32>
    %cst_82 = arith.constant 1.000000e+00 : f32
    %251 = vector.broadcast %cst_82 : f32 to vector<1x1xf32>
    %252 = arith.cmpf ogt, %250, %251 : vector<1x1xf32>
    %cst_83 = arith.constant 1.000000e-07 : f32
    %253 = vector.broadcast %cst_83 : f32 to vector<1x1xf32>
    %254 = arith.addf %250, %253 : vector<1x1xf32>
    %cst_84 = arith.constant 1.000000e+00 : f32
    %255 = vector.broadcast %cst_84 : f32 to vector<1x1xf32>
    %256 = arith.divf %255, %254 : vector<1x1xf32>
    %cst_85 = arith.constant 1.000000e+00 : f32
    %257 = vector.broadcast %cst_85 : f32 to vector<1x1xf32>
    %258 = arith.select %252, %256, %257 : vector<1x1xi1>, vector<1x1xf32>
    %259 = arith.mulf %243, %243 : vector<32x32xf32>
    %260 = vector.shape_cast %259 : vector<32x32xf32> to vector<1x32x32xf32>
    %cst_86 = arith.constant dense<0.000000e+00> : vector<1xf32>
    %261 = vector.multi_reduction <add>, %260, %cst_86 [1, 2] : vector<1x32x32xf32> to vector<1xf32>
    %262 = vector.shape_cast %261 : vector<1xf32> to vector<1x1x1xf32>
    %263 = vector.extract %262[0, 0, 0] : f32 from vector<1x1x1xf32>
    %264 = vector.broadcast %263 : f32 to vector<1x1xf32>
    %265 = math.sqrt %264 : vector<1x1xf32>
    %cst_87 = arith.constant 1.000000e+00 : f32
    %266 = vector.broadcast %cst_87 : f32 to vector<1x1xf32>
    %267 = arith.cmpf ogt, %265, %266 : vector<1x1xf32>
    %cst_88 = arith.constant 1.000000e-07 : f32
    %268 = vector.broadcast %cst_88 : f32 to vector<1x1xf32>
    %269 = arith.addf %265, %268 : vector<1x1xf32>
    %cst_89 = arith.constant 1.000000e+00 : f32
    %270 = vector.broadcast %cst_89 : f32 to vector<1x1xf32>
    %271 = arith.divf %270, %269 : vector<1x1xf32>
    %cst_90 = arith.constant 1.000000e+00 : f32
    %272 = vector.broadcast %cst_90 : f32 to vector<1x1xf32>
    %273 = arith.select %267, %271, %272 : vector<1x1xi1>, vector<1x1xf32>
    %274 = arith.mulf %258, %273 : vector<1x1xf32>
    %275 = arith.mulf %240, %240 : vector<1x32xf32>
    %276 = vector.shape_cast %275 : vector<1x32xf32> to vector<1x1x32xf32>
    %cst_91 = arith.constant dense<0.000000e+00> : vector<1xf32>
    %277 = vector.multi_reduction <add>, %276, %cst_91 [1, 2] : vector<1x1x32xf32> to vector<1xf32>
    %278 = vector.shape_cast %277 : vector<1xf32> to vector<1x1x1xf32>
    %279 = vector.extract %278[0, 0, 0] : f32 from vector<1x1x1xf32>
    %280 = vector.broadcast %279 : f32 to vector<1x1xf32>
    %281 = math.sqrt %280 : vector<1x1xf32>
    %cst_92 = arith.constant 1.000000e+00 : f32
    %282 = vector.broadcast %cst_92 : f32 to vector<1x1xf32>
    %283 = arith.cmpf ogt, %281, %282 : vector<1x1xf32>
    %cst_93 = arith.constant 1.000000e-07 : f32
    %284 = vector.broadcast %cst_93 : f32 to vector<1x1xf32>
    %285 = arith.addf %281, %284 : vector<1x1xf32>
    %cst_94 = arith.constant 1.000000e+00 : f32
    %286 = vector.broadcast %cst_94 : f32 to vector<1x1xf32>
    %287 = arith.divf %286, %285 : vector<1x1xf32>
    %cst_95 = arith.constant 1.000000e+00 : f32
    %288 = vector.broadcast %cst_95 : f32 to vector<1x1xf32>
    %289 = arith.select %283, %287, %288 : vector<1x1xi1>, vector<1x1xf32>
    %290 = arith.mulf %274, %289 : vector<1x1xf32>
    %cst_96 = arith.constant dense<0.000000e+00> : vector<1x32xf32>
    %291 = tpu.matmul %237, %243, %cst_96 {dimension_numbers = #tpu.dot_dimension_numbers<[1], [0], [0], [1], [0, 0, 1, 1], [], []>} : vector<1x32xf32>, vector<32x32xf32>, vector<1x32xf32> -> vector<1x32xf32>
    %292 = arith.mulf %291, %240 : vector<1x32xf32>
    %293 = vector.shape_cast %292 : vector<1x32xf32> to vector<1x1x32xf32>
    %cst_97 = arith.constant dense<0.000000e+00> : vector<1xf32>
    %294 = vector.multi_reduction <add>, %293, %cst_97 [1, 2] : vector<1x1x32xf32> to vector<1xf32>
    %295 = vector.shape_cast %294 : vector<1xf32> to vector<1x1x1xf32>
    %296 = vector.extract %295[0, 0, 0] : f32 from vector<1x1x1xf32>
    %297 = vector.broadcast %296 : f32 to vector<1x1xf32>
    %298 = arith.mulf %290, %297 : vector<1x1xf32>
    %cst_98 = arith.constant 0.000000e+00 : f32
    %299 = vector.broadcast %cst_98 : f32 to vector<1x1xf32>
    %300 = arith.subf %299, %298 : vector<1x1xf32>
    %301 = arith.subf %228, %300 : vector<1x1xf32>
    %cst_99 = arith.constant 1.000000e+00 : f32
    %302 = vector.broadcast %cst_99 : f32 to vector<1x1xf32>
    %303 = arith.addf %301, %302 : vector<1x1xf32>
    %cst_100 = arith.constant 0.000000e+00 : f32
    %304 = vector.broadcast %cst_100 : f32 to vector<1x1xf32>
    %305 = arith.maximumf %303, %304 : vector<1x1xf32>
    %c8_i32_101 = arith.constant 8 : i32
    %306 = arith.cmpi slt, %156, %c8_i32_101 : i32
    %cst_102 = arith.constant 0.000000e+00 : f32
    %307 = vector.broadcast %cst_102 : f32 to vector<1x1xf32>
    %308 = arith.select %306, %305, %307 : vector<1x1xf32>
    %309 = arith.addf %155, %308 : vector<1x1xf32>
    %c2_i32 = arith.constant 2 : i32
    %310 = arith.addi %0, %c2_i32 : i32
    %311 = arith.index_cast %310 : i32 to index
    %312 = memref.load %arg1[%311] : memref<8xi32, #tpu.memory_space<smem>>
    %313 = arith.index_cast %310 : i32 to index
    %314 = memref.load %arg2[%313] : memref<8xi32, #tpu.memory_space<smem>>
    %315 = arith.index_cast %310 : i32 to index
    %316 = memref.load %arg3[%315] : memref<8xi32, #tpu.memory_space<smem>>
    %317 = arith.index_cast %312 : i32 to index
    %c0_103 = arith.constant 0 : index
    %c0_104 = arith.constant 0 : index
    %318 = vector.load %arg7[%317, %c0_103, %c0_104] : memref<50x1x32xf32, #tpu.memory_space<vmem>>, vector<1x1x32xf32>
    %319 = vector.shape_cast %318 : vector<1x1x32xf32> to vector<1x32xf32>
    %320 = arith.index_cast %316 : i32 to index
    %c0_105 = arith.constant 0 : index
    %c0_106 = arith.constant 0 : index
    %321 = vector.load %arg7[%320, %c0_105, %c0_106] : memref<50x1x32xf32, #tpu.memory_space<vmem>>, vector<1x1x32xf32>
    %322 = vector.shape_cast %321 : vector<1x1x32xf32> to vector<1x32xf32>
    %323 = arith.index_cast %314 : i32 to index
    %c0_107 = arith.constant 0 : index
    %c0_108 = arith.constant 0 : index
    %324 = vector.load %arg8[%323, %c0_107, %c0_108] : memref<10x32x32xf32, #tpu.memory_space<vmem>>, vector<1x32x32xf32>
    %325 = vector.shape_cast %324 : vector<1x32x32xf32> to vector<32x32xf32>
    %326 = arith.mulf %319, %319 : vector<1x32xf32>
    %327 = vector.shape_cast %326 : vector<1x32xf32> to vector<1x1x32xf32>
    %cst_109 = arith.constant dense<0.000000e+00> : vector<1xf32>
    %328 = vector.multi_reduction <add>, %327, %cst_109 [1, 2] : vector<1x1x32xf32> to vector<1xf32>
    %329 = vector.shape_cast %328 : vector<1xf32> to vector<1x1x1xf32>
    %330 = vector.extract %329[0, 0, 0] : f32 from vector<1x1x1xf32>
    %331 = vector.broadcast %330 : f32 to vector<1x1xf32>
    %332 = math.sqrt %331 : vector<1x1xf32>
    %cst_110 = arith.constant 1.000000e+00 : f32
    %333 = vector.broadcast %cst_110 : f32 to vector<1x1xf32>
    %334 = arith.cmpf ogt, %332, %333 : vector<1x1xf32>
    %cst_111 = arith.constant 1.000000e-07 : f32
    %335 = vector.broadcast %cst_111 : f32 to vector<1x1xf32>
    %336 = arith.addf %332, %335 : vector<1x1xf32>
    %cst_112 = arith.constant 1.000000e+00 : f32
    %337 = vector.broadcast %cst_112 : f32 to vector<1x1xf32>
    %338 = arith.divf %337, %336 : vector<1x1xf32>
    %cst_113 = arith.constant 1.000000e+00 : f32
    %339 = vector.broadcast %cst_113 : f32 to vector<1x1xf32>
    %340 = arith.select %334, %338, %339 : vector<1x1xi1>, vector<1x1xf32>
    %341 = arith.mulf %325, %325 : vector<32x32xf32>
    %342 = vector.shape_cast %341 : vector<32x32xf32> to vector<1x32x32xf32>
    %cst_114 = arith.constant dense<0.000000e+00> : vector<1xf32>
    %343 = vector.multi_reduction <add>, %342, %cst_114 [1, 2] : vector<1x32x32xf32> to vector<1xf32>
    %344 = vector.shape_cast %343 : vector<1xf32> to vector<1x1x1xf32>
    %345 = vector.extract %344[0, 0, 0] : f32 from vector<1x1x1xf32>
    %346 = vector.broadcast %345 : f32 to vector<1x1xf32>
    %347 = math.sqrt %346 : vector<1x1xf32>
    %cst_115 = arith.constant 1.000000e+00 : f32
    %348 = vector.broadcast %cst_115 : f32 to vector<1x1xf32>
    %349 = arith.cmpf ogt, %347, %348 : vector<1x1xf32>
    %cst_116 = arith.constant 1.000000e-07 : f32
    %350 = vector.broadcast %cst_116 : f32 to vector<1x1xf32>
    %351 = arith.addf %347, %350 : vector<1x1xf32>
    %cst_117 = arith.constant 1.000000e+00 : f32
    %352 = vector.broadcast %cst_117 : f32 to vector<1x1xf32>
    %353 = arith.divf %352, %351 : vector<1x1xf32>
    %cst_118 = arith.constant 1.000000e+00 : f32
    %354 = vector.broadcast %cst_118 : f32 to vector<1x1xf32>
    %355 = arith.select %349, %353, %354 : vector<1x1xi1>, vector<1x1xf32>
    %356 = arith.mulf %340, %355 : vector<1x1xf32>
    %357 = arith.mulf %322, %322 : vector<1x32xf32>
    %358 = vector.shape_cast %357 : vector<1x32xf32> to vector<1x1x32xf32>
    %cst_119 = arith.constant dense<0.000000e+00> : vector<1xf32>
    %359 = vector.multi_reduction <add>, %358, %cst_119 [1, 2] : vector<1x1x32xf32> to vector<1xf32>
    %360 = vector.shape_cast %359 : vector<1xf32> to vector<1x1x1xf32>
    %361 = vector.extract %360[0, 0, 0] : f32 from vector<1x1x1xf32>
    %362 = vector.broadcast %361 : f32 to vector<1x1xf32>
    %363 = math.sqrt %362 : vector<1x1xf32>
    %cst_120 = arith.constant 1.000000e+00 : f32
    %364 = vector.broadcast %cst_120 : f32 to vector<1x1xf32>
    %365 = arith.cmpf ogt, %363, %364 : vector<1x1xf32>
    %cst_121 = arith.constant 1.000000e-07 : f32
    %366 = vector.broadcast %cst_121 : f32 to vector<1x1xf32>
    %367 = arith.addf %363, %366 : vector<1x1xf32>
    %cst_122 = arith.constant 1.000000e+00 : f32
    %368 = vector.broadcast %cst_122 : f32 to vector<1x1xf32>
    %369 = arith.divf %368, %367 : vector<1x1xf32>
    %cst_123 = arith.constant 1.000000e+00 : f32
    %370 = vector.broadcast %cst_123 : f32 to vector<1x1xf32>
    %371 = arith.select %365, %369, %370 : vector<1x1xi1>, vector<1x1xf32>
    %372 = arith.mulf %356, %371 : vector<1x1xf32>
    %cst_124 = arith.constant dense<0.000000e+00> : vector<1x32xf32>
    %373 = tpu.matmul %319, %325, %cst_124 {dimension_numbers = #tpu.dot_dimension_numbers<[1], [0], [0], [1], [0, 0, 1, 1], [], []>} : vector<1x32xf32>, vector<32x32xf32>, vector<1x32xf32> -> vector<1x32xf32>
    %374 = arith.mulf %373, %322 : vector<1x32xf32>
    %375 = vector.shape_cast %374 : vector<1x32xf32> to vector<1x1x32xf32>
    %cst_125 = arith.constant dense<0.000000e+00> : vector<1xf32>
    %376 = vector.multi_reduction <add>, %375, %cst_125 [1, 2] : vector<1x1x32xf32> to vector<1xf32>
    %377 = vector.shape_cast %376 : vector<1xf32> to vector<1x1x1xf32>
    %378 = vector.extract %377[0, 0, 0] : f32 from vector<1x1x1xf32>
    %379 = vector.broadcast %378 : f32 to vector<1x1xf32>
    %380 = arith.mulf %372, %379 : vector<1x1xf32>
    %cst_126 = arith.constant 0.000000e+00 : f32
    %381 = vector.broadcast %cst_126 : f32 to vector<1x1xf32>
    %382 = arith.subf %381, %380 : vector<1x1xf32>
    %383 = arith.index_cast %310 : i32 to index
    %384 = memref.load %arg4[%383] : memref<8xi32, #tpu.memory_space<smem>>
    %385 = arith.index_cast %310 : i32 to index
    %386 = memref.load %arg5[%385] : memref<8xi32, #tpu.memory_space<smem>>
    %387 = arith.index_cast %310 : i32 to index
    %388 = memref.load %arg6[%387] : memref<8xi32, #tpu.memory_space<smem>>
    %389 = arith.index_cast %384 : i32 to index
    %c0_127 = arith.constant 0 : index
    %c0_128 = arith.constant 0 : index
    %390 = vector.load %arg7[%389, %c0_127, %c0_128] : memref<50x1x32xf32, #tpu.memory_space<vmem>>, vector<1x1x32xf32>
    %391 = vector.shape_cast %390 : vector<1x1x32xf32> to vector<1x32xf32>
    %392 = arith.index_cast %388 : i32 to index
    %c0_129 = arith.constant 0 : index
    %c0_130 = arith.constant 0 : index
    %393 = vector.load %arg7[%392, %c0_129, %c0_130] : memref<50x1x32xf32, #tpu.memory_space<vmem>>, vector<1x1x32xf32>
    %394 = vector.shape_cast %393 : vector<1x1x32xf32> to vector<1x32xf32>
    %395 = arith.index_cast %386 : i32 to index
    %c0_131 = arith.constant 0 : index
    %c0_132 = arith.constant 0 : index
    %396 = vector.load %arg8[%395, %c0_131, %c0_132] : memref<10x32x32xf32, #tpu.memory_space<vmem>>, vector<1x32x32xf32>
    %397 = vector.shape_cast %396 : vector<1x32x32xf32> to vector<32x32xf32>
    %398 = arith.mulf %391, %391 : vector<1x32xf32>
    %399 = vector.shape_cast %398 : vector<1x32xf32> to vector<1x1x32xf32>
    %cst_133 = arith.constant dense<0.000000e+00> : vector<1xf32>
    %400 = vector.multi_reduction <add>, %399, %cst_133 [1, 2] : vector<1x1x32xf32> to vector<1xf32>
    %401 = vector.shape_cast %400 : vector<1xf32> to vector<1x1x1xf32>
    %402 = vector.extract %401[0, 0, 0] : f32 from vector<1x1x1xf32>
    %403 = vector.broadcast %402 : f32 to vector<1x1xf32>
    %404 = math.sqrt %403 : vector<1x1xf32>
    %cst_134 = arith.constant 1.000000e+00 : f32
    %405 = vector.broadcast %cst_134 : f32 to vector<1x1xf32>
    %406 = arith.cmpf ogt, %404, %405 : vector<1x1xf32>
    %cst_135 = arith.constant 1.000000e-07 : f32
    %407 = vector.broadcast %cst_135 : f32 to vector<1x1xf32>
    %408 = arith.addf %404, %407 : vector<1x1xf32>
    %cst_136 = arith.constant 1.000000e+00 : f32
    %409 = vector.broadcast %cst_136 : f32 to vector<1x1xf32>
    %410 = arith.divf %409, %408 : vector<1x1xf32>
    %cst_137 = arith.constant 1.000000e+00 : f32
    %411 = vector.broadcast %cst_137 : f32 to vector<1x1xf32>
    %412 = arith.select %406, %410, %411 : vector<1x1xi1>, vector<1x1xf32>
    %413 = arith.mulf %397, %397 : vector<32x32xf32>
    %414 = vector.shape_cast %413 : vector<32x32xf32> to vector<1x32x32xf32>
    %cst_138 = arith.constant dense<0.000000e+00> : vector<1xf32>
    %415 = vector.multi_reduction <add>, %414, %cst_138 [1, 2] : vector<1x32x32xf32> to vector<1xf32>
    %416 = vector.shape_cast %415 : vector<1xf32> to vector<1x1x1xf32>
    %417 = vector.extract %416[0, 0, 0] : f32 from vector<1x1x1xf32>
    %418 = vector.broadcast %417 : f32 to vector<1x1xf32>
    %419 = math.sqrt %418 : vector<1x1xf32>
    %cst_139 = arith.constant 1.000000e+00 : f32
    %420 = vector.broadcast %cst_139 : f32 to vector<1x1xf32>
    %421 = arith.cmpf ogt, %419, %420 : vector<1x1xf32>
    %cst_140 = arith.constant 1.000000e-07 : f32
    %422 = vector.broadcast %cst_140 : f32 to vector<1x1xf32>
    %423 = arith.addf %419, %422 : vector<1x1xf32>
    %cst_141 = arith.constant 1.000000e+00 : f32
    %424 = vector.broadcast %cst_141 : f32 to vector<1x1xf32>
    %425 = arith.divf %424, %423 : vector<1x1xf32>
    %cst_142 = arith.constant 1.000000e+00 : f32
    %426 = vector.broadcast %cst_142 : f32 to vector<1x1xf32>
    %427 = arith.select %421, %425, %426 : vector<1x1xi1>, vector<1x1xf32>
    %428 = arith.mulf %412, %427 : vector<1x1xf32>
    %429 = arith.mulf %394, %394 : vector<1x32xf32>
    %430 = vector.shape_cast %429 : vector<1x32xf32> to vector<1x1x32xf32>
    %cst_143 = arith.constant dense<0.000000e+00> : vector<1xf32>
    %431 = vector.multi_reduction <add>, %430, %cst_143 [1, 2] : vector<1x1x32xf32> to vector<1xf32>
    %432 = vector.shape_cast %431 : vector<1xf32> to vector<1x1x1xf32>
    %433 = vector.extract %432[0, 0, 0] : f32 from vector<1x1x1xf32>
    %434 = vector.broadcast %433 : f32 to vector<1x1xf32>
    %435 = math.sqrt %434 : vector<1x1xf32>
    %cst_144 = arith.constant 1.000000e+00 : f32
    %436 = vector.broadcast %cst_144 : f32 to vector<1x1xf32>
    %437 = arith.cmpf ogt, %435, %436 : vector<1x1xf32>
    %cst_145 = arith.constant 1.000000e-07 : f32
    %438 = vector.broadcast %cst_145 : f32 to vector<1x1xf32>
    %439 = arith.addf %435, %438 : vector<1x1xf32>
    %cst_146 = arith.constant 1.000000e+00 : f32
    %440 = vector.broadcast %cst_146 : f32 to vector<1x1xf32>
    %441 = arith.divf %440, %439 : vector<1x1xf32>
    %cst_147 = arith.constant 1.000000e+00 : f32
    %442 = vector.broadcast %cst_147 : f32 to vector<1x1xf32>
    %443 = arith.select %437, %441, %442 : vector<1x1xi1>, vector<1x1xf32>
    %444 = arith.mulf %428, %443 : vector<1x1xf32>
    %cst_148 = arith.constant dense<0.000000e+00> : vector<1x32xf32>
    %445 = tpu.matmul %391, %397, %cst_148 {dimension_numbers = #tpu.dot_dimension_numbers<[1], [0], [0], [1], [0, 0, 1, 1], [], []>} : vector<1x32xf32>, vector<32x32xf32>, vector<1x32xf32> -> vector<1x32xf32>
    %446 = arith.mulf %445, %394 : vector<1x32xf32>
    %447 = vector.shape_cast %446 : vector<1x32xf32> to vector<1x1x32xf32>
    %cst_149 = arith.constant dense<0.000000e+00> : vector<1xf32>
    %448 = vector.multi_reduction <add>, %447, %cst_149 [1, 2] : vector<1x1x32xf32> to vector<1xf32>
    %449 = vector.shape_cast %448 : vector<1xf32> to vector<1x1x1xf32>
    %450 = vector.extract %449[0, 0, 0] : f32 from vector<1x1x1xf32>
    %451 = vector.broadcast %450 : f32 to vector<1x1xf32>
    %452 = arith.mulf %444, %451 : vector<1x1xf32>
    %cst_150 = arith.constant 0.000000e+00 : f32
    %453 = vector.broadcast %cst_150 : f32 to vector<1x1xf32>
    %454 = arith.subf %453, %452 : vector<1x1xf32>
    %455 = arith.subf %382, %454 : vector<1x1xf32>
    %cst_151 = arith.constant 1.000000e+00 : f32
    %456 = vector.broadcast %cst_151 : f32 to vector<1x1xf32>
    %457 = arith.addf %455, %456 : vector<1x1xf32>
    %cst_152 = arith.constant 0.000000e+00 : f32
    %458 = vector.broadcast %cst_152 : f32 to vector<1x1xf32>
    %459 = arith.maximumf %457, %458 : vector<1x1xf32>
    %c8_i32_153 = arith.constant 8 : i32
    %460 = arith.cmpi slt, %310, %c8_i32_153 : i32
    %cst_154 = arith.constant 0.000000e+00 : f32
    %461 = vector.broadcast %cst_154 : f32 to vector<1x1xf32>
    %462 = arith.select %460, %459, %461 : vector<1x1xf32>
    %463 = arith.addf %309, %462 : vector<1x1xf32>
    %c3_i32 = arith.constant 3 : i32
    %464 = arith.addi %0, %c3_i32 : i32
    %465 = arith.index_cast %464 : i32 to index
    %466 = memref.load %arg1[%465] : memref<8xi32, #tpu.memory_space<smem>>
    %467 = arith.index_cast %464 : i32 to index
    %468 = memref.load %arg2[%467] : memref<8xi32, #tpu.memory_space<smem>>
    %469 = arith.index_cast %464 : i32 to index
    %470 = memref.load %arg3[%469] : memref<8xi32, #tpu.memory_space<smem>>
    %471 = arith.index_cast %466 : i32 to index
    %c0_155 = arith.constant 0 : index
    %c0_156 = arith.constant 0 : index
    %472 = vector.load %arg7[%471, %c0_155, %c0_156] : memref<50x1x32xf32, #tpu.memory_space<vmem>>, vector<1x1x32xf32>
    %473 = vector.shape_cast %472 : vector<1x1x32xf32> to vector<1x32xf32>
    %474 = arith.index_cast %470 : i32 to index
    %c0_157 = arith.constant 0 : index
    %c0_158 = arith.constant 0 : index
    %475 = vector.load %arg7[%474, %c0_157, %c0_158] : memref<50x1x32xf32, #tpu.memory_space<vmem>>, vector<1x1x32xf32>
    %476 = vector.shape_cast %475 : vector<1x1x32xf32> to vector<1x32xf32>
    %477 = arith.index_cast %468 : i32 to index
    %c0_159 = arith.constant 0 : index
    %c0_160 = arith.constant 0 : index
    %478 = vector.load %arg8[%477, %c0_159, %c0_160] : memref<10x32x32xf32, #tpu.memory_space<vmem>>, vector<1x32x32xf32>
    %479 = vector.shape_cast %478 : vector<1x32x32xf32> to vector<32x32xf32>
    %480 = arith.mulf %473, %473 : vector<1x32xf32>
    %481 = vector.shape_cast %480 : vector<1x32xf32> to vector<1x1x32xf32>
    %cst_161 = arith.constant dense<0.000000e+00> : vector<1xf32>
    %482 = vector.multi_reduction <add>, %481, %cst_161 [1, 2] : vector<1x1x32xf32> to vector<1xf32>
    %483 = vector.shape_cast %482 : vector<1xf32> to vector<1x1x1xf32>
    %484 = vector.extract %483[0, 0, 0] : f32 from vector<1x1x1xf32>
    %485 = vector.broadcast %484 : f32 to vector<1x1xf32>
    %486 = math.sqrt %485 : vector<1x1xf32>
    %cst_162 = arith.constant 1.000000e+00 : f32
    %487 = vector.broadcast %cst_162 : f32 to vector<1x1xf32>
    %488 = arith.cmpf ogt, %486, %487 : vector<1x1xf32>
    %cst_163 = arith.constant 1.000000e-07 : f32
    %489 = vector.broadcast %cst_163 : f32 to vector<1x1xf32>
    %490 = arith.addf %486, %489 : vector<1x1xf32>
    %cst_164 = arith.constant 1.000000e+00 : f32
    %491 = vector.broadcast %cst_164 : f32 to vector<1x1xf32>
    %492 = arith.divf %491, %490 : vector<1x1xf32>
    %cst_165 = arith.constant 1.000000e+00 : f32
    %493 = vector.broadcast %cst_165 : f32 to vector<1x1xf32>
    %494 = arith.select %488, %492, %493 : vector<1x1xi1>, vector<1x1xf32>
    %495 = arith.mulf %479, %479 : vector<32x32xf32>
    %496 = vector.shape_cast %495 : vector<32x32xf32> to vector<1x32x32xf32>
    %cst_166 = arith.constant dense<0.000000e+00> : vector<1xf32>
    %497 = vector.multi_reduction <add>, %496, %cst_166 [1, 2] : vector<1x32x32xf32> to vector<1xf32>
    %498 = vector.shape_cast %497 : vector<1xf32> to vector<1x1x1xf32>
    %499 = vector.extract %498[0, 0, 0] : f32 from vector<1x1x1xf32>
    %500 = vector.broadcast %499 : f32 to vector<1x1xf32>
    %501 = math.sqrt %500 : vector<1x1xf32>
    %cst_167 = arith.constant 1.000000e+00 : f32
    %502 = vector.broadcast %cst_167 : f32 to vector<1x1xf32>
    %503 = arith.cmpf ogt, %501, %502 : vector<1x1xf32>
    %cst_168 = arith.constant 1.000000e-07 : f32
    %504 = vector.broadcast %cst_168 : f32 to vector<1x1xf32>
    %505 = arith.addf %501, %504 : vector<1x1xf32>
    %cst_169 = arith.constant 1.000000e+00 : f32
    %506 = vector.broadcast %cst_169 : f32 to vector<1x1xf32>
    %507 = arith.divf %506, %505 : vector<1x1xf32>
    %cst_170 = arith.constant 1.000000e+00 : f32
    %508 = vector.broadcast %cst_170 : f32 to vector<1x1xf32>
    %509 = arith.select %503, %507, %508 : vector<1x1xi1>, vector<1x1xf32>
    %510 = arith.mulf %494, %509 : vector<1x1xf32>
    %511 = arith.mulf %476, %476 : vector<1x32xf32>
    %512 = vector.shape_cast %511 : vector<1x32xf32> to vector<1x1x32xf32>
    %cst_171 = arith.constant dense<0.000000e+00> : vector<1xf32>
    %513 = vector.multi_reduction <add>, %512, %cst_171 [1, 2] : vector<1x1x32xf32> to vector<1xf32>
    %514 = vector.shape_cast %513 : vector<1xf32> to vector<1x1x1xf32>
    %515 = vector.extract %514[0, 0, 0] : f32 from vector<1x1x1xf32>
    %516 = vector.broadcast %515 : f32 to vector<1x1xf32>
    %517 = math.sqrt %516 : vector<1x1xf32>
    %cst_172 = arith.constant 1.000000e+00 : f32
    %518 = vector.broadcast %cst_172 : f32 to vector<1x1xf32>
    %519 = arith.cmpf ogt, %517, %518 : vector<1x1xf32>
    %cst_173 = arith.constant 1.000000e-07 : f32
    %520 = vector.broadcast %cst_173 : f32 to vector<1x1xf32>
    %521 = arith.addf %517, %520 : vector<1x1xf32>
    %cst_174 = arith.constant 1.000000e+00 : f32
    %522 = vector.broadcast %cst_174 : f32 to vector<1x1xf32>
    %523 = arith.divf %522, %521 : vector<1x1xf32>
    %cst_175 = arith.constant 1.000000e+00 : f32
    %524 = vector.broadcast %cst_175 : f32 to vector<1x1xf32>
    %525 = arith.select %519, %523, %524 : vector<1x1xi1>, vector<1x1xf32>
    %526 = arith.mulf %510, %525 : vector<1x1xf32>
    %cst_176 = arith.constant dense<0.000000e+00> : vector<1x32xf32>
    %527 = tpu.matmul %473, %479, %cst_176 {dimension_numbers = #tpu.dot_dimension_numbers<[1], [0], [0], [1], [0, 0, 1, 1], [], []>} : vector<1x32xf32>, vector<32x32xf32>, vector<1x32xf32> -> vector<1x32xf32>
    %528 = arith.mulf %527, %476 : vector<1x32xf32>
    %529 = vector.shape_cast %528 : vector<1x32xf32> to vector<1x1x32xf32>
    %cst_177 = arith.constant dense<0.000000e+00> : vector<1xf32>
    %530 = vector.multi_reduction <add>, %529, %cst_177 [1, 2] : vector<1x1x32xf32> to vector<1xf32>
    %531 = vector.shape_cast %530 : vector<1xf32> to vector<1x1x1xf32>
    %532 = vector.extract %531[0, 0, 0] : f32 from vector<1x1x1xf32>
    %533 = vector.broadcast %532 : f32 to vector<1x1xf32>
    %534 = arith.mulf %526, %533 : vector<1x1xf32>
    %cst_178 = arith.constant 0.000000e+00 : f32
    %535 = vector.broadcast %cst_178 : f32 to vector<1x1xf32>
    %536 = arith.subf %535, %534 : vector<1x1xf32>
    %537 = arith.index_cast %464 : i32 to index
    %538 = memref.load %arg4[%537] : memref<8xi32, #tpu.memory_space<smem>>
    %539 = arith.index_cast %464 : i32 to index
    %540 = memref.load %arg5[%539] : memref<8xi32, #tpu.memory_space<smem>>
    %541 = arith.index_cast %464 : i32 to index
    %542 = memref.load %arg6[%541] : memref<8xi32, #tpu.memory_space<smem>>
    %543 = arith.index_cast %538 : i32 to index
    %c0_179 = arith.constant 0 : index
    %c0_180 = arith.constant 0 : index
    %544 = vector.load %arg7[%543, %c0_179, %c0_180] : memref<50x1x32xf32, #tpu.memory_space<vmem>>, vector<1x1x32xf32>
    %545 = vector.shape_cast %544 : vector<1x1x32xf32> to vector<1x32xf32>
    %546 = arith.index_cast %542 : i32 to index
    %c0_181 = arith.constant 0 : index
    %c0_182 = arith.constant 0 : index
    %547 = vector.load %arg7[%546, %c0_181, %c0_182] : memref<50x1x32xf32, #tpu.memory_space<vmem>>, vector<1x1x32xf32>
    %548 = vector.shape_cast %547 : vector<1x1x32xf32> to vector<1x32xf32>
    %549 = arith.index_cast %540 : i32 to index
    %c0_183 = arith.constant 0 : index
    %c0_184 = arith.constant 0 : index
    %550 = vector.load %arg8[%549, %c0_183, %c0_184] : memref<10x32x32xf32, #tpu.memory_space<vmem>>, vector<1x32x32xf32>
    %551 = vector.shape_cast %550 : vector<1x32x32xf32> to vector<32x32xf32>
    %552 = arith.mulf %545, %545 : vector<1x32xf32>
    %553 = vector.shape_cast %552 : vector<1x32xf32> to vector<1x1x32xf32>
    %cst_185 = arith.constant dense<0.000000e+00> : vector<1xf32>
    %554 = vector.multi_reduction <add>, %553, %cst_185 [1, 2] : vector<1x1x32xf32> to vector<1xf32>
    %555 = vector.shape_cast %554 : vector<1xf32> to vector<1x1x1xf32>
    %556 = vector.extract %555[0, 0, 0] : f32 from vector<1x1x1xf32>
    %557 = vector.broadcast %556 : f32 to vector<1x1xf32>
    %558 = math.sqrt %557 : vector<1x1xf32>
    %cst_186 = arith.constant 1.000000e+00 : f32
    %559 = vector.broadcast %cst_186 : f32 to vector<1x1xf32>
    %560 = arith.cmpf ogt, %558, %559 : vector<1x1xf32>
    %cst_187 = arith.constant 1.000000e-07 : f32
    %561 = vector.broadcast %cst_187 : f32 to vector<1x1xf32>
    %562 = arith.addf %558, %561 : vector<1x1xf32>
    %cst_188 = arith.constant 1.000000e+00 : f32
    %563 = vector.broadcast %cst_188 : f32 to vector<1x1xf32>
    %564 = arith.divf %563, %562 : vector<1x1xf32>
    %cst_189 = arith.constant 1.000000e+00 : f32
    %565 = vector.broadcast %cst_189 : f32 to vector<1x1xf32>
    %566 = arith.select %560, %564, %565 : vector<1x1xi1>, vector<1x1xf32>
    %567 = arith.mulf %551, %551 : vector<32x32xf32>
    %568 = vector.shape_cast %567 : vector<32x32xf32> to vector<1x32x32xf32>
    %cst_190 = arith.constant dense<0.000000e+00> : vector<1xf32>
    %569 = vector.multi_reduction <add>, %568, %cst_190 [1, 2] : vector<1x32x32xf32> to vector<1xf32>
    %570 = vector.shape_cast %569 : vector<1xf32> to vector<1x1x1xf32>
    %571 = vector.extract %570[0, 0, 0] : f32 from vector<1x1x1xf32>
    %572 = vector.broadcast %571 : f32 to vector<1x1xf32>
    %573 = math.sqrt %572 : vector<1x1xf32>
    %cst_191 = arith.constant 1.000000e+00 : f32
    %574 = vector.broadcast %cst_191 : f32 to vector<1x1xf32>
    %575 = arith.cmpf ogt, %573, %574 : vector<1x1xf32>
    %cst_192 = arith.constant 1.000000e-07 : f32
    %576 = vector.broadcast %cst_192 : f32 to vector<1x1xf32>
    %577 = arith.addf %573, %576 : vector<1x1xf32>
    %cst_193 = arith.constant 1.000000e+00 : f32
    %578 = vector.broadcast %cst_193 : f32 to vector<1x1xf32>
    %579 = arith.divf %578, %577 : vector<1x1xf32>
    %cst_194 = arith.constant 1.000000e+00 : f32
    %580 = vector.broadcast %cst_194 : f32 to vector<1x1xf32>
    %581 = arith.select %575, %579, %580 : vector<1x1xi1>, vector<1x1xf32>
    %582 = arith.mulf %566, %581 : vector<1x1xf32>
    %583 = arith.mulf %548, %548 : vector<1x32xf32>
    %584 = vector.shape_cast %583 : vector<1x32xf32> to vector<1x1x32xf32>
    %cst_195 = arith.constant dense<0.000000e+00> : vector<1xf32>
    %585 = vector.multi_reduction <add>, %584, %cst_195 [1, 2] : vector<1x1x32xf32> to vector<1xf32>
    %586 = vector.shape_cast %585 : vector<1xf32> to vector<1x1x1xf32>
    %587 = vector.extract %586[0, 0, 0] : f32 from vector<1x1x1xf32>
    %588 = vector.broadcast %587 : f32 to vector<1x1xf32>
    %589 = math.sqrt %588 : vector<1x1xf32>
    %cst_196 = arith.constant 1.000000e+00 : f32
    %590 = vector.broadcast %cst_196 : f32 to vector<1x1xf32>
    %591 = arith.cmpf ogt, %589, %590 : vector<1x1xf32>
    %cst_197 = arith.constant 1.000000e-07 : f32
    %592 = vector.broadcast %cst_197 : f32 to vector<1x1xf32>
    %593 = arith.addf %589, %592 : vector<1x1xf32>
    %cst_198 = arith.constant 1.000000e+00 : f32
    %594 = vector.broadcast %cst_198 : f32 to vector<1x1xf32>
    %595 = arith.divf %594, %593 : vector<1x1xf32>
    %cst_199 = arith.constant 1.000000e+00 : f32
    %596 = vector.broadcast %cst_199 : f32 to vector<1x1xf32>
    %597 = arith.select %591, %595, %596 : vector<1x1xi1>, vector<1x1xf32>
    %598 = arith.mulf %582, %597 : vector<1x1xf32>
    %cst_200 = arith.constant dense<0.000000e+00> : vector<1x32xf32>
    %599 = tpu.matmul %545, %551, %cst_200 {dimension_numbers = #tpu.dot_dimension_numbers<[1], [0], [0], [1], [0, 0, 1, 1], [], []>} : vector<1x32xf32>, vector<32x32xf32>, vector<1x32xf32> -> vector<1x32xf32>
    %600 = arith.mulf %599, %548 : vector<1x32xf32>
    %601 = vector.shape_cast %600 : vector<1x32xf32> to vector<1x1x32xf32>
    %cst_201 = arith.constant dense<0.000000e+00> : vector<1xf32>
    %602 = vector.multi_reduction <add>, %601, %cst_201 [1, 2] : vector<1x1x32xf32> to vector<1xf32>
    %603 = vector.shape_cast %602 : vector<1xf32> to vector<1x1x1xf32>
    %604 = vector.extract %603[0, 0, 0] : f32 from vector<1x1x1xf32>
    %605 = vector.broadcast %604 : f32 to vector<1x1xf32>
    %606 = arith.mulf %598, %605 : vector<1x1xf32>
    %cst_202 = arith.constant 0.000000e+00 : f32
    %607 = vector.broadcast %cst_202 : f32 to vector<1x1xf32>
    %608 = arith.subf %607, %606 : vector<1x1xf32>
    %609 = arith.subf %536, %608 : vector<1x1xf32>
    %cst_203 = arith.constant 1.000000e+00 : f32
    %610 = vector.broadcast %cst_203 : f32 to vector<1x1xf32>
    %611 = arith.addf %609, %610 : vector<1x1xf32>
    %cst_204 = arith.constant 0.000000e+00 : f32
    %612 = vector.broadcast %cst_204 : f32 to vector<1x1xf32>
    %613 = arith.maximumf %611, %612 : vector<1x1xf32>
    %c8_i32_205 = arith.constant 8 : i32
    %614 = arith.cmpi slt, %464, %c8_i32_205 : i32
    %cst_206 = arith.constant 0.000000e+00 : f32
    %615 = vector.broadcast %cst_206 : f32 to vector<1x1xf32>
    %616 = arith.select %614, %613, %615 : vector<1x1xf32>
    %617 = arith.addf %463, %616 : vector<1x1xf32>
    %c4_i32 = arith.constant 4 : i32
    %618 = arith.addi %0, %c4_i32 : i32
    %619 = arith.index_cast %618 : i32 to index
    %620 = memref.load %arg1[%619] : memref<8xi32, #tpu.memory_space<smem>>
    %621 = arith.index_cast %618 : i32 to index
    %622 = memref.load %arg2[%621] : memref<8xi32, #tpu.memory_space<smem>>
    %623 = arith.index_cast %618 : i32 to index
    %624 = memref.load %arg3[%623] : memref<8xi32, #tpu.memory_space<smem>>
    %625 = arith.index_cast %620 : i32 to index
    %c0_207 = arith.constant 0 : index
    %c0_208 = arith.constant 0 : index
    %626 = vector.load %arg7[%625, %c0_207, %c0_208] : memref<50x1x32xf32, #tpu.memory_space<vmem>>, vector<1x1x32xf32>
    %627 = vector.shape_cast %626 : vector<1x1x32xf32> to vector<1x32xf32>
    %628 = arith.index_cast %624 : i32 to index
    %c0_209 = arith.constant 0 : index
    %c0_210 = arith.constant 0 : index
    %629 = vector.load %arg7[%628, %c0_209, %c0_210] : memref<50x1x32xf32, #tpu.memory_space<vmem>>, vector<1x1x32xf32>
    %630 = vector.shape_cast %629 : vector<1x1x32xf32> to vector<1x32xf32>
    %631 = arith.index_cast %622 : i32 to index
    %c0_211 = arith.constant 0 : index
    %c0_212 = arith.constant 0 : index
    %632 = vector.load %arg8[%631, %c0_211, %c0_212] : memref<10x32x32xf32, #tpu.memory_space<vmem>>, vector<1x32x32xf32>
    %633 = vector.shape_cast %632 : vector<1x32x32xf32> to vector<32x32xf32>
    %634 = arith.mulf %627, %627 : vector<1x32xf32>
    %635 = vector.shape_cast %634 : vector<1x32xf32> to vector<1x1x32xf32>
    %cst_213 = arith.constant dense<0.000000e+00> : vector<1xf32>
    %636 = vector.multi_reduction <add>, %635, %cst_213 [1, 2] : vector<1x1x32xf32> to vector<1xf32>
    %637 = vector.shape_cast %636 : vector<1xf32> to vector<1x1x1xf32>
    %638 = vector.extract %637[0, 0, 0] : f32 from vector<1x1x1xf32>
    %639 = vector.broadcast %638 : f32 to vector<1x1xf32>
    %640 = math.sqrt %639 : vector<1x1xf32>
    %cst_214 = arith.constant 1.000000e+00 : f32
    %641 = vector.broadcast %cst_214 : f32 to vector<1x1xf32>
    %642 = arith.cmpf ogt, %640, %641 : vector<1x1xf32>
    %cst_215 = arith.constant 1.000000e-07 : f32
    %643 = vector.broadcast %cst_215 : f32 to vector<1x1xf32>
    %644 = arith.addf %640, %643 : vector<1x1xf32>
    %cst_216 = arith.constant 1.000000e+00 : f32
    %645 = vector.broadcast %cst_216 : f32 to vector<1x1xf32>
    %646 = arith.divf %645, %644 : vector<1x1xf32>
    %cst_217 = arith.constant 1.000000e+00 : f32
    %647 = vector.broadcast %cst_217 : f32 to vector<1x1xf32>
    %648 = arith.select %642, %646, %647 : vector<1x1xi1>, vector<1x1xf32>
    %649 = arith.mulf %633, %633 : vector<32x32xf32>
    %650 = vector.shape_cast %649 : vector<32x32xf32> to vector<1x32x32xf32>
    %cst_218 = arith.constant dense<0.000000e+00> : vector<1xf32>
    %651 = vector.multi_reduction <add>, %650, %cst_218 [1, 2] : vector<1x32x32xf32> to vector<1xf32>
    %652 = vector.shape_cast %651 : vector<1xf32> to vector<1x1x1xf32>
    %653 = vector.extract %652[0, 0, 0] : f32 from vector<1x1x1xf32>
    %654 = vector.broadcast %653 : f32 to vector<1x1xf32>
    %655 = math.sqrt %654 : vector<1x1xf32>
    %cst_219 = arith.constant 1.000000e+00 : f32
    %656 = vector.broadcast %cst_219 : f32 to vector<1x1xf32>
    %657 = arith.cmpf ogt, %655, %656 : vector<1x1xf32>
    %cst_220 = arith.constant 1.000000e-07 : f32
    %658 = vector.broadcast %cst_220 : f32 to vector<1x1xf32>
    %659 = arith.addf %655, %658 : vector<1x1xf32>
    %cst_221 = arith.constant 1.000000e+00 : f32
    %660 = vector.broadcast %cst_221 : f32 to vector<1x1xf32>
    %661 = arith.divf %660, %659 : vector<1x1xf32>
    %cst_222 = arith.constant 1.000000e+00 : f32
    %662 = vector.broadcast %cst_222 : f32 to vector<1x1xf32>
    %663 = arith.select %657, %661, %662 : vector<1x1xi1>, vector<1x1xf32>
    %664 = arith.mulf %648, %663 : vector<1x1xf32>
    %665 = arith.mulf %630, %630 : vector<1x32xf32>
    %666 = vector.shape_cast %665 : vector<1x32xf32> to vector<1x1x32xf32>
    %cst_223 = arith.constant dense<0.000000e+00> : vector<1xf32>
    %667 = vector.multi_reduction <add>, %666, %cst_223 [1, 2] : vector<1x1x32xf32> to vector<1xf32>
    %668 = vector.shape_cast %667 : vector<1xf32> to vector<1x1x1xf32>
    %669 = vector.extract %668[0, 0, 0] : f32 from vector<1x1x1xf32>
    %670 = vector.broadcast %669 : f32 to vector<1x1xf32>
    %671 = math.sqrt %670 : vector<1x1xf32>
    %cst_224 = arith.constant 1.000000e+00 : f32
    %672 = vector.broadcast %cst_224 : f32 to vector<1x1xf32>
    %673 = arith.cmpf ogt, %671, %672 : vector<1x1xf32>
    %cst_225 = arith.constant 1.000000e-07 : f32
    %674 = vector.broadcast %cst_225 : f32 to vector<1x1xf32>
    %675 = arith.addf %671, %674 : vector<1x1xf32>
    %cst_226 = arith.constant 1.000000e+00 : f32
    %676 = vector.broadcast %cst_226 : f32 to vector<1x1xf32>
    %677 = arith.divf %676, %675 : vector<1x1xf32>
    %cst_227 = arith.constant 1.000000e+00 : f32
    %678 = vector.broadcast %cst_227 : f32 to vector<1x1xf32>
    %679 = arith.select %673, %677, %678 : vector<1x1xi1>, vector<1x1xf32>
    %680 = arith.mulf %664, %679 : vector<1x1xf32>
    %cst_228 = arith.constant dense<0.000000e+00> : vector<1x32xf32>
    %681 = tpu.matmul %627, %633, %cst_228 {dimension_numbers = #tpu.dot_dimension_numbers<[1], [0], [0], [1], [0, 0, 1, 1], [], []>} : vector<1x32xf32>, vector<32x32xf32>, vector<1x32xf32> -> vector<1x32xf32>
    %682 = arith.mulf %681, %630 : vector<1x32xf32>
    %683 = vector.shape_cast %682 : vector<1x32xf32> to vector<1x1x32xf32>
    %cst_229 = arith.constant dense<0.000000e+00> : vector<1xf32>
    %684 = vector.multi_reduction <add>, %683, %cst_229 [1, 2] : vector<1x1x32xf32> to vector<1xf32>
    %685 = vector.shape_cast %684 : vector<1xf32> to vector<1x1x1xf32>
    %686 = vector.extract %685[0, 0, 0] : f32 from vector<1x1x1xf32>
    %687 = vector.broadcast %686 : f32 to vector<1x1xf32>
    %688 = arith.mulf %680, %687 : vector<1x1xf32>
    %cst_230 = arith.constant 0.000000e+00 : f32
    %689 = vector.broadcast %cst_230 : f32 to vector<1x1xf32>
    %690 = arith.subf %689, %688 : vector<1x1xf32>
    %691 = arith.index_cast %618 : i32 to index
    %692 = memref.load %arg4[%691] : memref<8xi32, #tpu.memory_space<smem>>
    %693 = arith.index_cast %618 : i32 to index
    %694 = memref.load %arg5[%693] : memref<8xi32, #tpu.memory_space<smem>>
    %695 = arith.index_cast %618 : i32 to index
    %696 = memref.load %arg6[%695] : memref<8xi32, #tpu.memory_space<smem>>
    %697 = arith.index_cast %692 : i32 to index
    %c0_231 = arith.constant 0 : index
    %c0_232 = arith.constant 0 : index
    %698 = vector.load %arg7[%697, %c0_231, %c0_232] : memref<50x1x32xf32, #tpu.memory_space<vmem>>, vector<1x1x32xf32>
    %699 = vector.shape_cast %698 : vector<1x1x32xf32> to vector<1x32xf32>
    %700 = arith.index_cast %696 : i32 to index
    %c0_233 = arith.constant 0 : index
    %c0_234 = arith.constant 0 : index
    %701 = vector.load %arg7[%700, %c0_233, %c0_234] : memref<50x1x32xf32, #tpu.memory_space<vmem>>, vector<1x1x32xf32>
    %702 = vector.shape_cast %701 : vector<1x1x32xf32> to vector<1x32xf32>
    %703 = arith.index_cast %694 : i32 to index
    %c0_235 = arith.constant 0 : index
    %c0_236 = arith.constant 0 : index
    %704 = vector.load %arg8[%703, %c0_235, %c0_236] : memref<10x32x32xf32, #tpu.memory_space<vmem>>, vector<1x32x32xf32>
    %705 = vector.shape_cast %704 : vector<1x32x32xf32> to vector<32x32xf32>
    %706 = arith.mulf %699, %699 : vector<1x32xf32>
    %707 = vector.shape_cast %706 : vector<1x32xf32> to vector<1x1x32xf32>
    %cst_237 = arith.constant dense<0.000000e+00> : vector<1xf32>
    %708 = vector.multi_reduction <add>, %707, %cst_237 [1, 2] : vector<1x1x32xf32> to vector<1xf32>
    %709 = vector.shape_cast %708 : vector<1xf32> to vector<1x1x1xf32>
    %710 = vector.extract %709[0, 0, 0] : f32 from vector<1x1x1xf32>
    %711 = vector.broadcast %710 : f32 to vector<1x1xf32>
    %712 = math.sqrt %711 : vector<1x1xf32>
    %cst_238 = arith.constant 1.000000e+00 : f32
    %713 = vector.broadcast %cst_238 : f32 to vector<1x1xf32>
    %714 = arith.cmpf ogt, %712, %713 : vector<1x1xf32>
    %cst_239 = arith.constant 1.000000e-07 : f32
    %715 = vector.broadcast %cst_239 : f32 to vector<1x1xf32>
    %716 = arith.addf %712, %715 : vector<1x1xf32>
    %cst_240 = arith.constant 1.000000e+00 : f32
    %717 = vector.broadcast %cst_240 : f32 to vector<1x1xf32>
    %718 = arith.divf %717, %716 : vector<1x1xf32>
    %cst_241 = arith.constant 1.000000e+00 : f32
    %719 = vector.broadcast %cst_241 : f32 to vector<1x1xf32>
    %720 = arith.select %714, %718, %719 : vector<1x1xi1>, vector<1x1xf32>
    %721 = arith.mulf %705, %705 : vector<32x32xf32>
    %722 = vector.shape_cast %721 : vector<32x32xf32> to vector<1x32x32xf32>
    %cst_242 = arith.constant dense<0.000000e+00> : vector<1xf32>
    %723 = vector.multi_reduction <add>, %722, %cst_242 [1, 2] : vector<1x32x32xf32> to vector<1xf32>
    %724 = vector.shape_cast %723 : vector<1xf32> to vector<1x1x1xf32>
    %725 = vector.extract %724[0, 0, 0] : f32 from vector<1x1x1xf32>
    %726 = vector.broadcast %725 : f32 to vector<1x1xf32>
    %727 = math.sqrt %726 : vector<1x1xf32>
    %cst_243 = arith.constant 1.000000e+00 : f32
    %728 = vector.broadcast %cst_243 : f32 to vector<1x1xf32>
    %729 = arith.cmpf ogt, %727, %728 : vector<1x1xf32>
    %cst_244 = arith.constant 1.000000e-07 : f32
    %730 = vector.broadcast %cst_244 : f32 to vector<1x1xf32>
    %731 = arith.addf %727, %730 : vector<1x1xf32>
    %cst_245 = arith.constant 1.000000e+00 : f32
    %732 = vector.broadcast %cst_245 : f32 to vector<1x1xf32>
    %733 = arith.divf %732, %731 : vector<1x1xf32>
    %cst_246 = arith.constant 1.000000e+00 : f32
    %734 = vector.broadcast %cst_246 : f32 to vector<1x1xf32>
    %735 = arith.select %729, %733, %734 : vector<1x1xi1>, vector<1x1xf32>
    %736 = arith.mulf %720, %735 : vector<1x1xf32>
    %737 = arith.mulf %702, %702 : vector<1x32xf32>
    %738 = vector.shape_cast %737 : vector<1x32xf32> to vector<1x1x32xf32>
    %cst_247 = arith.constant dense<0.000000e+00> : vector<1xf32>
    %739 = vector.multi_reduction <add>, %738, %cst_247 [1, 2] : vector<1x1x32xf32> to vector<1xf32>
    %740 = vector.shape_cast %739 : vector<1xf32> to vector<1x1x1xf32>
    %741 = vector.extract %740[0, 0, 0] : f32 from vector<1x1x1xf32>
    %742 = vector.broadcast %741 : f32 to vector<1x1xf32>
    %743 = math.sqrt %742 : vector<1x1xf32>
    %cst_248 = arith.constant 1.000000e+00 : f32
    %744 = vector.broadcast %cst_248 : f32 to vector<1x1xf32>
    %745 = arith.cmpf ogt, %743, %744 : vector<1x1xf32>
    %cst_249 = arith.constant 1.000000e-07 : f32
    %746 = vector.broadcast %cst_249 : f32 to vector<1x1xf32>
    %747 = arith.addf %743, %746 : vector<1x1xf32>
    %cst_250 = arith.constant 1.000000e+00 : f32
    %748 = vector.broadcast %cst_250 : f32 to vector<1x1xf32>
    %749 = arith.divf %748, %747 : vector<1x1xf32>
    %cst_251 = arith.constant 1.000000e+00 : f32
    %750 = vector.broadcast %cst_251 : f32 to vector<1x1xf32>
    %751 = arith.select %745, %749, %750 : vector<1x1xi1>, vector<1x1xf32>
    %752 = arith.mulf %736, %751 : vector<1x1xf32>
    %cst_252 = arith.constant dense<0.000000e+00> : vector<1x32xf32>
    %753 = tpu.matmul %699, %705, %cst_252 {dimension_numbers = #tpu.dot_dimension_numbers<[1], [0], [0], [1], [0, 0, 1, 1], [], []>} : vector<1x32xf32>, vector<32x32xf32>, vector<1x32xf32> -> vector<1x32xf32>
    %754 = arith.mulf %753, %702 : vector<1x32xf32>
    %755 = vector.shape_cast %754 : vector<1x32xf32> to vector<1x1x32xf32>
    %cst_253 = arith.constant dense<0.000000e+00> : vector<1xf32>
    %756 = vector.multi_reduction <add>, %755, %cst_253 [1, 2] : vector<1x1x32xf32> to vector<1xf32>
    %757 = vector.shape_cast %756 : vector<1xf32> to vector<1x1x1xf32>
    %758 = vector.extract %757[0, 0, 0] : f32 from vector<1x1x1xf32>
    %759 = vector.broadcast %758 : f32 to vector<1x1xf32>
    %760 = arith.mulf %752, %759 : vector<1x1xf32>
    %cst_254 = arith.constant 0.000000e+00 : f32
    %761 = vector.broadcast %cst_254 : f32 to vector<1x1xf32>
    %762 = arith.subf %761, %760 : vector<1x1xf32>
    %763 = arith.subf %690, %762 : vector<1x1xf32>
    %cst_255 = arith.constant 1.000000e+00 : f32
    %764 = vector.broadcast %cst_255 : f32 to vector<1x1xf32>
    %765 = arith.addf %763, %764 : vector<1x1xf32>
    %cst_256 = arith.constant 0.000000e+00 : f32
    %766 = vector.broadcast %cst_256 : f32 to vector<1x1xf32>
    %767 = arith.maximumf %765, %766 : vector<1x1xf32>
    %c8_i32_257 = arith.constant 8 : i32
    %768 = arith.cmpi slt, %618, %c8_i32_257 : i32
    %cst_258 = arith.constant 0.000000e+00 : f32
    %769 = vector.broadcast %cst_258 : f32 to vector<1x1xf32>
    %770 = arith.select %768, %767, %769 : vector<1x1xf32>
    %771 = arith.addf %617, %770 : vector<1x1xf32>
    %c5_i32 = arith.constant 5 : i32
    %772 = arith.addi %0, %c5_i32 : i32
    %773 = arith.index_cast %772 : i32 to index
    %774 = memref.load %arg1[%773] : memref<8xi32, #tpu.memory_space<smem>>
    %775 = arith.index_cast %772 : i32 to index
    %776 = memref.load %arg2[%775] : memref<8xi32, #tpu.memory_space<smem>>
    %777 = arith.index_cast %772 : i32 to index
    %778 = memref.load %arg3[%777] : memref<8xi32, #tpu.memory_space<smem>>
    %779 = arith.index_cast %774 : i32 to index
    %c0_259 = arith.constant 0 : index
    %c0_260 = arith.constant 0 : index
    %780 = vector.load %arg7[%779, %c0_259, %c0_260] : memref<50x1x32xf32, #tpu.memory_space<vmem>>, vector<1x1x32xf32>
    %781 = vector.shape_cast %780 : vector<1x1x32xf32> to vector<1x32xf32>
    %782 = arith.index_cast %778 : i32 to index
    %c0_261 = arith.constant 0 : index
    %c0_262 = arith.constant 0 : index
    %783 = vector.load %arg7[%782, %c0_261, %c0_262] : memref<50x1x32xf32, #tpu.memory_space<vmem>>, vector<1x1x32xf32>
    %784 = vector.shape_cast %783 : vector<1x1x32xf32> to vector<1x32xf32>
    %785 = arith.index_cast %776 : i32 to index
    %c0_263 = arith.constant 0 : index
    %c0_264 = arith.constant 0 : index
    %786 = vector.load %arg8[%785, %c0_263, %c0_264] : memref<10x32x32xf32, #tpu.memory_space<vmem>>, vector<1x32x32xf32>
    %787 = vector.shape_cast %786 : vector<1x32x32xf32> to vector<32x32xf32>
    %788 = arith.mulf %781, %781 : vector<1x32xf32>
    %789 = vector.shape_cast %788 : vector<1x32xf32> to vector<1x1x32xf32>
    %cst_265 = arith.constant dense<0.000000e+00> : vector<1xf32>
    %790 = vector.multi_reduction <add>, %789, %cst_265 [1, 2] : vector<1x1x32xf32> to vector<1xf32>
    %791 = vector.shape_cast %790 : vector<1xf32> to vector<1x1x1xf32>
    %792 = vector.extract %791[0, 0, 0] : f32 from vector<1x1x1xf32>
    %793 = vector.broadcast %792 : f32 to vector<1x1xf32>
    %794 = math.sqrt %793 : vector<1x1xf32>
    %cst_266 = arith.constant 1.000000e+00 : f32
    %795 = vector.broadcast %cst_266 : f32 to vector<1x1xf32>
    %796 = arith.cmpf ogt, %794, %795 : vector<1x1xf32>
    %cst_267 = arith.constant 1.000000e-07 : f32
    %797 = vector.broadcast %cst_267 : f32 to vector<1x1xf32>
    %798 = arith.addf %794, %797 : vector<1x1xf32>
    %cst_268 = arith.constant 1.000000e+00 : f32
    %799 = vector.broadcast %cst_268 : f32 to vector<1x1xf32>
    %800 = arith.divf %799, %798 : vector<1x1xf32>
    %cst_269 = arith.constant 1.000000e+00 : f32
    %801 = vector.broadcast %cst_269 : f32 to vector<1x1xf32>
    %802 = arith.select %796, %800, %801 : vector<1x1xi1>, vector<1x1xf32>
    %803 = arith.mulf %787, %787 : vector<32x32xf32>
    %804 = vector.shape_cast %803 : vector<32x32xf32> to vector<1x32x32xf32>
    %cst_270 = arith.constant dense<0.000000e+00> : vector<1xf32>
    %805 = vector.multi_reduction <add>, %804, %cst_270 [1, 2] : vector<1x32x32xf32> to vector<1xf32>
    %806 = vector.shape_cast %805 : vector<1xf32> to vector<1x1x1xf32>
    %807 = vector.extract %806[0, 0, 0] : f32 from vector<1x1x1xf32>
    %808 = vector.broadcast %807 : f32 to vector<1x1xf32>
    %809 = math.sqrt %808 : vector<1x1xf32>
    %cst_271 = arith.constant 1.000000e+00 : f32
    %810 = vector.broadcast %cst_271 : f32 to vector<1x1xf32>
    %811 = arith.cmpf ogt, %809, %810 : vector<1x1xf32>
    %cst_272 = arith.constant 1.000000e-07 : f32
    %812 = vector.broadcast %cst_272 : f32 to vector<1x1xf32>
    %813 = arith.addf %809, %812 : vector<1x1xf32>
    %cst_273 = arith.constant 1.000000e+00 : f32
    %814 = vector.broadcast %cst_273 : f32 to vector<1x1xf32>
    %815 = arith.divf %814, %813 : vector<1x1xf32>
    %cst_274 = arith.constant 1.000000e+00 : f32
    %816 = vector.broadcast %cst_274 : f32 to vector<1x1xf32>
    %817 = arith.select %811, %815, %816 : vector<1x1xi1>, vector<1x1xf32>
    %818 = arith.mulf %802, %817 : vector<1x1xf32>
    %819 = arith.mulf %784, %784 : vector<1x32xf32>
    %820 = vector.shape_cast %819 : vector<1x32xf32> to vector<1x1x32xf32>
    %cst_275 = arith.constant dense<0.000000e+00> : vector<1xf32>
    %821 = vector.multi_reduction <add>, %820, %cst_275 [1, 2] : vector<1x1x32xf32> to vector<1xf32>
    %822 = vector.shape_cast %821 : vector<1xf32> to vector<1x1x1xf32>
    %823 = vector.extract %822[0, 0, 0] : f32 from vector<1x1x1xf32>
    %824 = vector.broadcast %823 : f32 to vector<1x1xf32>
    %825 = math.sqrt %824 : vector<1x1xf32>
    %cst_276 = arith.constant 1.000000e+00 : f32
    %826 = vector.broadcast %cst_276 : f32 to vector<1x1xf32>
    %827 = arith.cmpf ogt, %825, %826 : vector<1x1xf32>
    %cst_277 = arith.constant 1.000000e-07 : f32
    %828 = vector.broadcast %cst_277 : f32 to vector<1x1xf32>
    %829 = arith.addf %825, %828 : vector<1x1xf32>
    %cst_278 = arith.constant 1.000000e+00 : f32
    %830 = vector.broadcast %cst_278 : f32 to vector<1x1xf32>
    %831 = arith.divf %830, %829 : vector<1x1xf32>
    %cst_279 = arith.constant 1.000000e+00 : f32
    %832 = vector.broadcast %cst_279 : f32 to vector<1x1xf32>
    %833 = arith.select %827, %831, %832 : vector<1x1xi1>, vector<1x1xf32>
    %834 = arith.mulf %818, %833 : vector<1x1xf32>
    %cst_280 = arith.constant dense<0.000000e+00> : vector<1x32xf32>
    %835 = tpu.matmul %781, %787, %cst_280 {dimension_numbers = #tpu.dot_dimension_numbers<[1], [0], [0], [1], [0, 0, 1, 1], [], []>} : vector<1x32xf32>, vector<32x32xf32>, vector<1x32xf32> -> vector<1x32xf32>
    %836 = arith.mulf %835, %784 : vector<1x32xf32>
    %837 = vector.shape_cast %836 : vector<1x32xf32> to vector<1x1x32xf32>
    %cst_281 = arith.constant dense<0.000000e+00> : vector<1xf32>
    %838 = vector.multi_reduction <add>, %837, %cst_281 [1, 2] : vector<1x1x32xf32> to vector<1xf32>
    %839 = vector.shape_cast %838 : vector<1xf32> to vector<1x1x1xf32>
    %840 = vector.extract %839[0, 0, 0] : f32 from vector<1x1x1xf32>
    %841 = vector.broadcast %840 : f32 to vector<1x1xf32>
    %842 = arith.mulf %834, %841 : vector<1x1xf32>
    %cst_282 = arith.constant 0.000000e+00 : f32
    %843 = vector.broadcast %cst_282 : f32 to vector<1x1xf32>
    %844 = arith.subf %843, %842 : vector<1x1xf32>
    %845 = arith.index_cast %772 : i32 to index
    %846 = memref.load %arg4[%845] : memref<8xi32, #tpu.memory_space<smem>>
    %847 = arith.index_cast %772 : i32 to index
    %848 = memref.load %arg5[%847] : memref<8xi32, #tpu.memory_space<smem>>
    %849 = arith.index_cast %772 : i32 to index
    %850 = memref.load %arg6[%849] : memref<8xi32, #tpu.memory_space<smem>>
    %851 = arith.index_cast %846 : i32 to index
    %c0_283 = arith.constant 0 : index
    %c0_284 = arith.constant 0 : index
    %852 = vector.load %arg7[%851, %c0_283, %c0_284] : memref<50x1x32xf32, #tpu.memory_space<vmem>>, vector<1x1x32xf32>
    %853 = vector.shape_cast %852 : vector<1x1x32xf32> to vector<1x32xf32>
    %854 = arith.index_cast %850 : i32 to index
    %c0_285 = arith.constant 0 : index
    %c0_286 = arith.constant 0 : index
    %855 = vector.load %arg7[%854, %c0_285, %c0_286] : memref<50x1x32xf32, #tpu.memory_space<vmem>>, vector<1x1x32xf32>
    %856 = vector.shape_cast %855 : vector<1x1x32xf32> to vector<1x32xf32>
    %857 = arith.index_cast %848 : i32 to index
    %c0_287 = arith.constant 0 : index
    %c0_288 = arith.constant 0 : index
    %858 = vector.load %arg8[%857, %c0_287, %c0_288] : memref<10x32x32xf32, #tpu.memory_space<vmem>>, vector<1x32x32xf32>
    %859 = vector.shape_cast %858 : vector<1x32x32xf32> to vector<32x32xf32>
    %860 = arith.mulf %853, %853 : vector<1x32xf32>
    %861 = vector.shape_cast %860 : vector<1x32xf32> to vector<1x1x32xf32>
    %cst_289 = arith.constant dense<0.000000e+00> : vector<1xf32>
    %862 = vector.multi_reduction <add>, %861, %cst_289 [1, 2] : vector<1x1x32xf32> to vector<1xf32>
    %863 = vector.shape_cast %862 : vector<1xf32> to vector<1x1x1xf32>
    %864 = vector.extract %863[0, 0, 0] : f32 from vector<1x1x1xf32>
    %865 = vector.broadcast %864 : f32 to vector<1x1xf32>
    %866 = math.sqrt %865 : vector<1x1xf32>
    %cst_290 = arith.constant 1.000000e+00 : f32
    %867 = vector.broadcast %cst_290 : f32 to vector<1x1xf32>
    %868 = arith.cmpf ogt, %866, %867 : vector<1x1xf32>
    %cst_291 = arith.constant 1.000000e-07 : f32
    %869 = vector.broadcast %cst_291 : f32 to vector<1x1xf32>
    %870 = arith.addf %866, %869 : vector<1x1xf32>
    %cst_292 = arith.constant 1.000000e+00 : f32
    %871 = vector.broadcast %cst_292 : f32 to vector<1x1xf32>
    %872 = arith.divf %871, %870 : vector<1x1xf32>
    %cst_293 = arith.constant 1.000000e+00 : f32
    %873 = vector.broadcast %cst_293 : f32 to vector<1x1xf32>
    %874 = arith.select %868, %872, %873 : vector<1x1xi1>, vector<1x1xf32>
    %875 = arith.mulf %859, %859 : vector<32x32xf32>
    %876 = vector.shape_cast %875 : vector<32x32xf32> to vector<1x32x32xf32>
    %cst_294 = arith.constant dense<0.000000e+00> : vector<1xf32>
    %877 = vector.multi_reduction <add>, %876, %cst_294 [1, 2] : vector<1x32x32xf32> to vector<1xf32>
    %878 = vector.shape_cast %877 : vector<1xf32> to vector<1x1x1xf32>
    %879 = vector.extract %878[0, 0, 0] : f32 from vector<1x1x1xf32>
    %880 = vector.broadcast %879 : f32 to vector<1x1xf32>
    %881 = math.sqrt %880 : vector<1x1xf32>
    %cst_295 = arith.constant 1.000000e+00 : f32
    %882 = vector.broadcast %cst_295 : f32 to vector<1x1xf32>
    %883 = arith.cmpf ogt, %881, %882 : vector<1x1xf32>
    %cst_296 = arith.constant 1.000000e-07 : f32
    %884 = vector.broadcast %cst_296 : f32 to vector<1x1xf32>
    %885 = arith.addf %881, %884 : vector<1x1xf32>
    %cst_297 = arith.constant 1.000000e+00 : f32
    %886 = vector.broadcast %cst_297 : f32 to vector<1x1xf32>
    %887 = arith.divf %886, %885 : vector<1x1xf32>
    %cst_298 = arith.constant 1.000000e+00 : f32
    %888 = vector.broadcast %cst_298 : f32 to vector<1x1xf32>
    %889 = arith.select %883, %887, %888 : vector<1x1xi1>, vector<1x1xf32>
    %890 = arith.mulf %874, %889 : vector<1x1xf32>
    %891 = arith.mulf %856, %856 : vector<1x32xf32>
    %892 = vector.shape_cast %891 : vector<1x32xf32> to vector<1x1x32xf32>
    %cst_299 = arith.constant dense<0.000000e+00> : vector<1xf32>
    %893 = vector.multi_reduction <add>, %892, %cst_299 [1, 2] : vector<1x1x32xf32> to vector<1xf32>
    %894 = vector.shape_cast %893 : vector<1xf32> to vector<1x1x1xf32>
    %895 = vector.extract %894[0, 0, 0] : f32 from vector<1x1x1xf32>
    %896 = vector.broadcast %895 : f32 to vector<1x1xf32>
    %897 = math.sqrt %896 : vector<1x1xf32>
    %cst_300 = arith.constant 1.000000e+00 : f32
    %898 = vector.broadcast %cst_300 : f32 to vector<1x1xf32>
    %899 = arith.cmpf ogt, %897, %898 : vector<1x1xf32>
    %cst_301 = arith.constant 1.000000e-07 : f32
    %900 = vector.broadcast %cst_301 : f32 to vector<1x1xf32>
    %901 = arith.addf %897, %900 : vector<1x1xf32>
    %cst_302 = arith.constant 1.000000e+00 : f32
    %902 = vector.broadcast %cst_302 : f32 to vector<1x1xf32>
    %903 = arith.divf %902, %901 : vector<1x1xf32>
    %cst_303 = arith.constant 1.000000e+00 : f32
    %904 = vector.broadcast %cst_303 : f32 to vector<1x1xf32>
    %905 = arith.select %899, %903, %904 : vector<1x1xi1>, vector<1x1xf32>
    %906 = arith.mulf %890, %905 : vector<1x1xf32>
    %cst_304 = arith.constant dense<0.000000e+00> : vector<1x32xf32>
    %907 = tpu.matmul %853, %859, %cst_304 {dimension_numbers = #tpu.dot_dimension_numbers<[1], [0], [0], [1], [0, 0, 1, 1], [], []>} : vector<1x32xf32>, vector<32x32xf32>, vector<1x32xf32> -> vector<1x32xf32>
    %908 = arith.mulf %907, %856 : vector<1x32xf32>
    %909 = vector.shape_cast %908 : vector<1x32xf32> to vector<1x1x32xf32>
    %cst_305 = arith.constant dense<0.000000e+00> : vector<1xf32>
    %910 = vector.multi_reduction <add>, %909, %cst_305 [1, 2] : vector<1x1x32xf32> to vector<1xf32>
    %911 = vector.shape_cast %910 : vector<1xf32> to vector<1x1x1xf32>
    %912 = vector.extract %911[0, 0, 0] : f32 from vector<1x1x1xf32>
    %913 = vector.broadcast %912 : f32 to vector<1x1xf32>
    %914 = arith.mulf %906, %913 : vector<1x1xf32>
    %cst_306 = arith.constant 0.000000e+00 : f32
    %915 = vector.broadcast %cst_306 : f32 to vector<1x1xf32>
    %916 = arith.subf %915, %914 : vector<1x1xf32>
    %917 = arith.subf %844, %916 : vector<1x1xf32>
    %cst_307 = arith.constant 1.000000e+00 : f32
    %918 = vector.broadcast %cst_307 : f32 to vector<1x1xf32>
    %919 = arith.addf %917, %918 : vector<1x1xf32>
    %cst_308 = arith.constant 0.000000e+00 : f32
    %920 = vector.broadcast %cst_308 : f32 to vector<1x1xf32>
    %921 = arith.maximumf %919, %920 : vector<1x1xf32>
    %c8_i32_309 = arith.constant 8 : i32
    %922 = arith.cmpi slt, %772, %c8_i32_309 : i32
    %cst_310 = arith.constant 0.000000e+00 : f32
    %923 = vector.broadcast %cst_310 : f32 to vector<1x1xf32>
    %924 = arith.select %922, %921, %923 : vector<1x1xf32>
    %925 = arith.addf %771, %924 : vector<1x1xf32>
    %c6_i32 = arith.constant 6 : i32
    %926 = arith.addi %0, %c6_i32 : i32
    %927 = arith.index_cast %926 : i32 to index
    %928 = memref.load %arg1[%927] : memref<8xi32, #tpu.memory_space<smem>>
    %929 = arith.index_cast %926 : i32 to index
    %930 = memref.load %arg2[%929] : memref<8xi32, #tpu.memory_space<smem>>
    %931 = arith.index_cast %926 : i32 to index
    %932 = memref.load %arg3[%931] : memref<8xi32, #tpu.memory_space<smem>>
    %933 = arith.index_cast %928 : i32 to index
    %c0_311 = arith.constant 0 : index
    %c0_312 = arith.constant 0 : index
    %934 = vector.load %arg7[%933, %c0_311, %c0_312] : memref<50x1x32xf32, #tpu.memory_space<vmem>>, vector<1x1x32xf32>
    %935 = vector.shape_cast %934 : vector<1x1x32xf32> to vector<1x32xf32>
    %936 = arith.index_cast %932 : i32 to index
    %c0_313 = arith.constant 0 : index
    %c0_314 = arith.constant 0 : index
    %937 = vector.load %arg7[%936, %c0_313, %c0_314] : memref<50x1x32xf32, #tpu.memory_space<vmem>>, vector<1x1x32xf32>
    %938 = vector.shape_cast %937 : vector<1x1x32xf32> to vector<1x32xf32>
    %939 = arith.index_cast %930 : i32 to index
    %c0_315 = arith.constant 0 : index
    %c0_316 = arith.constant 0 : index
    %940 = vector.load %arg8[%939, %c0_315, %c0_316] : memref<10x32x32xf32, #tpu.memory_space<vmem>>, vector<1x32x32xf32>
    %941 = vector.shape_cast %940 : vector<1x32x32xf32> to vector<32x32xf32>
    %942 = arith.mulf %935, %935 : vector<1x32xf32>
    %943 = vector.shape_cast %942 : vector<1x32xf32> to vector<1x1x32xf32>
    %cst_317 = arith.constant dense<0.000000e+00> : vector<1xf32>
    %944 = vector.multi_reduction <add>, %943, %cst_317 [1, 2] : vector<1x1x32xf32> to vector<1xf32>
    %945 = vector.shape_cast %944 : vector<1xf32> to vector<1x1x1xf32>
    %946 = vector.extract %945[0, 0, 0] : f32 from vector<1x1x1xf32>
    %947 = vector.broadcast %946 : f32 to vector<1x1xf32>
    %948 = math.sqrt %947 : vector<1x1xf32>
    %cst_318 = arith.constant 1.000000e+00 : f32
    %949 = vector.broadcast %cst_318 : f32 to vector<1x1xf32>
    %950 = arith.cmpf ogt, %948, %949 : vector<1x1xf32>
    %cst_319 = arith.constant 1.000000e-07 : f32
    %951 = vector.broadcast %cst_319 : f32 to vector<1x1xf32>
    %952 = arith.addf %948, %951 : vector<1x1xf32>
    %cst_320 = arith.constant 1.000000e+00 : f32
    %953 = vector.broadcast %cst_320 : f32 to vector<1x1xf32>
    %954 = arith.divf %953, %952 : vector<1x1xf32>
    %cst_321 = arith.constant 1.000000e+00 : f32
    %955 = vector.broadcast %cst_321 : f32 to vector<1x1xf32>
    %956 = arith.select %950, %954, %955 : vector<1x1xi1>, vector<1x1xf32>
    %957 = arith.mulf %941, %941 : vector<32x32xf32>
    %958 = vector.shape_cast %957 : vector<32x32xf32> to vector<1x32x32xf32>
    %cst_322 = arith.constant dense<0.000000e+00> : vector<1xf32>
    %959 = vector.multi_reduction <add>, %958, %cst_322 [1, 2] : vector<1x32x32xf32> to vector<1xf32>
    %960 = vector.shape_cast %959 : vector<1xf32> to vector<1x1x1xf32>
    %961 = vector.extract %960[0, 0, 0] : f32 from vector<1x1x1xf32>
    %962 = vector.broadcast %961 : f32 to vector<1x1xf32>
    %963 = math.sqrt %962 : vector<1x1xf32>
    %cst_323 = arith.constant 1.000000e+00 : f32
    %964 = vector.broadcast %cst_323 : f32 to vector<1x1xf32>
    %965 = arith.cmpf ogt, %963, %964 : vector<1x1xf32>
    %cst_324 = arith.constant 1.000000e-07 : f32
    %966 = vector.broadcast %cst_324 : f32 to vector<1x1xf32>
    %967 = arith.addf %963, %966 : vector<1x1xf32>
    %cst_325 = arith.constant 1.000000e+00 : f32
    %968 = vector.broadcast %cst_325 : f32 to vector<1x1xf32>
    %969 = arith.divf %968, %967 : vector<1x1xf32>
    %cst_326 = arith.constant 1.000000e+00 : f32
    %970 = vector.broadcast %cst_326 : f32 to vector<1x1xf32>
    %971 = arith.select %965, %969, %970 : vector<1x1xi1>, vector<1x1xf32>
    %972 = arith.mulf %956, %971 : vector<1x1xf32>
    %973 = arith.mulf %938, %938 : vector<1x32xf32>
    %974 = vector.shape_cast %973 : vector<1x32xf32> to vector<1x1x32xf32>
    %cst_327 = arith.constant dense<0.000000e+00> : vector<1xf32>
    %975 = vector.multi_reduction <add>, %974, %cst_327 [1, 2] : vector<1x1x32xf32> to vector<1xf32>
    %976 = vector.shape_cast %975 : vector<1xf32> to vector<1x1x1xf32>
    %977 = vector.extract %976[0, 0, 0] : f32 from vector<1x1x1xf32>
    %978 = vector.broadcast %977 : f32 to vector<1x1xf32>
    %979 = math.sqrt %978 : vector<1x1xf32>
    %cst_328 = arith.constant 1.000000e+00 : f32
    %980 = vector.broadcast %cst_328 : f32 to vector<1x1xf32>
    %981 = arith.cmpf ogt, %979, %980 : vector<1x1xf32>
    %cst_329 = arith.constant 1.000000e-07 : f32
    %982 = vector.broadcast %cst_329 : f32 to vector<1x1xf32>
    %983 = arith.addf %979, %982 : vector<1x1xf32>
    %cst_330 = arith.constant 1.000000e+00 : f32
    %984 = vector.broadcast %cst_330 : f32 to vector<1x1xf32>
    %985 = arith.divf %984, %983 : vector<1x1xf32>
    %cst_331 = arith.constant 1.000000e+00 : f32
    %986 = vector.broadcast %cst_331 : f32 to vector<1x1xf32>
    %987 = arith.select %981, %985, %986 : vector<1x1xi1>, vector<1x1xf32>
    %988 = arith.mulf %972, %987 : vector<1x1xf32>
    %cst_332 = arith.constant dense<0.000000e+00> : vector<1x32xf32>
    %989 = tpu.matmul %935, %941, %cst_332 {dimension_numbers = #tpu.dot_dimension_numbers<[1], [0], [0], [1], [0, 0, 1, 1], [], []>} : vector<1x32xf32>, vector<32x32xf32>, vector<1x32xf32> -> vector<1x32xf32>
    %990 = arith.mulf %989, %938 : vector<1x32xf32>
    %991 = vector.shape_cast %990 : vector<1x32xf32> to vector<1x1x32xf32>
    %cst_333 = arith.constant dense<0.000000e+00> : vector<1xf32>
    %992 = vector.multi_reduction <add>, %991, %cst_333 [1, 2] : vector<1x1x32xf32> to vector<1xf32>
    %993 = vector.shape_cast %992 : vector<1xf32> to vector<1x1x1xf32>
    %994 = vector.extract %993[0, 0, 0] : f32 from vector<1x1x1xf32>
    %995 = vector.broadcast %994 : f32 to vector<1x1xf32>
    %996 = arith.mulf %988, %995 : vector<1x1xf32>
    %cst_334 = arith.constant 0.000000e+00 : f32
    %997 = vector.broadcast %cst_334 : f32 to vector<1x1xf32>
    %998 = arith.subf %997, %996 : vector<1x1xf32>
    %999 = arith.index_cast %926 : i32 to index
    %1000 = memref.load %arg4[%999] : memref<8xi32, #tpu.memory_space<smem>>
    %1001 = arith.index_cast %926 : i32 to index
    %1002 = memref.load %arg5[%1001] : memref<8xi32, #tpu.memory_space<smem>>
    %1003 = arith.index_cast %926 : i32 to index
    %1004 = memref.load %arg6[%1003] : memref<8xi32, #tpu.memory_space<smem>>
    %1005 = arith.index_cast %1000 : i32 to index
    %c0_335 = arith.constant 0 : index
    %c0_336 = arith.constant 0 : index
    %1006 = vector.load %arg7[%1005, %c0_335, %c0_336] : memref<50x1x32xf32, #tpu.memory_space<vmem>>, vector<1x1x32xf32>
    %1007 = vector.shape_cast %1006 : vector<1x1x32xf32> to vector<1x32xf32>
    %1008 = arith.index_cast %1004 : i32 to index
    %c0_337 = arith.constant 0 : index
    %c0_338 = arith.constant 0 : index
    %1009 = vector.load %arg7[%1008, %c0_337, %c0_338] : memref<50x1x32xf32, #tpu.memory_space<vmem>>, vector<1x1x32xf32>
    %1010 = vector.shape_cast %1009 : vector<1x1x32xf32> to vector<1x32xf32>
    %1011 = arith.index_cast %1002 : i32 to index
    %c0_339 = arith.constant 0 : index
    %c0_340 = arith.constant 0 : index
    %1012 = vector.load %arg8[%1011, %c0_339, %c0_340] : memref<10x32x32xf32, #tpu.memory_space<vmem>>, vector<1x32x32xf32>
    %1013 = vector.shape_cast %1012 : vector<1x32x32xf32> to vector<32x32xf32>
    %1014 = arith.mulf %1007, %1007 : vector<1x32xf32>
    %1015 = vector.shape_cast %1014 : vector<1x32xf32> to vector<1x1x32xf32>
    %cst_341 = arith.constant dense<0.000000e+00> : vector<1xf32>
    %1016 = vector.multi_reduction <add>, %1015, %cst_341 [1, 2] : vector<1x1x32xf32> to vector<1xf32>
    %1017 = vector.shape_cast %1016 : vector<1xf32> to vector<1x1x1xf32>
    %1018 = vector.extract %1017[0, 0, 0] : f32 from vector<1x1x1xf32>
    %1019 = vector.broadcast %1018 : f32 to vector<1x1xf32>
    %1020 = math.sqrt %1019 : vector<1x1xf32>
    %cst_342 = arith.constant 1.000000e+00 : f32
    %1021 = vector.broadcast %cst_342 : f32 to vector<1x1xf32>
    %1022 = arith.cmpf ogt, %1020, %1021 : vector<1x1xf32>
    %cst_343 = arith.constant 1.000000e-07 : f32
    %1023 = vector.broadcast %cst_343 : f32 to vector<1x1xf32>
    %1024 = arith.addf %1020, %1023 : vector<1x1xf32>
    %cst_344 = arith.constant 1.000000e+00 : f32
    %1025 = vector.broadcast %cst_344 : f32 to vector<1x1xf32>
    %1026 = arith.divf %1025, %1024 : vector<1x1xf32>
    %cst_345 = arith.constant 1.000000e+00 : f32
    %1027 = vector.broadcast %cst_345 : f32 to vector<1x1xf32>
    %1028 = arith.select %1022, %1026, %1027 : vector<1x1xi1>, vector<1x1xf32>
    %1029 = arith.mulf %1013, %1013 : vector<32x32xf32>
    %1030 = vector.shape_cast %1029 : vector<32x32xf32> to vector<1x32x32xf32>
    %cst_346 = arith.constant dense<0.000000e+00> : vector<1xf32>
    %1031 = vector.multi_reduction <add>, %1030, %cst_346 [1, 2] : vector<1x32x32xf32> to vector<1xf32>
    %1032 = vector.shape_cast %1031 : vector<1xf32> to vector<1x1x1xf32>
    %1033 = vector.extract %1032[0, 0, 0] : f32 from vector<1x1x1xf32>
    %1034 = vector.broadcast %1033 : f32 to vector<1x1xf32>
    %1035 = math.sqrt %1034 : vector<1x1xf32>
    %cst_347 = arith.constant 1.000000e+00 : f32
    %1036 = vector.broadcast %cst_347 : f32 to vector<1x1xf32>
    %1037 = arith.cmpf ogt, %1035, %1036 : vector<1x1xf32>
    %cst_348 = arith.constant 1.000000e-07 : f32
    %1038 = vector.broadcast %cst_348 : f32 to vector<1x1xf32>
    %1039 = arith.addf %1035, %1038 : vector<1x1xf32>
    %cst_349 = arith.constant 1.000000e+00 : f32
    %1040 = vector.broadcast %cst_349 : f32 to vector<1x1xf32>
    %1041 = arith.divf %1040, %1039 : vector<1x1xf32>
    %cst_350 = arith.constant 1.000000e+00 : f32
    %1042 = vector.broadcast %cst_350 : f32 to vector<1x1xf32>
    %1043 = arith.select %1037, %1041, %1042 : vector<1x1xi1>, vector<1x1xf32>
    %1044 = arith.mulf %1028, %1043 : vector<1x1xf32>
    %1045 = arith.mulf %1010, %1010 : vector<1x32xf32>
    %1046 = vector.shape_cast %1045 : vector<1x32xf32> to vector<1x1x32xf32>
    %cst_351 = arith.constant dense<0.000000e+00> : vector<1xf32>
    %1047 = vector.multi_reduction <add>, %1046, %cst_351 [1, 2] : vector<1x1x32xf32> to vector<1xf32>
    %1048 = vector.shape_cast %1047 : vector<1xf32> to vector<1x1x1xf32>
    %1049 = vector.extract %1048[0, 0, 0] : f32 from vector<1x1x1xf32>
    %1050 = vector.broadcast %1049 : f32 to vector<1x1xf32>
    %1051 = math.sqrt %1050 : vector<1x1xf32>
    %cst_352 = arith.constant 1.000000e+00 : f32
    %1052 = vector.broadcast %cst_352 : f32 to vector<1x1xf32>
    %1053 = arith.cmpf ogt, %1051, %1052 : vector<1x1xf32>
    %cst_353 = arith.constant 1.000000e-07 : f32
    %1054 = vector.broadcast %cst_353 : f32 to vector<1x1xf32>
    %1055 = arith.addf %1051, %1054 : vector<1x1xf32>
    %cst_354 = arith.constant 1.000000e+00 : f32
    %1056 = vector.broadcast %cst_354 : f32 to vector<1x1xf32>
    %1057 = arith.divf %1056, %1055 : vector<1x1xf32>
    %cst_355 = arith.constant 1.000000e+00 : f32
    %1058 = vector.broadcast %cst_355 : f32 to vector<1x1xf32>
    %1059 = arith.select %1053, %1057, %1058 : vector<1x1xi1>, vector<1x1xf32>
    %1060 = arith.mulf %1044, %1059 : vector<1x1xf32>
    %cst_356 = arith.constant dense<0.000000e+00> : vector<1x32xf32>
    %1061 = tpu.matmul %1007, %1013, %cst_356 {dimension_numbers = #tpu.dot_dimension_numbers<[1], [0], [0], [1], [0, 0, 1, 1], [], []>} : vector<1x32xf32>, vector<32x32xf32>, vector<1x32xf32> -> vector<1x32xf32>
    %1062 = arith.mulf %1061, %1010 : vector<1x32xf32>
    %1063 = vector.shape_cast %1062 : vector<1x32xf32> to vector<1x1x32xf32>
    %cst_357 = arith.constant dense<0.000000e+00> : vector<1xf32>
    %1064 = vector.multi_reduction <add>, %1063, %cst_357 [1, 2] : vector<1x1x32xf32> to vector<1xf32>
    %1065 = vector.shape_cast %1064 : vector<1xf32> to vector<1x1x1xf32>
    %1066 = vector.extract %1065[0, 0, 0] : f32 from vector<1x1x1xf32>
    %1067 = vector.broadcast %1066 : f32 to vector<1x1xf32>
    %1068 = arith.mulf %1060, %1067 : vector<1x1xf32>
    %cst_358 = arith.constant 0.000000e+00 : f32
    %1069 = vector.broadcast %cst_358 : f32 to vector<1x1xf32>
    %1070 = arith.subf %1069, %1068 : vector<1x1xf32>
    %1071 = arith.subf %998, %1070 : vector<1x1xf32>
    %cst_359 = arith.constant 1.000000e+00 : f32
    %1072 = vector.broadcast %cst_359 : f32 to vector<1x1xf32>
    %1073 = arith.addf %1071, %1072 : vector<1x1xf32>
    %cst_360 = arith.constant 0.000000e+00 : f32
    %1074 = vector.broadcast %cst_360 : f32 to vector<1x1xf32>
    %1075 = arith.maximumf %1073, %1074 : vector<1x1xf32>
    %c8_i32_361 = arith.constant 8 : i32
    %1076 = arith.cmpi slt, %926, %c8_i32_361 : i32
    %cst_362 = arith.constant 0.000000e+00 : f32
    %1077 = vector.broadcast %cst_362 : f32 to vector<1x1xf32>
    %1078 = arith.select %1076, %1075, %1077 : vector<1x1xf32>
    %1079 = arith.addf %925, %1078 : vector<1x1xf32>
    %c7_i32 = arith.constant 7 : i32
    %1080 = arith.addi %0, %c7_i32 : i32
    %1081 = arith.index_cast %1080 : i32 to index
    %1082 = memref.load %arg1[%1081] : memref<8xi32, #tpu.memory_space<smem>>
    %1083 = arith.index_cast %1080 : i32 to index
    %1084 = memref.load %arg2[%1083] : memref<8xi32, #tpu.memory_space<smem>>
    %1085 = arith.index_cast %1080 : i32 to index
    %1086 = memref.load %arg3[%1085] : memref<8xi32, #tpu.memory_space<smem>>
    %1087 = arith.index_cast %1082 : i32 to index
    %c0_363 = arith.constant 0 : index
    %c0_364 = arith.constant 0 : index
    %1088 = vector.load %arg7[%1087, %c0_363, %c0_364] : memref<50x1x32xf32, #tpu.memory_space<vmem>>, vector<1x1x32xf32>
    %1089 = vector.shape_cast %1088 : vector<1x1x32xf32> to vector<1x32xf32>
    %1090 = arith.index_cast %1086 : i32 to index
    %c0_365 = arith.constant 0 : index
    %c0_366 = arith.constant 0 : index
    %1091 = vector.load %arg7[%1090, %c0_365, %c0_366] : memref<50x1x32xf32, #tpu.memory_space<vmem>>, vector<1x1x32xf32>
    %1092 = vector.shape_cast %1091 : vector<1x1x32xf32> to vector<1x32xf32>
    %1093 = arith.index_cast %1084 : i32 to index
    %c0_367 = arith.constant 0 : index
    %c0_368 = arith.constant 0 : index
    %1094 = vector.load %arg8[%1093, %c0_367, %c0_368] : memref<10x32x32xf32, #tpu.memory_space<vmem>>, vector<1x32x32xf32>
    %1095 = vector.shape_cast %1094 : vector<1x32x32xf32> to vector<32x32xf32>
    %1096 = arith.mulf %1089, %1089 : vector<1x32xf32>
    %1097 = vector.shape_cast %1096 : vector<1x32xf32> to vector<1x1x32xf32>
    %cst_369 = arith.constant dense<0.000000e+00> : vector<1xf32>
    %1098 = vector.multi_reduction <add>, %1097, %cst_369 [1, 2] : vector<1x1x32xf32> to vector<1xf32>
    %1099 = vector.shape_cast %1098 : vector<1xf32> to vector<1x1x1xf32>
    %1100 = vector.extract %1099[0, 0, 0] : f32 from vector<1x1x1xf32>
    %1101 = vector.broadcast %1100 : f32 to vector<1x1xf32>
    %1102 = math.sqrt %1101 : vector<1x1xf32>
    %cst_370 = arith.constant 1.000000e+00 : f32
    %1103 = vector.broadcast %cst_370 : f32 to vector<1x1xf32>
    %1104 = arith.cmpf ogt, %1102, %1103 : vector<1x1xf32>
    %cst_371 = arith.constant 1.000000e-07 : f32
    %1105 = vector.broadcast %cst_371 : f32 to vector<1x1xf32>
    %1106 = arith.addf %1102, %1105 : vector<1x1xf32>
    %cst_372 = arith.constant 1.000000e+00 : f32
    %1107 = vector.broadcast %cst_372 : f32 to vector<1x1xf32>
    %1108 = arith.divf %1107, %1106 : vector<1x1xf32>
    %cst_373 = arith.constant 1.000000e+00 : f32
    %1109 = vector.broadcast %cst_373 : f32 to vector<1x1xf32>
    %1110 = arith.select %1104, %1108, %1109 : vector<1x1xi1>, vector<1x1xf32>
    %1111 = arith.mulf %1095, %1095 : vector<32x32xf32>
    %1112 = vector.shape_cast %1111 : vector<32x32xf32> to vector<1x32x32xf32>
    %cst_374 = arith.constant dense<0.000000e+00> : vector<1xf32>
    %1113 = vector.multi_reduction <add>, %1112, %cst_374 [1, 2] : vector<1x32x32xf32> to vector<1xf32>
    %1114 = vector.shape_cast %1113 : vector<1xf32> to vector<1x1x1xf32>
    %1115 = vector.extract %1114[0, 0, 0] : f32 from vector<1x1x1xf32>
    %1116 = vector.broadcast %1115 : f32 to vector<1x1xf32>
    %1117 = math.sqrt %1116 : vector<1x1xf32>
    %cst_375 = arith.constant 1.000000e+00 : f32
    %1118 = vector.broadcast %cst_375 : f32 to vector<1x1xf32>
    %1119 = arith.cmpf ogt, %1117, %1118 : vector<1x1xf32>
    %cst_376 = arith.constant 1.000000e-07 : f32
    %1120 = vector.broadcast %cst_376 : f32 to vector<1x1xf32>
    %1121 = arith.addf %1117, %1120 : vector<1x1xf32>
    %cst_377 = arith.constant 1.000000e+00 : f32
    %1122 = vector.broadcast %cst_377 : f32 to vector<1x1xf32>
    %1123 = arith.divf %1122, %1121 : vector<1x1xf32>
    %cst_378 = arith.constant 1.000000e+00 : f32
    %1124 = vector.broadcast %cst_378 : f32 to vector<1x1xf32>
    %1125 = arith.select %1119, %1123, %1124 : vector<1x1xi1>, vector<1x1xf32>
    %1126 = arith.mulf %1110, %1125 : vector<1x1xf32>
    %1127 = arith.mulf %1092, %1092 : vector<1x32xf32>
    %1128 = vector.shape_cast %1127 : vector<1x32xf32> to vector<1x1x32xf32>
    %cst_379 = arith.constant dense<0.000000e+00> : vector<1xf32>
    %1129 = vector.multi_reduction <add>, %1128, %cst_379 [1, 2] : vector<1x1x32xf32> to vector<1xf32>
    %1130 = vector.shape_cast %1129 : vector<1xf32> to vector<1x1x1xf32>
    %1131 = vector.extract %1130[0, 0, 0] : f32 from vector<1x1x1xf32>
    %1132 = vector.broadcast %1131 : f32 to vector<1x1xf32>
    %1133 = math.sqrt %1132 : vector<1x1xf32>
    %cst_380 = arith.constant 1.000000e+00 : f32
    %1134 = vector.broadcast %cst_380 : f32 to vector<1x1xf32>
    %1135 = arith.cmpf ogt, %1133, %1134 : vector<1x1xf32>
    %cst_381 = arith.constant 1.000000e-07 : f32
    %1136 = vector.broadcast %cst_381 : f32 to vector<1x1xf32>
    %1137 = arith.addf %1133, %1136 : vector<1x1xf32>
    %cst_382 = arith.constant 1.000000e+00 : f32
    %1138 = vector.broadcast %cst_382 : f32 to vector<1x1xf32>
    %1139 = arith.divf %1138, %1137 : vector<1x1xf32>
    %cst_383 = arith.constant 1.000000e+00 : f32
    %1140 = vector.broadcast %cst_383 : f32 to vector<1x1xf32>
    %1141 = arith.select %1135, %1139, %1140 : vector<1x1xi1>, vector<1x1xf32>
    %1142 = arith.mulf %1126, %1141 : vector<1x1xf32>
    %cst_384 = arith.constant dense<0.000000e+00> : vector<1x32xf32>
    %1143 = tpu.matmul %1089, %1095, %cst_384 {dimension_numbers = #tpu.dot_dimension_numbers<[1], [0], [0], [1], [0, 0, 1, 1], [], []>} : vector<1x32xf32>, vector<32x32xf32>, vector<1x32xf32> -> vector<1x32xf32>
    %1144 = arith.mulf %1143, %1092 : vector<1x32xf32>
    %1145 = vector.shape_cast %1144 : vector<1x32xf32> to vector<1x1x32xf32>
    %cst_385 = arith.constant dense<0.000000e+00> : vector<1xf32>
    %1146 = vector.multi_reduction <add>, %1145, %cst_385 [1, 2] : vector<1x1x32xf32> to vector<1xf32>
    %1147 = vector.shape_cast %1146 : vector<1xf32> to vector<1x1x1xf32>
    %1148 = vector.extract %1147[0, 0, 0] : f32 from vector<1x1x1xf32>
    %1149 = vector.broadcast %1148 : f32 to vector<1x1xf32>
    %1150 = arith.mulf %1142, %1149 : vector<1x1xf32>
    %cst_386 = arith.constant 0.000000e+00 : f32
    %1151 = vector.broadcast %cst_386 : f32 to vector<1x1xf32>
    %1152 = arith.subf %1151, %1150 : vector<1x1xf32>
    %1153 = arith.index_cast %1080 : i32 to index
    %1154 = memref.load %arg4[%1153] : memref<8xi32, #tpu.memory_space<smem>>
    %1155 = arith.index_cast %1080 : i32 to index
    %1156 = memref.load %arg5[%1155] : memref<8xi32, #tpu.memory_space<smem>>
    %1157 = arith.index_cast %1080 : i32 to index
    %1158 = memref.load %arg6[%1157] : memref<8xi32, #tpu.memory_space<smem>>
    %1159 = arith.index_cast %1154 : i32 to index
    %c0_387 = arith.constant 0 : index
    %c0_388 = arith.constant 0 : index
    %1160 = vector.load %arg7[%1159, %c0_387, %c0_388] : memref<50x1x32xf32, #tpu.memory_space<vmem>>, vector<1x1x32xf32>
    %1161 = vector.shape_cast %1160 : vector<1x1x32xf32> to vector<1x32xf32>
    %1162 = arith.index_cast %1158 : i32 to index
    %c0_389 = arith.constant 0 : index
    %c0_390 = arith.constant 0 : index
    %1163 = vector.load %arg7[%1162, %c0_389, %c0_390] : memref<50x1x32xf32, #tpu.memory_space<vmem>>, vector<1x1x32xf32>
    %1164 = vector.shape_cast %1163 : vector<1x1x32xf32> to vector<1x32xf32>
    %1165 = arith.index_cast %1156 : i32 to index
    %c0_391 = arith.constant 0 : index
    %c0_392 = arith.constant 0 : index
    %1166 = vector.load %arg8[%1165, %c0_391, %c0_392] : memref<10x32x32xf32, #tpu.memory_space<vmem>>, vector<1x32x32xf32>
    %1167 = vector.shape_cast %1166 : vector<1x32x32xf32> to vector<32x32xf32>
    %1168 = arith.mulf %1161, %1161 : vector<1x32xf32>
    %1169 = vector.shape_cast %1168 : vector<1x32xf32> to vector<1x1x32xf32>
    %cst_393 = arith.constant dense<0.000000e+00> : vector<1xf32>
    %1170 = vector.multi_reduction <add>, %1169, %cst_393 [1, 2] : vector<1x1x32xf32> to vector<1xf32>
    %1171 = vector.shape_cast %1170 : vector<1xf32> to vector<1x1x1xf32>
    %1172 = vector.extract %1171[0, 0, 0] : f32 from vector<1x1x1xf32>
    %1173 = vector.broadcast %1172 : f32 to vector<1x1xf32>
    %1174 = math.sqrt %1173 : vector<1x1xf32>
    %cst_394 = arith.constant 1.000000e+00 : f32
    %1175 = vector.broadcast %cst_394 : f32 to vector<1x1xf32>
    %1176 = arith.cmpf ogt, %1174, %1175 : vector<1x1xf32>
    %cst_395 = arith.constant 1.000000e-07 : f32
    %1177 = vector.broadcast %cst_395 : f32 to vector<1x1xf32>
    %1178 = arith.addf %1174, %1177 : vector<1x1xf32>
    %cst_396 = arith.constant 1.000000e+00 : f32
    %1179 = vector.broadcast %cst_396 : f32 to vector<1x1xf32>
    %1180 = arith.divf %1179, %1178 : vector<1x1xf32>
    %cst_397 = arith.constant 1.000000e+00 : f32
    %1181 = vector.broadcast %cst_397 : f32 to vector<1x1xf32>
    %1182 = arith.select %1176, %1180, %1181 : vector<1x1xi1>, vector<1x1xf32>
    %1183 = arith.mulf %1167, %1167 : vector<32x32xf32>
    %1184 = vector.shape_cast %1183 : vector<32x32xf32> to vector<1x32x32xf32>
    %cst_398 = arith.constant dense<0.000000e+00> : vector<1xf32>
    %1185 = vector.multi_reduction <add>, %1184, %cst_398 [1, 2] : vector<1x32x32xf32> to vector<1xf32>
    %1186 = vector.shape_cast %1185 : vector<1xf32> to vector<1x1x1xf32>
    %1187 = vector.extract %1186[0, 0, 0] : f32 from vector<1x1x1xf32>
    %1188 = vector.broadcast %1187 : f32 to vector<1x1xf32>
    %1189 = math.sqrt %1188 : vector<1x1xf32>
    %cst_399 = arith.constant 1.000000e+00 : f32
    %1190 = vector.broadcast %cst_399 : f32 to vector<1x1xf32>
    %1191 = arith.cmpf ogt, %1189, %1190 : vector<1x1xf32>
    %cst_400 = arith.constant 1.000000e-07 : f32
    %1192 = vector.broadcast %cst_400 : f32 to vector<1x1xf32>
    %1193 = arith.addf %1189, %1192 : vector<1x1xf32>
    %cst_401 = arith.constant 1.000000e+00 : f32
    %1194 = vector.broadcast %cst_401 : f32 to vector<1x1xf32>
    %1195 = arith.divf %1194, %1193 : vector<1x1xf32>
    %cst_402 = arith.constant 1.000000e+00 : f32
    %1196 = vector.broadcast %cst_402 : f32 to vector<1x1xf32>
    %1197 = arith.select %1191, %1195, %1196 : vector<1x1xi1>, vector<1x1xf32>
    %1198 = arith.mulf %1182, %1197 : vector<1x1xf32>
    %1199 = arith.mulf %1164, %1164 : vector<1x32xf32>
    %1200 = vector.shape_cast %1199 : vector<1x32xf32> to vector<1x1x32xf32>
    %cst_403 = arith.constant dense<0.000000e+00> : vector<1xf32>
    %1201 = vector.multi_reduction <add>, %1200, %cst_403 [1, 2] : vector<1x1x32xf32> to vector<1xf32>
    %1202 = vector.shape_cast %1201 : vector<1xf32> to vector<1x1x1xf32>
    %1203 = vector.extract %1202[0, 0, 0] : f32 from vector<1x1x1xf32>
    %1204 = vector.broadcast %1203 : f32 to vector<1x1xf32>
    %1205 = math.sqrt %1204 : vector<1x1xf32>
    %cst_404 = arith.constant 1.000000e+00 : f32
    %1206 = vector.broadcast %cst_404 : f32 to vector<1x1xf32>
    %1207 = arith.cmpf ogt, %1205, %1206 : vector<1x1xf32>
    %cst_405 = arith.constant 1.000000e-07 : f32
    %1208 = vector.broadcast %cst_405 : f32 to vector<1x1xf32>
    %1209 = arith.addf %1205, %1208 : vector<1x1xf32>
    %cst_406 = arith.constant 1.000000e+00 : f32
    %1210 = vector.broadcast %cst_406 : f32 to vector<1x1xf32>
    %1211 = arith.divf %1210, %1209 : vector<1x1xf32>
    %cst_407 = arith.constant 1.000000e+00 : f32
    %1212 = vector.broadcast %cst_407 : f32 to vector<1x1xf32>
    %1213 = arith.select %1207, %1211, %1212 : vector<1x1xi1>, vector<1x1xf32>
    %1214 = arith.mulf %1198, %1213 : vector<1x1xf32>
    %cst_408 = arith.constant dense<0.000000e+00> : vector<1x32xf32>
    %1215 = tpu.matmul %1161, %1167, %cst_408 {dimension_numbers = #tpu.dot_dimension_numbers<[1], [0], [0], [1], [0, 0, 1, 1], [], []>} : vector<1x32xf32>, vector<32x32xf32>, vector<1x32xf32> -> vector<1x32xf32>
    %1216 = arith.mulf %1215, %1164 : vector<1x32xf32>
    %1217 = vector.shape_cast %1216 : vector<1x32xf32> to vector<1x1x32xf32>
    %cst_409 = arith.constant dense<0.000000e+00> : vector<1xf32>
    %1218 = vector.multi_reduction <add>, %1217, %cst_409 [1, 2] : vector<1x1x32xf32> to vector<1xf32>
    %1219 = vector.shape_cast %1218 : vector<1xf32> to vector<1x1x1xf32>
    %1220 = vector.extract %1219[0, 0, 0] : f32 from vector<1x1x1xf32>
    %1221 = vector.broadcast %1220 : f32 to vector<1x1xf32>
    %1222 = arith.mulf %1214, %1221 : vector<1x1xf32>
    %cst_410 = arith.constant 0.000000e+00 : f32
    %1223 = vector.broadcast %cst_410 : f32 to vector<1x1xf32>
    %1224 = arith.subf %1223, %1222 : vector<1x1xf32>
    %1225 = arith.subf %1152, %1224 : vector<1x1xf32>
    %cst_411 = arith.constant 1.000000e+00 : f32
    %1226 = vector.broadcast %cst_411 : f32 to vector<1x1xf32>
    %1227 = arith.addf %1225, %1226 : vector<1x1xf32>
    %cst_412 = arith.constant 0.000000e+00 : f32
    %1228 = vector.broadcast %cst_412 : f32 to vector<1x1xf32>
    %1229 = arith.maximumf %1227, %1228 : vector<1x1xf32>
    %c8_i32_413 = arith.constant 8 : i32
    %1230 = arith.cmpi slt, %1080, %c8_i32_413 : i32
    %cst_414 = arith.constant 0.000000e+00 : f32
    %1231 = vector.broadcast %cst_414 : f32 to vector<1x1xf32>
    %1232 = arith.select %1230, %1229, %1231 : vector<1x1xf32>
    %1233 = arith.addf %1079, %1232 : vector<1x1xf32>
    %1234 = vector.shape_cast %1233 : vector<1x1xf32> to vector<1x1x1xf32>
    %1235 = vector.broadcast %1234 : vector<1x1x1xf32> to vector<1x1x128xf32>
    %c0_415 = arith.constant 0 : index
    %c0_416 = arith.constant 0 : index
    %c0_417 = arith.constant 0 : index
    %1236 = vector.load %arg9[%c0_415, %c0_416, %c0_417] : memref<1x1x128xf32, #tpu.memory_space<vmem>>, vector<1x1x128xf32>
    tpu.vector_store %arg9[%c0_415, %c0_416, %c0_417], %1235 {strides = array<i32>} : memref<1x1x128xf32, #tpu.memory_space<vmem>>, vector<1x1x128xf32>,
    return
  }
  func.func @transform_0(%arg0: i32, %arg1: memref<8xi32, #tpu.memory_space<smem>>, %arg2: memref<8xi32, #tpu.memory_space<smem>>, %arg3: memref<8xi32, #tpu.memory_space<smem>>, %arg4: memref<8xi32, #tpu.memory_space<smem>>, %arg5: memref<8xi32, #tpu.memory_space<smem>>, %arg6: memref<8xi32, #tpu.memory_space<smem>>) -> (i32, i32, i32) {
    %c0_i32 = arith.constant 0 : i32
    %c0_i32_0 = arith.constant 0 : i32
    %c0_i32_1 = arith.constant 0 : i32
    %c0_i32_2 = arith.constant 0 : i32
    return %c0_i32, %c0_i32_0, %c0_i32_1 : i32, i32, i32
  }
  func.func @transform_1(%arg0: i32, %arg1: memref<8xi32, #tpu.memory_space<smem>>, %arg2: memref<8xi32, #tpu.memory_space<smem>>, %arg3: memref<8xi32, #tpu.memory_space<smem>>, %arg4: memref<8xi32, #tpu.memory_space<smem>>, %arg5: memref<8xi32, #tpu.memory_space<smem>>, %arg6: memref<8xi32, #tpu.memory_space<smem>>) -> (i32, i32, i32) {
    %c0_i32 = arith.constant 0 : i32
    %c0_i32_0 = arith.constant 0 : i32
    %c0_i32_1 = arith.constant 0 : i32
    %c0_i32_2 = arith.constant 0 : i32
    return %c0_i32, %c0_i32_0, %c0_i32_1 : i32, i32, i32
  }
  func.func @transform_2(%arg0: i32, %arg1: memref<8xi32, #tpu.memory_space<smem>>, %arg2: memref<8xi32, #tpu.memory_space<smem>>, %arg3: memref<8xi32, #tpu.memory_space<smem>>, %arg4: memref<8xi32, #tpu.memory_space<smem>>, %arg5: memref<8xi32, #tpu.memory_space<smem>>, %arg6: memref<8xi32, #tpu.memory_space<smem>>) -> (i32, i32, i32) {
    %c0_i32 = arith.constant 0 : i32
    %c0_i32_0 = arith.constant 0 : i32
    %c0_i32_1 = arith.constant 0 : i32
    return %arg0, %c0_i32, %c0_i32_0 : i32, i32, i32
  }
}

</mosaic_0001>

<bundles_post_ra>
// kernel: tpu_custom_call.1
= control target key start
LH: loop header
LB: loop body
LE: loop exit
PB: predicated region body
PF: predicated region fallthrough
CT: control target
= control target key end

     0   :  { %s5904_s0 = inlined_call_operand.vmem [shape: s32[8], index: 0, kind: input, shape index: {}]   ;;  %s5905_s6 = inlined_call_operand.vmem [shape: f32[50,1,32], index: 6, kind: input, shape index: {}]   ;;  %s5906_s7 = inlined_call_operand.hbm [shape: f32[10,32,32], index: 7, kind: input, shape index: {}]   ;;  %s5907_s8 = inlined_call_operand.hbm [shape: f32[1,1,128], index: 8, kind: output, shape index: {}]   ;;  %s5908_s1 = inlined_call_operand.vmem [shape: s32[8], index: 1, kind: input, shape index: {}]   ;;  %s5909_s2 = inlined_call_operand.vmem [shape: s32[8], index: 2, kind: input, shape index: {}]   ;;  %s5910_s3 = inlined_call_operand.vmem [shape: s32[8], index: 3, kind: input, shape index: {}]   ;;  %s5911_s4 = inlined_call_operand.vmem [shape: s32[8], index: 4, kind: input, shape index: {}]   ;;  %s5912_s5 = inlined_call_operand.vmem [shape: s32[8], index: 5, kind: input, shape index: {}]  }
   0x1   :  { %s13_s29 = sshll.u32 %s5904_s0, 4  ;;  %s17_s10 = sshll.u32 %s5908_s1, 4  ;;  %s14_s29 = int_to_ptr.vmem [resolvable:$true] %s13_s29  ;;  %s18_s10 = int_to_ptr.vmem [resolvable:$true] %s17_s10 }
   0x2   :  { %s3810_s11 = scalar_lea.vmem %s14_s29, 16  ;;  %p3815_p1 = scmp.lt.s32.totalorder %s14_s29, %s14_s29 }
   0x3   :  { %p3811_p0 = scmp.ne.s32.totalorder %s14_s29, %s3810_s11  ;;  %p3816_p2 = scmp.lt.s32.totalorder %s3810_s11, %s3810_s11 }
   0x5   :  { %p3817_p3 = por %p3816_p2, %p3815_p1 }
   0x7   :  { %p3818_p4 = pnand %p3817_p3, %p3811_p0 }
   0x9   :  { %3821 = shalt.err (!%p3818_p4)  }
   0xa   :  { %s3928_s12 = smov [#allocation3]   ;;  %s3822_s13 = scalar_lea.vmem %s18_s10, 16 }
   0xb   :  { %16 = dma.vmem_to_smem %s14_s29, 16, %s3928_s12, [#allocation2] }
   0xc   :  { %p3823_p5 = scmp.ne.s32.totalorder %s18_s10, %s3822_s13  ;;  %p3827_p6 = scmp.lt.s32.totalorder %s18_s10, %s18_s10 }
   0xd   :  { %p3828_p7 = scmp.lt.s32.totalorder %s3822_s13, %s3822_s13 }
   0xf   :  { %p3829_p8 = por %p3828_p7, %p3827_p6 }
  0x11   :  { %p3830_p9 = pnand %p3829_p8, %p3823_p5 }
  0x13   :  { %3833 = shalt.err (!%p3830_p9)  }
  0x14   :  { %s3929_s0 = smov [#allocation4]   ;;  %s21_s15 = sshll.u32 %s5909_s2, 4  ;;  %s22_s15 = int_to_ptr.vmem [resolvable:$true] %s21_s15 }
  0x15   :  { %20 = dma.vmem_to_smem %s18_s10, 16, %s3929_s0, [#allocation2] }
  0x16   :  { %s25_s18 = sshll.u32 %s5910_s3, 4  ;;  %s3834_s19 = scalar_lea.vmem %s22_s15, 16  ;;  %s26_s18 = int_to_ptr.vmem [resolvable:$true] %s25_s18 }
  0x17   :  { %p3835_p10 = scmp.ne.s32.totalorder %s22_s15, %s3834_s19  ;;  %p3839_p11 = scmp.lt.s32.totalorder %s22_s15, %s22_s15 }
  0x18   :  { %p3840_p12 = scmp.lt.s32.totalorder %s3834_s19, %s3834_s19 }
  0x1a   :  { %p3841_p13 = por %p3840_p12, %p3839_p11 }
  0x1c   :  { %p3842_p0 = pnand %p3841_p13, %p3835_p10 }
  0x1e   :  { %3845 = shalt.err (!%p3842_p0)  }
  0x1f   :  { %s3930_s20 = smov [#allocation5]   ;;  %s3846_s21 = scalar_lea.vmem %s26_s18, 16 }
  0x20   :  { %24 = dma.vmem_to_smem %s22_s15, 16, %s3930_s20, [#allocation2] }
  0x21   :  { %p3847_p1 = scmp.ne.s32.totalorder %s26_s18, %s3846_s21  ;;  %p3851_p2 = scmp.lt.s32.totalorder %s26_s18, %s26_s18 }
  0x22   :  { %p3852_p3 = scmp.lt.s32.totalorder %s3846_s21, %s3846_s21 }
  0x24   :  { %p3853_p4 = por %p3852_p3, %p3851_p2 }
  0x26   :  { %p3854_p5 = pnand %p3853_p4, %p3847_p1 }
  0x28   :  { %3857 = shalt.err (!%p3854_p5)  }
  0x29   :  { %s3931_s2 = smov [#allocation6]   ;;  %s29_s23 = sshll.u32 %s5911_s4, 4  ;;  %s30_s23 = int_to_ptr.vmem [resolvable:$true] %s29_s23 }
  0x2a   :  { %28 = dma.vmem_to_smem %s26_s18, 16, %s3931_s2, [#allocation2] }
  0x2b   :  { %s33_s26 = sshll.u32 %s5912_s5, 4  ;;  %s3858_s27 = scalar_lea.vmem %s30_s23, 16  ;;  %s34_s26 = int_to_ptr.vmem [resolvable:$true] %s33_s26 }
  0x2c   :  { %p3859_p6 = scmp.ne.s32.totalorder %s30_s23, %s3858_s27  ;;  %p3863_p7 = scmp.lt.s32.totalorder %s30_s23, %s30_s23 }
  0x2d   :  { %p3864_p8 = scmp.lt.s32.totalorder %s3858_s27, %s3858_s27 }
  0x2f   :  { %p3865_p9 = por %p3864_p8, %p3863_p7 }
  0x31   :  { %p3866_p10 = pnand %p3865_p9, %p3859_p6 }
  0x33   :  { %3869 = shalt.err (!%p3866_p10)  }
  0x34   :  { %s3932_s28 = smov [#allocation7]   ;;  %s3870_s29 = scalar_lea.vmem %s34_s26, 16 }
  0x35   :  { %32 = dma.vmem_to_smem %s30_s23, 16, %s3932_s28, [#allocation2] }
  0x36   :  { %p3871_p11 = scmp.ne.s32.totalorder %s34_s26, %s3870_s29  ;;  %p3875_p12 = scmp.lt.s32.totalorder %s34_s26, %s34_s26 }
  0x37   :  { %p3876_p13 = scmp.lt.s32.totalorder %s3870_s29, %s3870_s29 }
  0x39   :  { %p3877_p0 = por %p3876_p13, %p3875_p12 }
  0x3b   :  { %p3878_p1 = pnand %p3877_p0, %p3871_p11 }
  0x3d   :  { %3881 = shalt.err (!%p3878_p1)  }
  0x3e   :  { %s3933_s4 = smov [#allocation8]  }
  0x3f   :  { %36 = dma.vmem_to_smem %s34_s26, 16, %s3933_s4, [#allocation2] }
  0x40   :  { %3922 = dma.done.wait [#allocation2], 96 }
  0x41   :  { %3923 = vsyncadd [#allocation2], 4294967200 }
  0x42   :  { %38 = sfence }
  0x43   :  { %39 = vsyncpa [#allocation10], 0 }
  0x44   :  { %40 = vsyncpa [#allocation11], 0  ;;  %s3934_s5 = smov [#allocation9]  }
  0x45   :  { %s48_s30 = sshll.u32 %s3934_s5, 4  ;;  %s49_s30 = int_to_ptr.vmem [resolvable:$true] %s48_s30 }
  0x46   :  { %s3890_s9 = scalar_lea.vmem %s49_s30, 5120  ;;  %p3895_p3 = scmp.lt.s32.totalorder %s49_s30, %s49_s30 }
  0x47   :  { %p3891_p2 = scmp.ne.s32.totalorder %s49_s30, %s3890_s9  ;;  %p3896_p4 = scmp.lt.s32.totalorder %s3890_s9, %s3890_s9 }
  0x49   :  { %p3897_p5 = por %p3896_p4, %p3895_p3 }
  0x4b   :  { %p3898_p6 = pnand %p3897_p5, %p3891_p2 }
  0x4d   :  { %3901 = shalt.err (!%p3898_p6)
}
  0x4e   :  { %s3935_s10 = smov 128   ;;  %s3936_s11 = smov 8  }
  0x4f   :  { %54 = dma.hbm_to_vmem [thread:$0]  %s5906_s7, 5120, %s49_s30, [#allocation10], %s3935_s10, %s3935_s10, %s3936_s11  }
  0x50   :  { %3924 = dma.done.wait [#allocation10], 5120  }
  0x51   :  { %3925 = vsyncadd [#allocation10], 4294962176  ;;  %v3937_v0 = vmov 0.0   ;;  %s60_s0 = sld [smem:[#allocation4]]  ;;  %vm3938_vm0 = vmmov 0   ;;  %vm101_vm1 = vcmask 261120  }
  0x52   :  { %3302 = vmatprep.subr.mxu0 %v3937_v0  ;;  %3313 = vmatprep.subr.mxu1 %v3937_v0  ;;  %s245_s1 = sld [smem:[#allocation7]]  ;;  %vm73_vm2 = vcmask 253952  }
  0x53   :  { %3310 = vmatprep.mubr.msk.f32.mxu0 %vm3938_vm0, %v3937_v0  ;;  %3321 = vmatprep.mubr.msk.f32.mxu1 %vm3938_vm0, %v3937_v0  ;;  %s4012_s14 = sld [smem:[#allocation3]] }
  0x54   :  { %s4014_s7 = sld [smem:[#allocation4 + $0x1]] }
  0x55   :  { %s4016_s15 = sld [smem:[#allocation6]] }
  0x56   :  { %s4018_s16 = sld [smem:[#allocation7 + $0x1]] }
  0x57   :  { %s3148_s17 = sshll.u32 %s60_s0, 5  ;;  %s4025_s23 = sld [smem:[#allocation4 + $0x2]] }
  0x58   :  { %s3150_s18 = sshll.u32 %s245_s1, 5  ;;  %s67_s19 = scalar_lea.vmem [#allocation9], %s3148_s17 }
  0x59   :  { %v71_v1 = vld [vmem:[%s67_s19 + $0x18] sm:$0xff]  ;;  %v70_v2 = vld [vmem:[%s67_s19 + $0x10] sm:$0xff]  ;;  %v69_v3 = vld [vmem:[%s67_s19 + $0x8] sm:$0xff]  ;;  %s62_s2 = scalar_lea.vmem %s5905_s6, %s4012_s14  ;;  %s252_s3 = scalar_lea.vmem [#allocation9], %s3150_s18 }
  0x5a   :  { %3303 = vmatpush3.msra.mxu0 %v71_v1  ;;  %v99_v4 = vmul.f32 %v70_v2, %v70_v2  ;;  %v256_v5 = vld [vmem:[%s252_s3 + $0x18] sm:$0xff]  ;;  %v98_v6 = vmul.f32 %v69_v3, %v69_v3  ;;  %v255_v7 = vld [vmem:[%s252_s3 + $0x10] sm:$0xff]  ;;  %v68_v8 = vld [vmem:[%s67_s19] sm:$0xff]  ;;  %s3155_s22 = sshll.u32 %s4014_s7, 5  ;;  %v100_v12 = vmul.f32 %v71_v1, %v71_v1  ;;  %s4035_s28 = sld [smem:[#allocation3 + $0x1]] }
  0x5b   :  { %3304 = vmatprep.subr.mxu0 %v3937_v0  ;;  %3314 = vmatpush3.msra.mxu1 %v256_v5  ;;  %v97_v9 = vmul.f32 %v68_v8, %v68_v8  ;;  %v254_v10 = vld [vmem:[%s252_s3 + $0x8] sm:$0xff]  ;;  %v253_v11 = vld [vmem:[%s252_s3] sm:$0xff]  ;;  %s247_s26 = scalar_lea.vmem %s5905_s6, %s4016_s15  ;;  %v283_v16 = vmul.f32 %v255_v7, %v255_v7  ;;  %v284_v19 = vmul.f32 %v256_v5, %v256_v5  ;;  %s445_s29 = scalar_lea.vmem [#allocation9], %s3155_s22 }
  0x5c   :  { %3305 = vmatpush3.msra.mxu0 %v70_v2  ;;  %3315 = vmatprep.subr.mxu1 %v3937_v0  ;;  %v103_v13 = vsel %vm101_vm1, %v98_v6, 0.0  ;;  %v282_v14 = vmul.f32 %v254_v10, %v254_v10  ;;  %v281_v15 = vmul.f32 %v253_v11, %v253_v11  ;;  %s3160_s27 = sshll.u32 %s4018_s16, 5  ;;  %v4039_v18 = vld [vmem:[%s62_s2] sm:$0x1]  ;;  %v449_v22 = vld [vmem:[%s445_s29 + $0x18] sm:$0xff]  ;;  %v105_v25 = vsel %vm101_vm1, %v99_v4, 0.0 }
  0x5d   :  { %3306 = vmatprep.subr.mxu0 %v3937_v0  ;;  %3316 = vmatpush3.msra.mxu1 %v255_v7  ;;  %v102_v17 = vsel %vm101_vm1, %v97_v9, 0.0  ;;  %v4044_v23 = vld [vmem:[%s247_s26] sm:$0x1]  ;;  %v448_v26 = vld [vmem:[%s445_s29 + $0x10] sm:$0xff]  ;;  %v447_v27 = vld [vmem:[%s445_s29 + $0x8] sm:$0xff]  ;;  %s628_s4 = scalar_lea.vmem [#allocation9], %s3160_s27  ;;  %v477_v46 = vmul.f32 %v449_v22, %v449_v22 }
  0x5e   :  { %3307 = vmatpush3.msra.mxu0 %v69_v3  ;;  %3317 = vmatprep.subr.mxu1 %v3937_v0  ;;  %v286_v20 = vsel %vm101_vm1, %v282_v14, 0.0  ;;  %v285_v21 = vsel %vm101_vm1, %v281_v15, 0.0  ;;  %v4046_v24 = vld [vmem:[%s445_s29] sm:$0xff]  ;;  %v4052_v29 = vld [vmem:[%s628_s4 + $0x8] sm:$0xff]  ;;  %s4054_s5 = sld [smem:[#allocation6 + $0x1]]  ;;  %v104_v30 = vadd.f32 %v103_v13, %v102_v17  ;;  %v476_v31 = vmul.f32 %v448_v26, %v448_v26  ;;  %s3165_s30 = sshll.u32 %s4025_s23, 5 }
  0x5f   :  { %3308 = vmatprep.subr.mxu0 %v3937_v0  ;;  %3318 = vmatpush3.msra.mxu1 %v254_v10  ;;  %v474_v28 = vmul.f32 %v4046_v24, %v4046_v24  ;;  %v475_v32 = vmul.f32 %v447_v27, %v447_v27  ;;  %v658_v33 = vmul.f32 %v4052_v29, %v4052_v29  ;;  %v4059_v34 = vld [vmem:[%s628_s4] sm:$0xff]  ;;  %s4062_s9 = sld [smem:[#allocation7 + $0x2]]  ;;  %v107_v35 = vsel %vm101_vm1, %v100_v12, 0.0  ;;  %v632_v36 = vld [vmem:[%s628_s4 + $0x18] sm:$0xff]  ;;  %v631_v37 = vld [vmem:[%s628_s4 + $0x10] sm:$0xff]  ;;  %s821_s10 = scalar_lea.vmem [#allocation9], %s3165_s30 }
  0x60   :  { %3309 = vmatpush3.msra.mxu0 %v68_v8  ;;  %3319 = vmatprep.subr.mxu1 %v3937_v0  ;;  %v657_v38 = vmul.f32 %v4059_v34, %v4059_v34  ;;  %v106_v39 = vadd.f32 %v105_v25, %v104_v30  ;;  %v287_v40 = vadd.f32 %v286_v20, %v285_v21  ;;  %v288_v41 = vsel %vm101_vm1, %v283_v16, 0.0  ;;  %v4071_v43 = vld [vmem:[%s821_s10 + $0x10] sm:$0xff]  ;;  %v4073_v44 = vld [vmem:[%s821_s10 + $0x8] sm:$0xff]  ;;  %s4075_s11 = sld [smem:[#allocation4 + $0x3]]  ;;  %v4085_v50 = vld [vmem:[%s821_s10] sm:$0xff]  ;;  %s440_s0 = scalar_lea.vmem %s5905_s6, %s4035_s28 }
  0x61   :  { %3311 = vmatmul.mubr.msk.f32.vlgmr.msra.gmra.mxu0 %vm101_vm1, %v4039_v18  ;;  %3324 = vmatprep.subr.mxu0 %v3937_v0  ;;  %v659_v42 = vmul.f32 %v631_v37, %v631_v37  ;;  %v290_v45 = vsel %vm101_vm1, %v284_v19, 0.0  ;;  %v660_v47 = vmul.f32 %v632_v36, %v632_v36  ;;  %v852_v48 = vmul.f32 %v4071_v43, %v4071_v43  ;;  %s4097_s1 = sld [smem:[#allocation7 + $0x3]]  ;;  %v825_v57 = vld [vmem:[%s821_s10 + $0x18] sm:$0xff]  ;;  %v4113_v3 = vld [vmem:[%s440_s0] sm:$0x1] }
  0x62   :  { %3320 = vmatpush3.msra.mxu1 %v253_v11  ;;  %3325 = vmatpush3.msra.mxu0 %v449_v22  ;;  %v851_v49 = vmul.f32 %v4073_v44, %v4073_v44  ;;  %v4087_v51 = vadd.f32 %v107_v35, %v106_v39  ;;  %v478_v52 = vsel %vm101_vm1, %v474_v28, 0.0  ;;  %v850_v53 = vmul.f32 %v4085_v50, %v4085_v50  ;;  %s4107_s7 = sld [smem:[#allocation3 + $0x2]] }
  0x63   :  { %3322 = vmatmul.mubr.msk.f32.vlgmr.msra.gmra.mxu1 %vm101_vm1, %v4044_v23  ;;  %3326 = vmatprep.subr.mxu0 %v3937_v0  ;;  %v289_v54 = vadd.f32 %v288_v41, %v287_v40  ;;  %v479_v55 = vsel %vm101_vm1, %v475_v32, 0.0  ;;  %v481_v56 = vsel %vm101_vm1, %v476_v31, 0.0  ;;  %v483_v59 = vsel %vm101_vm1, %v477_v46, 0.0  ;;  %s4138_s20 = sld [smem:[#allocation6 + $0x2]] }
  0x64   :  { %3335 = vmatprep.subr.mxu1 %v3937_v0  ;;  %3327 = vmatpush3.msra.mxu0 %v448_v26  ;;  %v480_v58 = vadd.f32 %v479_v55, %v478_v52  ;;  %v661_v60 = vsel %vm101_vm1, %v657_v38, 0.0  ;;  %v662_v61 = vsel %vm101_vm1, %v658_v33, 0.0  ;;  %v664_v1 = vsel %vm101_vm1, %v659_v42, 0.0  ;;  %s623_s17 = scalar_lea.vmem %s5905_s6, %s4054_s5  ;;  %s4191_s25 = sld [smem:[#allocation4 + $0x4]] }
  0x65   :  { %3336 = vmatpush3.msra.mxu1 %v632_v36  ;;  %3328 = vmatprep.subr.mxu0 %v3937_v0  ;;  %s3170_s14 = sshll.u32 %s4062_s9, 5  ;;  %v4109_v62 = vadd.f32 %v290_v45, %v289_v54  ;;  %v663_v63 = vadd.f32 %v662_v61, %v661_v60  ;;  %v853_v2 = vmul.f32 %v825_v57, %v825_v57  ;;  %v666_v5 = vsel %vm101_vm1, %v660_v47, 0.0  ;;  %v4146_v17 = vld [vmem:[%s623_s17] sm:$0x1]  ;;  %s4197_s26 = sld [smem:[#allocation3 + $0x3]] }
  0x66   :  { %3337 = vmatprep.subr.mxu1 %v3937_v0  ;;  %3329 = vmatpush3.msra.mxu0 %v447_v27  ;;  %v482_v4 = vadd.f32 %v481_v56, %v480_v58  ;;  %v854_v6 = vsel %vm101_vm1, %v850_v53, 0.0  ;;  %v855_v7 = vsel %vm101_vm1, %v851_v49, 0.0  ;;  %s1004_s18 = scalar_lea.vmem [#allocation9], %s3170_s14  ;;  %s3175_s19 = sshll.u32 %s4075_s11, 5  ;;  %v857_v16 = vsel %vm101_vm1, %v852_v48, 0.0 }
  0x67   :  { %3338 = vmatpush3.msra.mxu1 %v631_v37  ;;  %3330 = vmatprep.subr.mxu0 %v3937_v0  ;;  %v4124_v8 = vld [vmem:[%s1004_s18 + $0x10] sm:$0xff]  ;;  %v4126_v9 = vld [vmem:[%s1004_s18 + $0x8] sm:$0xff]  ;;  %v665_v10 = vadd.f32 %v664_v1, %v663_v63  ;;  %v856_v11 = vadd.f32 %v855_v7, %v854_v6  ;;  %v4136_v14 = vld [vmem:[%s1004_s18] sm:$0xff]  ;;  %s3180_s21 = sshll.u32 %s4097_s1, 5  ;;  %s1197_s2 = scalar_lea.vmem [#allocation9], %s3175_s19 }
  0x68   :  { %3339 = vmatprep.subr.mxu1 %v3937_v0  ;;  %3331 = vmatpush3.msra.mxu0 %v4046_v24  ;;  %v1035_v12 = vmul.f32 %v4124_v8, %v4124_v8  ;;  %v1034_v13 = vmul.f32 %v4126_v9, %v4126_v9  ;;  %v4140_v15 = vadd.f32 %v483_v59, %v482_v4  ;;  %v1008_v19 = vld [vmem:[%s1004_s18 + $0x18] sm:$0xff]  ;;  %v859_v24 = vsel %vm101_vm1, %v853_v2, 0.0  ;;  %v4156_v25 = vld [vmem:[%s1197_s2 + $0x8] sm:$0xff]  ;;  %v4158_v26 = vld [vmem:[%s1197_s2] sm:$0xff]  ;;  %s1380_s3 = scalar_lea.vmem [#allocation9], %s3180_s21  ;;  %s816_s24 = scalar_lea.vmem %s5905_s6, %s4107_s7 }
  0x69   :  { %3332 = vmatprep.mubr.msk.f32.mxu0 %vm3938_vm0, %v3937_v0  ;;  %3340 = vmatpush3.msra.mxu1 %v4052_v29  ;;  %v1033_v20 = vmul.f32 %v4136_v14, %v4136_v14  ;;  %v4151_v21 = vadd.f32 %v666_v5, %v665_v10  ;;  %v858_v22 = vadd.f32 %v857_v16, %v856_v11  ;;  %v4162_v28 = vld [vmem:[%s1197_s2 + $0x10] sm:$0xff]  ;;  %v1201_v33 = vld [vmem:[%s1197_s2 + $0x18] sm:$0xff]  ;;  %v4176_v35 = vld [vmem:[%s1380_s3 + $0x8] sm:$0xff]  ;;  %s999_s29 = scalar_lea.vmem %s5905_s6, %s4138_s20  ;;  %s4213_s4 = sld [smem:[#allocation7 + $0x4]] }
  0x6a   :  { %3333 = vmatmul.mubr.msk.f32.vlgmr.msra.gmra.mxu0 %vm101_vm1, %v4113_v3  ;;  %3341 = vmatprep.subr.mxu1 %v3937_v0  ;;  %v1036_v27 = vmul.f32 %v1008_v19, %v1008_v19  ;;  %v1227_v29 = vmul.f32 %v4156_v25, %v4156_v25  ;;  %v1226_v30 = vmul.f32 %v4158_v26, %v4158_v26  ;;  %v1038_v32 = vsel %vm101_vm1, %v1034_v13, 0.0  ;;  %v4178_v36 = vld [vmem:[%s1380_s3] sm:$0xff]  ;;  %v1383_v38 = vld [vmem:[%s1380_s3 + $0x10] sm:$0xff]  ;;  %v1384_v46 = vld [vmem:[%s1380_s3 + $0x18] sm:$0xff]  ;;  %s4221_s5 = sld [smem:[#allocation6 + $0x3]]  ;;  %s3185_s30 = sshll.u32 %s4191_s25, 5 }
  0x6b   :  { %3346 = vmatprep.subr.mxu0 %v3937_v0  ;;  %3342 = vmatpush3.msra.mxu1 %v4059_v34  ;;  %v4168_v31 = vadd.f32 %v859_v24, %v858_v22  ;;  %v1228_v34 = vmul.f32 %v4162_v28, %v4162_v28  ;;  %v1040_v37 = vsel %vm101_vm1, %v1035_v12, 0.0  ;;  %v1410_v39 = vmul.f32 %v4176_v35, %v4176_v35  ;;  %v4204_v52 = vld [vmem:[%s816_s24] sm:$0x1]  ;;  %s1192_s11 = scalar_lea.vmem %s5905_s6, %s4197_s26  ;;  %s4251_s12 = sld [smem:[#allocation4 + $0x5]] }
  0x6c   :  { %3343 = vmatprep.mubr.msk.f32.mxu1 %vm3938_vm0, %v3937_v0  ;;  %3347 = vmatpush3.msra.mxu0 %v825_v57  ;;  %v1409_v40 = vmul.f32 %v4178_v36, %v4178_v36  ;;  %v1037_v41 = vsel %vm101_vm1, %v1033_v20, 0.0  ;;  %v1229_v42 = vmul.f32 %v1201_v33, %v1201_v33  ;;  %v1042_v47 = vsel %vm101_vm1, %v1036_v27, 0.0  ;;  %v4229_v63 = vld [vmem:[%s999_s29] sm:$0x1]  ;;  %s4256_s0 = sld [smem:[#allocation3 + $0x4]]  ;;  %s1573_s16 = scalar_lea.vmem [#allocation9], %s3185_s30 }
  0x6d   :  { %3344 = vmatmul.mubr.msk.f32.vlgmr.msra.gmra.mxu1 %vm101_vm1, %v4146_v17  ;;  %3348 = vmatprep.subr.mxu0 %v3937_v0  ;;  %v1039_v45 = vadd.f32 %v1038_v32, %v1037_v41  ;;  %v1230_v48 = vsel %vm101_vm1, %v1226_v30, 0.0  ;;  %v1231_v49 = vsel %vm101_vm1, %v1227_v29, 0.0  ;;  %v1233_v54 = vsel %vm101_vm1, %v1228_v34, 0.0  ;;  %v4259_v6 = vld [vmem:[%s1192_s11] sm:$0x1]  ;;  %s4267_s15 = sld [smem:[#allocation7 + $0x5]] }
  0x6e   :  { %3357 = vmatprep.subr.mxu1 %v3937_v0  ;;  %3349 = vmatpush3.msra.mxu0 %v4071_v43  ;;  %v1411_v43 = vmul.f32 %v1383_v38, %v1383_v38  ;;  %v1232_v53 = vadd.f32 %v1231_v49, %v1230_v48  ;;  %v1412_v55 = vmul.f32 %v1384_v46, %v1384_v46  ;;  %v1235_v56 = vsel %vm101_vm1, %v1229_v42, 0.0  ;;  %v4272_v7 = vld [vmem:[%s1573_s16 + $0x18] sm:$0xff]  ;;  %s4274_s17 = sld [smem:[#allocation6 + $0x4]]  ;;  %v4293_v11 = vld [vmem:[%s1573_s16 + $0x8] sm:$0xff]  ;;  %v4308_v13 = vld [vmem:[%s1573_s16] sm:$0xff] }
  0x6f   :  { %3358 = vmatpush3.msra.mxu1 %v1008_v19  ;;  %3350 = vmatprep.subr.mxu0 %v3937_v0  ;;  %v1413_v57 = vsel %vm101_vm1, %v1409_v40, 0.0  ;;  %v1414_v58 = vsel %vm101_vm1, %v1410_v39, 0.0  ;;  %s3190_s13 = sshll.u32 %s4213_s4, 5  ;;  %s4304_s3 = sld [smem:[#allocation4 + $0x6]]  ;;  %v257_v49 = vmul.f32 %v4044_v23, %v4044_v23 }
  0x70   :  { %3359 = vmatprep.subr.mxu1 %v3937_v0  ;;  %3351 = vmatpush3.msra.mxu0 %v4073_v44  ;;  %v1041_v44 = vadd.f32 %v1040_v37, %v1039_v45  ;;  %v1234_v60 = vadd.f32 %v1233_v54, %v1232_v53  ;;  %v1416_v61 = vsel %vm101_vm1, %v1411_v43, 0.0  ;;  %v1418_v2 = vsel %vm101_vm1, %v1412_v55, 0.0  ;;  %s1375_s7 = scalar_lea.vmem %s5905_s6, %s4221_s5  ;;  %s1756_s18 = scalar_lea.vmem [#allocation9], %s3190_s13 }
  0x71   :  { %3360 = vmatpush3.msra.mxu1 %v4124_v8  ;;  %3352 = vmatprep.subr.mxu0 %v3937_v0  ;;  %v4279_v8 = vld [vmem:[%s1375_s7] sm:$0x1]  ;;  %v4288_v10 = vld [vmem:[%s1756_s18 + $0x18] sm:$0xff]  ;;  %s3195_s19 = sshll.u32 %s4251_s12, 5  ;;  %v4298_v12 = vld [vmem:[%s1756_s18 + $0x10] sm:$0xff]  ;;  %s4310_s22 = sld [smem:[#allocation3 + $0x5]]  ;;  %v72_v43 = vmul.f32 %v4039_v18, %v4039_v18 }
  0x72   :  { %3361 = vmatprep.subr.mxu1 %v3937_v0  ;;  %3353 = vmatpush3.msra.mxu0 %v4085_v50  ;;  %v4223_v59 = vadd.f32 %v1042_v47, %v1041_v44  ;;  %v1415_v50 = vadd.f32 %v1414_v58, %v1413_v57  ;;  %v4233_v1 = vadd.f32 %v1235_v56, %v1234_v60  ;;  %s1568_s2 = scalar_lea.vmem %s5905_s6, %s4256_s0  ;;  %v4327_v19 = vld [vmem:[%s1756_s18] sm:$0xff]  ;;  %s4329_s27 = sld [smem:[#allocation7 + $0x6]]  ;;  %v258_v57 = vsel %vm73_vm2, %v257_v49, 0.0 }
  0x73   :  { %3354 = vmatprep.mubr.msk.f32.mxu0 %vm3938_vm0, %v3937_v0  ;;  %3362 = vmatpush3.msra.mxu1 %v4126_v9  ;;  %v4283_v9 = vld [vmem:[%s1573_s16 + $0x10] sm:$0xff]  ;;  %s3200_s23 = sshll.u32 %s4267_s15, 5  ;;  %v4319_v16 = vld [vmem:[%s1568_s2] sm:$0x1]  ;;  %s1949_s28 = scalar_lea.vmem [#allocation9], %s3195_s19  ;;  %v74_v48 = vsel %vm73_vm2, %v72_v43, 0.0 }
  0x74   :  { %3355 = vmatmul.mubr.msk.f32.vlgmr.msra.gmra.mxu0 %vm101_vm1, %v4204_v52  ;;  %3363 = vmatprep.subr.mxu1 %v3937_v0  ;;  %v1417_v4 = vadd.f32 %v1416_v61, %v1415_v50  ;;  %s1751_s26 = scalar_lea.vmem %s5905_s6, %s4274_s17  ;;  %v4334_v20 = vld [vmem:[%s1949_s28 + $0x18] sm:$0xff]  ;;  %s4336_s29 = sld [smem:[#allocation6 + $0x5]]  ;;  %v4345_v24 = vld [vmem:[%s1949_s28 + $0x10] sm:$0xff] }
  0x75   :  { %3368 = vmatprep.subr.mxu0 %v3937_v0  ;;  %3364 = vmatpush3.msra.mxu1 %v4136_v14  ;;  %v4314_v14 = vld [vmem:[%s1756_s18 + $0x8] sm:$0xff]  ;;  %v4341_v22 = vld [vmem:[%s1751_s26] sm:$0x1]  ;;  %s2132_s4 = scalar_lea.vmem [#allocation9], %s3200_s23  ;;  %s3205_s5 = sshll.u32 %s4304_s3, 5 }
  0x76   :  { %3365 = vmatprep.mubr.msk.f32.mxu1 %vm3938_vm0, %v3937_v0  ;;  %3369 = vmatpush3.msra.mxu0 %v1201_v33  ;;  %v4248_v5 = vadd.f32 %v1418_v2, %v1417_v4  ;;  %v4360_v27 = vld [vmem:[%s2132_s4 + $0x10] sm:$0xff]  ;;  %s4370_s11 = sld [smem:[#allocation4 + $0x7]]  ;;  %v4374_v29 = vld [vmem:[%s2132_s4 + $0x8] sm:$0xff]  ;;  %v4389_v32 = vld [vmem:[%s2132_s4] sm:$0xff]  ;;  %s2325_s15 = scalar_lea.vmem [#allocation9], %s3205_s5  ;;  %v450_v4 = vmul.f32 %v4113_v3, %v4113_v3 }
  0x77   :  { %3366 = vmatmul.mubr.msk.f32.vlgmr.msra.gmra.mxu1 %vm101_vm1, %v4229_v63  ;;  %3370 = vmatprep.subr.mxu0 %v3937_v0  ;;  %s1944_s10 = scalar_lea.vmem %s5905_s6, %s4310_s22  ;;  %s4377_s13 = sld [smem:[#allocation3 + $0x6]]  ;;  %v4396_v33 = vld [vmem:[%s2325_s15 + $0x18] sm:$0xff]  ;;  %v4421_v37 = vld [vmem:[%s2325_s15 + $0x8] sm:$0xff]  ;;  %v4434_v39 = vld [vmem:[%s2325_s15] sm:$0xff] }
  0x78   :  { %3379 = vmatprep.subr.mxu1 %v3937_v0  ;;  %3371 = vmatpush3.msra.mxu0 %v4162_v28  ;;  %v4368_v28 = vld [vmem:[%s1949_s28] sm:$0xff]  ;;  %s3210_s12 = sshll.u32 %s4329_s27, 5  ;;  %s4391_s7 = sld [smem:[#allocation6 + $0x6]]  ;;  %v451_v3 = vsel %vm73_vm2, %v450_v4, 0.0 }
  0x79   :  { %3380 = vmatpush3.msra.mxu1 %v1384_v46  ;;  %3372 = vmatprep.subr.mxu0 %v3937_v0  ;;  %v4381_v30 = vld [vmem:[%s1944_s10] sm:$0x1]  ;;  %s4398_s16 = sld [smem:[#allocation7 + $0x7]]  ;;  %s2508_s18 = scalar_lea.vmem [#allocation9], %s3210_s12 }
  0x7a   :  { %3381 = vmatprep.subr.mxu1 %v3937_v0  ;;  %3373 = vmatpush3.msra.mxu0 %v4156_v25  ;;  %v4350_v25 = vld [vmem:[%s2132_s4 + $0x18] sm:$0xff]  ;;  %s2127_s14 = scalar_lea.vmem %s5905_s6, %s4336_s29  ;;  %s4405_s17 = sld [smem:[#allocation5]]  ;;  %v4440_v40 = vld [vmem:[%s2508_s18 + $0x8] sm:$0xff]  ;;  %v4452_v42 = vld [vmem:[%s2508_s18] sm:$0xff] }
  0x7b   :  { %3382 = vmatpush3.msra.mxu1 %v1383_v38  ;;  %3374 = vmatprep.subr.mxu0 %v3937_v0  ;;  %v4403_v34 = vld [vmem:[%s2127_s14] sm:$0x1]  ;;  %s4416_s19 = sld [smem:[#allocation8]]  ;;  %v4426_v38 = vld [vmem:[%s2508_s18 + $0x10] sm:$0xff] }
  0x7c   :  { %3383 = vmatprep.subr.mxu1 %v3937_v0  ;;  %3375 = vmatpush3.msra.mxu0 %v4158_v26  ;;  %v4356_v26 = vld [vmem:[%s1949_s28 + $0x8] sm:$0xff]  ;;  %s3215_s20 = sshll.u32 %s4370_s11, 5  ;;  %s4436_s22 = sld [smem:[#allocation3 + $0x7]] }
  0x7d   :  { %3376 = vmatprep.mubr.msk.f32.mxu0 %vm3938_vm0, %v3937_v0  ;;  %3384 = vmatpush3.msra.mxu1 %v4176_v35  ;;  %v4409_v35 = vld [vmem:[%s2325_s15 + $0x10] sm:$0xff]  ;;  %s2320_s3 = scalar_lea.vmem %s5905_s6, %s4377_s13  ;;  %s2701_s4 = scalar_lea.vmem [#allocation9], %s3215_s20 }
  0x7e   :  { %3377 = vmatmul.mubr.msk.f32.vlgmr.msra.gmra.mxu0 %vm101_vm1, %v4259_v6  ;;  %3385 = vmatprep.subr.mxu1 %v3937_v0  ;;  %v4444_v41 = vld [vmem:[%s2320_s3] sm:$0x1]  ;;  %s2503_s25 = scalar_lea.vmem %s5905_s6, %s4391_s7  ;;  %v4464_v45 = vld [vmem:[%s2701_s4 + $0x18] sm:$0xff]  ;;  %v4477_v46 = vld [vmem:[%s2701_s4 + $0x10] sm:$0xff]  ;;  %s4479_s10 = sld [smem:[#allocation6 + $0x7]] }
  0x7f   :  { %3390 = vmatprep.subr.mxu0 %v3937_v0  ;;  %3386 = vmatpush3.msra.mxu1 %v4178_v36  ;;  %v4414_v36 = vld [vmem:[%s2508_s18 + $0x18] sm:$0xff]  ;;  %s3220_s26 = sshll.u32 %s4398_s16, 5  ;;  %v4469_v18 = vld [vmem:[%s2503_s25] sm:$0x1]  ;;  %v4492_v44 = vld [vmem:[%s2701_s4 + $0x8] sm:$0xff]  ;;  %s4507_s1 = sld [smem:[#allocation5 + $0x1]] }
  0x80   :  { %3387 = vmatprep.mubr.msk.f32.mxu1 %vm3938_vm0, %v3937_v0  ;;  %3391 = vmatpush3.msra.mxu0 %v4272_v7  ;;  %s64_s29 = scalar_lea.vmem %s5905_s6, %s4405_s17  ;;  %s2884_s0 = scalar_lea.vmem [#allocation9], %s3220_s26  ;;  %v4510_v55 = vld [vmem:[%s2701_s4] sm:$0xff] }
  0x81   :  { %3388 = vmatmul.mubr.msk.f32.vlgmr.msra.gmra.mxu1 %vm101_vm1, %v4279_v8  ;;  %3392 = vmatprep.subr.mxu0 %v3937_v0  ;;  %s249_s9 = scalar_lea.vmem %s5905_s6, %s4416_s19  ;;  %v4481_v47 = vld [vmem:[%s64_s29] sm:$0x1]  ;;  %v4503_v23 = vld [vmem:[%s2884_s0 + $0x18] sm:$0xff]  ;;  %v4521_v60 = vld [vmem:[%s2884_s0 + $0x10] sm:$0xff]  ;;  %s3159_s19 = sld [smem:[#allocation8 + $0x1]] }
  0x82   :  { %3401 = vmatprep.subr.mxu1 %v3937_v0  ;;  %3393 = vmatpush3.msra.mxu0 %v4283_v9  ;;  %s2696_s13 = scalar_lea.vmem %s5905_s6, %s4436_s22  ;;  %v4498_v53 = vld [vmem:[%s249_s9] sm:$0x1]  ;;  %v132_v54 = vmul.f32 %v4481_v47, %v4481_v47  ;;  %v4528_v61 = vld [vmem:[%s2884_s0 + $0x8] sm:$0xff]  ;;  %s3164_s3 = sld [smem:[#allocation5 + $0x2]] }
  0x83   :  { %3402 = vmatpush3.msra.mxu1 %v4288_v10  ;;  %3394 = vmatprep.subr.mxu0 %v3937_v0  ;;  %v4513_v56 = vld [vmem:[%s2696_s13] sm:$0x1]  ;;  %v315_v58 = vmul.f32 %v4498_v53, %v4498_v53  ;;  %s4590_s25 = sld [smem:[#allocation8 + $0x2]] }
  0x84   :  { %3403 = vmatprep.subr.mxu1 %v3937_v0  ;;  %3395 = vmatpush3.msra.mxu0 %v4293_v11  ;;  %v133_v50 = vsel %vm73_vm2, %v132_v54, 0.0  ;;  %s2879_s15 = scalar_lea.vmem %s5905_s6, %s4479_s10  ;;  %v4541_v43 = vld [vmem:[%s2884_s0] sm:$0xff]  ;;  %s4629_s29 = sld [smem:[#allocation5 + $0x3]] }
  0x85   :  { %3404 = vmatpush3.msra.mxu1 %v4298_v12  ;;  %3396 = vmatprep.subr.mxu0 %v3937_v0  ;;  %v316_v2 = vsel %vm73_vm2, %v315_v58, 0.0  ;;  %s442_s18 = scalar_lea.vmem %s5905_s6, %s4507_s1  ;;  %v1603_v58 = vmul.f32 %v4293_v11, %v4293_v11  ;;  %s4668_s9 = sld [smem:[#allocation8 + $0x3]] }
  0x86   :  { %3405 = vmatprep.subr.mxu1 %v3937_v0  ;;  %3397 = vmatpush3.msra.mxu0 %v4308_v13  ;;  %v4556_v49 = vld [vmem:[%s442_s18] sm:$0x1]  ;;  %s3184_s13 = sld [smem:[#allocation5 + $0x4]] }
  0x87   :  { %3398 = vmatprep.mubr.msk.f32.mxu0 %vm3938_vm0, %v3937_v0  ;;  %3406 = vmatpush3.msra.mxu1 %v4314_v14  ;;  %v508_v54 = vmul.f32 %v4556_v49, %v4556_v49  ;;  %s625_s2 = scalar_lea.vmem %s5905_s6, %s3159_s19  ;;  %s3189_s7 = sld [smem:[#allocation8 + $0x4]] }
  0x88   :  { %3399 = vmatmul.mubr.msk.f32.vlgmr.msra.gmra.mxu0 %vm101_vm1, %v4319_v16  ;;  %3407 = vmatprep.subr.mxu1 %v3937_v0  ;;  %s818_s24 = scalar_lea.vmem %s5905_s6, %s3164_s3  ;;  %s3194_s18 = sld [smem:[#allocation5 + $0x5]] }
  0x89   :  { %3412 = vmatprep.subr.mxu0 %v3937_v0  ;;  %3408 = vmatpush3.msra.mxu1 %v4327_v19  ;;  %s1001_s28 = scalar_lea.vmem %s5905_s6, %s4590_s25 }
  0x8a   :  { %3409 = vmatprep.mubr.msk.f32.mxu1 %vm3938_vm0, %v3937_v0  ;;  %3413 = vmatpush3.msra.mxu0 %v4334_v20  ;;  %s1194_s30 = scalar_lea.vmem %s5905_s6, %s4629_s29 }
  0x8b   :  { %3410 = vmatmul.mubr.msk.f32.vlgmr.msra.gmra.mxu1 %vm101_vm1, %v4341_v22  ;;  %3414 = vmatprep.subr.mxu0 %v3937_v0  ;;  %s1377_s12 = scalar_lea.vmem %s5905_s6, %s4668_s9 }
  0x8c   :  { %3423 = vmatprep.subr.mxu1 %v3937_v0  ;;  %3415 = vmatpush3.msra.mxu0 %v4345_v24  ;;  %s1570_s14 = scalar_lea.vmem %s5905_s6, %s3184_s13 }
  0x8d   :  { %3424 = vmatpush3.msra.mxu1 %v4350_v25  ;;  %3416 = vmatprep.subr.mxu0 %v3937_v0  ;;  %s1753_s17 = scalar_lea.vmem %s5905_s6, %s3189_s7 }
  0x8e   :  { %3425 = vmatprep.subr.mxu1 %v3937_v0  ;;  %3417 = vmatpush3.msra.mxu0 %v4356_v26  ;;  %s1946_s21 = scalar_lea.vmem %s5905_s6, %s3194_s18 }
  0x8f   :  { %3426 = vmatpush3.msra.mxu1 %v4360_v27  ;;  %3418 = vmatprep.subr.mxu0 %v3937_v0 }
  0x90   :  { %3427 = vmatprep.subr.mxu1 %v3937_v0  ;;  %3419 = vmatpush3.msra.mxu0 %v4368_v28 }
  0x91   :  { %3420 = vmatprep.mubr.msk.f32.mxu0 %vm3938_vm0, %v3937_v0  ;;  %3428 = vmatpush3.msra.mxu1 %v4374_v29 }
  0x92   :  { %3421 = vmatmul.mubr.msk.f32.vlgmr.msra.gmra.mxu0 %vm101_vm1, %v4381_v30  ;;  %3429 = vmatprep.subr.mxu1 %v3937_v0 }
  0x93   :  { %3434 = vmatprep.subr.mxu0 %v3937_v0  ;;  %3430 = vmatpush3.msra.mxu1 %v4389_v32 }
  0x94   :  { %3431 = vmatprep.mubr.msk.f32.mxu1 %vm3938_vm0, %v3937_v0  ;;  %3435 = vmatpush3.msra.mxu0 %v4396_v33 }
  0x95   :  { %3432 = vmatmul.mubr.msk.f32.vlgmr.msra.gmra.mxu1 %vm101_vm1, %v4403_v34  ;;  %3436 = vmatprep.subr.mxu0 %v3937_v0 }
  0x96   :  { %3445 = vmatprep.subr.mxu1 %v3937_v0  ;;  %3437 = vmatpush3.msra.mxu0 %v4409_v35 }
  0x97   :  { %3446 = vmatpush3.msra.mxu1 %v4414_v36  ;;  %3438 = vmatprep.subr.mxu0 %v3937_v0 }
  0x98   :  { %3447 = vmatprep.subr.mxu1 %v3937_v0  ;;  %3439 = vmatpush3.msra.mxu0 %v4421_v37 }
  0x99   :  { %3448 = vmatpush3.msra.mxu1 %v4426_v38  ;;  %3440 = vmatprep.subr.mxu0 %v3937_v0 }
  0x9a   :  { %3449 = vmatprep.subr.mxu1 %v3937_v0  ;;  %3441 = vmatpush3.msra.mxu0 %v4434_v39 }
  0x9b   :  { %3442 = vmatprep.mubr.msk.f32.mxu0 %vm3938_vm0, %v3937_v0  ;;  %3450 = vmatpush3.msra.mxu1 %v4440_v40 }
  0x9c   :  { %3443 = vmatmul.mubr.msk.f32.vlgmr.msra.gmra.mxu0 %vm101_vm1, %v4444_v41  ;;  %3451 = vmatprep.subr.mxu1 %v3937_v0 }
  0x9d   :  { %3456 = vmatprep.subr.mxu0 %v3937_v0  ;;  %3452 = vmatpush3.msra.mxu1 %v4452_v42 }
  0x9e   :  { %3453 = vmatprep.mubr.msk.f32.mxu1 %vm3938_vm0, %v3937_v0  ;;  %3457 = vmatpush3.msra.mxu0 %v4464_v45 }
  0x9f   :  { %3454 = vmatmul.mubr.msk.f32.vlgmr.msra.gmra.mxu1 %vm101_vm1, %v4469_v18  ;;  %3458 = vmatprep.subr.mxu0 %v3937_v0 }
  0xa0   :  { %3459 = vmatpush3.msra.mxu0 %v4477_v46  ;;  %3464 = vmatprep.mubr.msk.f32.mxu0 %vm3938_vm0, %v3937_v0 }
  0xa1   :  { %3460 = vmatprep.subr.mxu0 %v3937_v0  ;;  %75 = vadd.xlane.f32.xlu0 %v74_v48  ;;  %v4544_v48 = vld [vmem:[%s2879_s15] sm:$0x1] }
  0xa2   :  { %3461 = vmatpush3.msra.mxu0 %v4492_v44  ;;  %3467 = vmatprep.subr.mxu1 %v3937_v0 }
  0xa3   :  { %3462 = vmatprep.subr.mxu0 %v3937_v0  ;;  %3468 = vmatpush3.msra.mxu1 %v4503_v23 }
  0xa4   :  { %3463 = vmatpush3.msra.mxu0 %v4510_v55  ;;  %3469 = vmatprep.subr.mxu1 %v3937_v0 }
  0xa5   :  { %3465 = vmatmul.mubr.msk.f32.vlgmr.msra.gmra.mxu0 %vm101_vm1, %v4513_v56  ;;  %259 = vadd.xlane.f32.xlu0 %v258_v57  ;;  %v4569_v57 = vld [vmem:[%s625_s2] sm:$0x1]  ;;  %s3199_s2 = sld [smem:[#allocation8 + $0x5]] }
  0xa6   :  { %3470 = vmatpush3.msra.mxu1 %v4521_v60  ;;  %3475 = vmatprep.mubr.msk.f32.mxu1 %vm3938_vm0, %v3937_v0 }
  0xa7   :  { %3471 = vmatprep.subr.mxu1 %v3937_v0  ;;  %134 = vadd.xlane.f32.xlu1 %v133_v50 }
  0xa8   :  { %3472 = vmatpush3.msra.mxu1 %v4528_v61 }
  0xa9   :  { %317 = vadd.xlane.f32.xlu0 %v316_v2  ;;  %3473 = vmatprep.subr.mxu1 %v3937_v0  ;;  %v509_v0 = vsel %vm73_vm2, %v508_v54, 0.0  ;;  %v1604_v2 = vmul.f32 %v4283_v9, %v4283_v9  ;;  %v4601_v54 = vld [vmem:[%s818_s24] sm:$0x1]  ;;  %s3204_s24 = sld [smem:[#allocation5 + $0x6]] }
  0xaa   :  { %3474 = vmatpush3.msra.mxu1 %v4541_v43 }
  0xab   :  { %3476 = vmatmul.mubr.msk.f32.vlgmr.msra.gmra.mxu1 %vm101_vm1, %v4544_v48  ;;  %292 = vadd.xlane.f32.xlu1 %v4109_v62  ;;  %v633_v62 = vmul.f32 %v4146_v17, %v4146_v17  ;;  %v1786_v17 = vmul.f32 %v4314_v14, %v4314_v14  ;;  %v1787_v14 = vmul.f32 %v4298_v12, %v4298_v12  ;;  %s2129_s23 = scalar_lea.vmem %s5905_s6, %s3199_s2 }
  0xad   :  { %452 = vadd.xlane.f32.xlu0 %v451_v3  ;;  %v634_v50 = vsel %vm73_vm2, %v633_v62, 0.0  ;;  %v1609_v3 = vsel %vm101_vm1, %v1604_v2, 0.0  ;;  %v1978_v62 = vmul.f32 %v4368_v28, %v4368_v28  ;;  %v1790_v12 = vsel %vm101_vm1, %v1786_v17, 0.0 }
  0xae   :  { %v2162_v28 = vmul.f32 %v4374_v29, %v4374_v29  ;;  %v1792_v2 = vsel %vm101_vm1, %v1787_v14, 0.0  ;;  %v2355_v29 = vmul.f32 %v4421_v37, %v4421_v37 }
  0xaf   :  { %485 = vadd.xlane.f32.xlu1 %v4140_v15  ;;  %v1602_v15 = vmul.f32 %v4308_v13, %v4308_v13  ;;  %v1607_v13 = vsel %vm101_vm1, %v1603_v58, 0.0  ;;  %v884_v58 = vmul.f32 %v4601_v54, %v4601_v54  ;;  %v1982_v17 = vsel %vm101_vm1, %v1978_v62, 0.0  ;;  %s2322_s27 = scalar_lea.vmem %s5905_s6, %s3204_s24 }
  0xb1   :  { %109 = vadd.xlane.f32.xlu0 %v4087_v51  ;;  %v691_v51 = vmul.f32 %v4569_v57, %v4569_v57  ;;  %v1606_v11 = vsel %vm101_vm1, %v1602_v15, 0.0 }
  0xb2   :  { %v1608_v4 = vadd.f32 %v1607_v13, %v1606_v11  ;;  %v1981_v11 = vmul.f32 %v4334_v20, %v4334_v20  ;;  %v2354_v13 = vmul.f32 %v4434_v39, %v4434_v39  ;;  %v2164_v20 = vmul.f32 %v4350_v25, %v4350_v25 }
  0xb3   :  { %668 = vadd.xlane.f32.xlu1 %v4151_v21  ;;  %v1785_v21 = vmul.f32 %v4327_v19, %v4327_v19  ;;  %v692_v9 = vsel %vm73_vm2, %v691_v51, 0.0  ;;  %v1605_v19 = vmul.f32 %v4272_v7, %v4272_v7  ;;  %v2537_v25 = vmul.f32 %v4452_v42, %v4452_v42 }
  0xb4   :  { %v1610_v15 = vadd.f32 %v1609_v3, %v1608_v4  ;;  %v2166_v4 = vsel %vm101_vm1, %v2162_v28, 0.0  ;;  %v1987_v3 = vsel %vm101_vm1, %v1981_v11, 0.0  ;;  %v2170_v42 = vsel %vm101_vm1, %v2164_v20, 0.0 }
  0xb5   :  { %510 = vadd.xlane.f32.xlu0 %v509_v0  ;;  %v1979_v0 = vmul.f32 %v4356_v26, %v4356_v26  ;;  %v1788_v26 = vmul.f32 %v4288_v10, %v4288_v10  ;;  %v2163_v10 = vmul.f32 %v4360_v27, %v4360_v27 }
  0xb7   :  { %861 = vadd.xlane.f32.xlu1 %v4168_v31  ;;  %v826_v31 = vmul.f32 %v4204_v52, %v4204_v52  ;;  %v1789_v52 = vsel %vm101_vm1, %v1785_v21, 0.0  ;;  %v1983_v21 = vsel %vm101_vm1, %v1979_v0, 0.0  ;;  %v1794_v27 = vsel %vm101_vm1, %v1788_v26, 0.0 }
  0xb8   :  { %v1791_v51 = vadd.f32 %v1790_v12, %v1789_v52  ;;  %v1984_v14 = vadd.f32 %v1983_v21, %v1982_v17  ;;  %v1202_v26 = vmul.f32 %v4259_v6, %v4259_v6  ;;  %v4680_v17 = vld [vmem:[%s1194_s30] sm:$0x1]  ;;  %v2730_v6 = vmul.f32 %v4510_v55, %v4510_v55  ;;  %s3214_s30 = sld [smem:[#allocation5 + $0x7]] }
  0xb9   :  { %635 = vadd.xlane.f32.xlu0 %v634_v50  ;;  %v827_v7 = vsel %vm73_vm2, %v826_v31, 0.0  ;;  %v1611_v50 = vsel %vm101_vm1, %v1605_v19, 0.0  ;;  %v2541_v21 = vsel %vm101_vm1, %v2537_v25, 0.0  ;;  %v2540_v55 = vmul.f32 %v4414_v36, %v4414_v36 }
  0xba   :  { %v1793_v31 = vadd.f32 %v1792_v2, %v1791_v51  ;;  %v1385_v36 = vmul.f32 %v4279_v8, %v4279_v8 }
  0xbb   :  { %1044 = vadd.xlane.f32.xlu1 %v4223_v59  ;;  %v1980_v59 = vmul.f32 %v4345_v24, %v4345_v24  ;;  %v2161_v24 = vmul.f32 %v4389_v32, %v4389_v32  ;;  %v885_v32 = vsel %vm73_vm2, %v884_v58, 0.0  ;;  %v2359_v58 = vsel %vm101_vm1, %v2355_v29, 0.0 }
  0xbc   :  { %v1795_v62 = vadd.f32 %v1794_v27, %v1793_v31  ;;  %v2734_v31 = vsel %vm101_vm1, %v2730_v6, 0.0  ;;  %v2546_v20 = vsel %vm101_vm1, %v2540_v55, 0.0  ;;  %v4754_v6 = vld [vmem:[%s1946_s21] sm:$0x1] }
  0xbd   :  { %693 = vadd.xlane.f32.xlu0 %v692_v9  ;;  %v1612_v9 = vadd.f32 %v1611_v50, %v1610_v15  ;;  %v1985_v19 = vsel %vm101_vm1, %v1980_v59, 0.0  ;;  %v2165_v37 = vsel %vm101_vm1, %v2161_v24, 0.0  ;;  %v2168_v59 = vsel %vm101_vm1, %v2163_v10, 0.0 }
  0xbe   :  { %v1986_v52 = vadd.f32 %v1985_v19, %v1984_v14  ;;  %v2167_v12 = vadd.f32 %v2166_v4, %v2165_v37  ;;  %v2357_v15 = vmul.f32 %v4396_v33, %v4396_v33  ;;  %v2731_v50 = vmul.f32 %v4492_v44, %v4492_v44  ;;  %v4705_v4 = vld [vmem:[%s1377_s12] sm:$0x1]  ;;  %s2698_s11 = scalar_lea.vmem %s5905_s6, %s3214_s30  ;;  %s3219_s12 = sld [smem:[#allocation8 + $0x7]] }
  0xbf   :  { %1237 = vadd.xlane.f32.xlu1 %v4233_v1  ;;  %v1009_v1 = vmul.f32 %v4229_v63, %v4229_v63  ;;  %v4643_v63 = vld [vmem:[%s1001_s28] sm:$0x1]  ;;  %v2732_v33 = vmul.f32 %v4477_v46, %v4477_v46  ;;  %v1203_v44 = vsel %vm73_vm2, %v1202_v26, 0.0  ;;  %v1260_v10 = vmul.f32 %v4680_v17, %v4680_v17  ;;  %s3209_s28 = sld [smem:[#allocation8 + $0x6]] }
  0xc0   :  { %v1067_v0 = vmul.f32 %v4643_v63, %v4643_v63  ;;  %v1988_v51 = vadd.f32 %v1987_v3, %v1986_v52  ;;  %v2169_v24 = vadd.f32 %v2168_v59, %v2167_v12  ;;  %v2735_v46 = vsel %vm101_vm1, %v2731_v50, 0.0 }
  0xc1   :  { %828 = vadd.xlane.f32.xlu0 %v827_v7  ;;  %v1010_v39 = vsel %vm73_vm2, %v1009_v1, 0.0  ;;  %v2538_v7 = vmul.f32 %v4440_v40, %v4440_v40  ;;  %v2539_v40 = vmul.f32 %v4426_v38, %v4426_v38  ;;  %v1261_v14 = vsel %vm73_vm2, %v1260_v10, 0.0 }
  0xc2   :  { %v1068_v28 = vsel %vm73_vm2, %v1067_v0, 0.0  ;;  %v2171_v29 = vadd.f32 %v2170_v42, %v2169_v24  ;;  %v2736_v37 = vadd.f32 %v2735_v46, %v2734_v31  ;;  %v1386_v3 = vsel %vm73_vm2, %v1385_v36, 0.0 }
  0xc3   :  { %1420 = vadd.xlane.f32.xlu1 %v4248_v5  ;;  %v2356_v5 = vmul.f32 %v4409_v35, %v4409_v35  ;;  %v2358_v35 = vsel %vm101_vm1, %v2354_v13, 0.0  ;;  %v2542_v1 = vsel %vm101_vm1, %v2538_v7, 0.0  ;;  %v2363_v13 = vsel %vm101_vm1, %v2357_v15, 0.0  ;;  %v4721_v7 = vld [vmem:[%s1570_s14] sm:$0x1] }
  0xc4   :  { %v2360_v2 = vadd.f32 %v2359_v58, %v2358_v35  ;;  %v2543_v11 = vadd.f32 %v2542_v1, %v2541_v21  ;;  %v1443_v0 = vmul.f32 %v4705_v4, %v4705_v4  ;;  %v1578_v12 = vmul.f32 %v4319_v16, %v4319_v16  ;;  %s2881_s1 = scalar_lea.vmem %s5905_s6, %s3219_s12 }
  0xc5   :  { %886 = vadd.xlane.f32.xlu0 %v885_v32  ;;  %v2361_v38 = vsel %vm101_vm1, %v2356_v5, 0.0  ;;  %v2733_v5 = vmul.f32 %v4464_v45, %v4464_v45  ;;  %v1636_v35 = vmul.f32 %v4721_v7, %v4721_v7  ;;  %v2914_v16 = vmul.f32 %v4528_v61, %v4528_v61  ;;  %s2505_s5 = scalar_lea.vmem %s5905_s6, %s3209_s28 }
  0xc6   :  { %v2362_v32 = vadd.f32 %v2361_v38, %v2360_v2  ;;  %v1444_v45 = vsel %vm73_vm2, %v1443_v0, 0.0  ;;  %v1579_v25 = vsel %vm73_vm2, %v1578_v12, 0.0  ;;  %v2913_v58 = vmul.f32 %v4541_v43, %v4541_v43 }
  0xc7   :  { %1613 = vadd.xlane.f32.xlu1 %v1612_v9  ;;  %v2544_v9 = vsel %vm101_vm1, %v2539_v40, 0.0  ;;  %v2739_v52 = vsel %vm101_vm1, %v2733_v5, 0.0  ;;  %v1637_v26 = vsel %vm73_vm2, %v1636_v35, 0.0  ;;  %v1761_v40 = vmul.f32 %v4341_v22, %v4341_v22  ;;  %v4809_v5 = vld [vmem:[%s2881_s1] sm:$0x1] }
  0xc8   :  { %v2364_v27 = vadd.f32 %v2363_v13, %v2362_v32  ;;  %v2545_v19 = vadd.f32 %v2544_v9, %v2543_v11  ;;  %v2915_v42 = vmul.f32 %v4521_v60, %v4521_v60  ;;  %v2917_v61 = vsel %vm101_vm1, %v2913_v58, 0.0 }
  0xc9   :  { %1011 = vadd.xlane.f32.xlu0 %v1010_v39  ;;  %v2737_v39 = vsel %vm101_vm1, %v2732_v33, 0.0  ;;  %v1762_v15 = vsel %vm73_vm2, %v1761_v40, 0.0  ;;  %v2918_v43 = vsel %vm101_vm1, %v2914_v16, 0.0  ;;  %v1954_v2 = vmul.f32 %v4381_v30, %v4381_v30  ;;  %v4765_v30 = vld [vmem:[%s2129_s23] sm:$0x1] }
  0xca   :  { %v2547_v8 = vadd.f32 %v2546_v20, %v2545_v19  ;;  %v2920_v22 = vsel %vm101_vm1, %v2915_v42, 0.0  ;;  %v2012_v21 = vmul.f32 %v4754_v6, %v4754_v6  ;;  %v2137_v33 = vmul.f32 %v4403_v34, %v4403_v34  ;;  %v4776_v34 = vld [vmem:[%s2322_s27] sm:$0x1] }
  0xcb   :  { %1796 = vadd.xlane.f32.xlu1 %v1795_v62  ;;  %v2738_v62 = vadd.f32 %v2737_v39, %v2736_v37  ;;  %v1955_v38 = vsel %vm73_vm2, %v1954_v2, 0.0  ;;  %v2195_v10 = vmul.f32 %v4765_v30, %v4765_v30  ;;  %v2330_v32 = vmul.f32 %v4444_v41, %v4444_v41  ;;  %v4787_v41 = vld [vmem:[%s2505_s5] sm:$0x1] }
  0xcc   :  { %v2013_v1 = vsel %vm73_vm2, %v2012_v21, 0.0  ;;  %v2388_v11 = vmul.f32 %v4776_v34, %v4776_v34  ;;  %v2513_v9 = vmul.f32 %v4469_v18, %v4469_v18  ;;  %v2571_v46 = vmul.f32 %v4787_v41, %v4787_v41  ;;  %v4798_v18 = vld [vmem:[%s2698_s11] sm:$0x1] }
  0xcd   :  { %1069 = vadd.xlane.f32.xlu0 %v1068_v28  ;;  %v2740_v59 = vadd.f32 %v2739_v52, %v2738_v62  ;;  %v4736_v28 = vld [vmem:[%s1753_s17] sm:$0x1]  ;;  %v2331_v55 = vsel %vm73_vm2, %v2330_v32, 0.0  ;;  %v2706_v36 = vmul.f32 %v4513_v56, %v4513_v56  ;;  %v2764_v19 = vmul.f32 %v4798_v18, %v4798_v18 }
  0xce   :  { %v1819_v50 = vmul.f32 %v4736_v28, %v4736_v28  ;;  %v2389_v13 = vsel %vm73_vm2, %v2388_v11, 0.0  ;;  %v2514_v31 = vsel %vm73_vm2, %v2513_v9, 0.0  ;;  %v2889_v20 = vmul.f32 %v4544_v48, %v4544_v48 }
  0xcf   :  { %1989 = vadd.xlane.f32.xlu1 %v1988_v51  ;;  %v2919_v51 = vadd.f32 %v2918_v43, %v2917_v61  ;;  %v2765_v37 = vsel %vm73_vm2, %v2764_v19, 0.0  ;;  %v2947_v39 = vmul.f32 %v4809_v5, %v4809_v5 }
  0xd0   :  { %v1820_v24 = vsel %vm73_vm2, %v1819_v50, 0.0  ;;  %v2890_v56 = vsel %vm73_vm2, %v2889_v20, 0.0 }
  0xd1   :  { %1204 = vadd.xlane.f32.xlu0 %v1203_v44  ;;  %v4749_v60 = vadd.f32 %v2920_v22, %v2919_v51  ;;  %v2138_v44 = vsel %vm73_vm2, %v2137_v33, 0.0 }
  0xd3   :  { %2172 = vadd.xlane.f32.xlu1 %v2171_v29  ;;  %v2196_v29 = vsel %vm73_vm2, %v2195_v10, 0.0 }
  0xd5   :  { %1262 = vadd.xlane.f32.xlu0 %v1261_v14  ;;  %v2572_v14 = vsel %vm73_vm2, %v2571_v46, 0.0 }
  0xd7   :  { %2365 = vadd.xlane.f32.xlu1 %v2364_v27  ;;  %v2707_v27 = vsel %vm73_vm2, %v2706_v36, 0.0 }
  0xd9   :  { %1387 = vadd.xlane.f32.xlu0 %v1386_v3  ;;  %v2948_v3 = vsel %vm73_vm2, %v2947_v39, 0.0 }
  0xdb   :  { %2548 = vadd.xlane.f32.xlu1 %v2547_v8 }
  0xdd   :  { %1445 = vadd.xlane.f32.xlu0 %v1444_v45 }
  0xdf   :  { %2741 = vadd.xlane.f32.xlu1 %v2740_v59 }
  0xe1   :  { %1580 = vadd.xlane.f32.xlu0 %v1579_v25 }
  0xe5   :  { %1638 = vadd.xlane.f32.xlu0 %v1637_v26 }
  0xe9   :  { %1763 = vadd.xlane.f32.xlu0 %v1762_v15 }
  0xed   :  { %1821 = vadd.xlane.f32.xlu0 %v1820_v24 }
  0xf1   :  { %1956 = vadd.xlane.f32.xlu0 %v1955_v38 }
  0xf5   :  { %2014 = vadd.xlane.f32.xlu0 %v2013_v1 }
  0xf9   :  { %2139 = vadd.xlane.f32.xlu0 %v2138_v44 }
  0xfd   :  { %2197 = vadd.xlane.f32.xlu0 %v2196_v29 }
 0x101   :  { %2332 = vadd.xlane.f32.xlu0 %v2331_v55 }
 0x105   :  { %2390 = vadd.xlane.f32.xlu0 %v2389_v13 }
 0x109   :  { %2515 = vadd.xlane.f32.xlu0 %v2514_v31 }
 0x10d   :  { %2573 = vadd.xlane.f32.xlu0 %v2572_v14 }
 0x111   :  { %2708 = vadd.xlane.f32.xlu0 %v2707_v27 }
 0x115   :  { %2766 = vadd.xlane.f32.xlu0 %v2765_v37 }
 0x119   :  { %2891 = vadd.xlane.f32.xlu0 %v2890_v56 }
 0x11d   :  { %2949 = vadd.xlane.f32.xlu0 %v2948_v3 }
 0x121   :  { %v226_v0 = vpop.f32.mrf.mxu0 }
 0x122   :  { %v230_v8 = vmul.f32 %v226_v0, %v4481_v47 }
 0x123   :  { %v3312_v62 = vpop.f32.mrf.mxu0  ;;  %v409_v52 = vpop.f32.mrf.mxu1 }
 0x124   :  { %v413_v45 = vmul.f32 %v409_v52, %v4498_v53  ;;  %v231_v48 = vsel %vm73_vm2, %v230_v8, 0.0 }
 0x125   :  { %v3323_v12 = vpop.f32.mrf.mxu1  ;;  %232 = vadd.xlane.f32.xlu1 %v231_v48 }
 0x126   :  { %v414_v59 = vsel %vm73_vm2, %v413_v45, 0.0 }
 0x129   :  { %415 = vadd.xlane.f32.xlu1 %v414_v59 }
 0x12a   :  { %v602_v25 = vpop.f32.mrf.mxu0  ;;  %v76_v35 = vpop.xlane.xlu0 %75 }
 0x12b   :  { %v606_v16 = vmul.f32 %v602_v25, %v4556_v49  ;;  %v77_v58 = vrot.slane %v76_v35, 4 }
 0x12c   :  { %v3334_v26 = vpop.f32.mrf.mxu0 }
 0x12d   :  { %v785_v40 = vpop.f32.mrf.mxu1  ;;  %v607_v47 = vsel %vm73_vm2, %v606_v16, 0.0  ;;  %v78_v42 = vadd.f32 %v77_v58, %v76_v35 }
 0x12e   :  { %v789_v15 = vmul.f32 %v785_v40, %v4569_v57  ;;  %608 = vadd.xlane.f32.xlu1 %v607_v47  ;;  %v4822_v53 = vpop.xlane.xlu0 %259 }
 0x12f   :  { %v3345_v50 = vpop.f32.mrf.mxu1  ;;  %v79_v61 = vrot.slane %v78_v42, 2 }
 0x130   :  { %v790_v43 = vsel %vm73_vm2, %v789_v15, 0.0  ;;  %v135_v51 = vpop.xlane.xlu1 %134 }
 0x131   :  { %v136_v22 = vrot.slane %v135_v51, 4  ;;  %v80_v24 = vadd.f32 %v79_v61, %v78_v42 }
 0x132   :  { %791 = vadd.xlane.f32.xlu1 %v790_v43  ;;  %v4825_v49 = vpop.xlane.xlu0 %317 }
 0x133   :  { %v81_v2 = vrot.slane %v80_v24, 1  ;;  %v137_v21 = vadd.f32 %v136_v22, %v135_v51 }
 0x134   :  { %v978_v38 = vpop.f32.mrf.mxu0  ;;  %v293_v43 = vpop.xlane.xlu1 %292 }
 0x135   :  { %v982_v1 = vmul.f32 %v978_v38, %v4601_v54  ;;  %v82_v33 = vadd.f32 %v81_v2, %v80_v24  ;;  %v138_v55 = vrot.slane %v137_v21, 2 }
 0x136   :  { %v3356_v57 = vpop.f32.mrf.mxu0  ;;  %v4828_v44 = vpop.xlane.xlu0 %452 }
 0x137   :  { %v1161_v10 = vpop.f32.mrf.mxu1  ;;  %v983_v29 = vsel %vm73_vm2, %v982_v1, 0.0  ;;  %3478 = vpush %v82_v33  ;;  %v139_v46 = vadd.f32 %v138_v55, %v137_v21  ;;  %v2916_v1 = vmul.f32 %v4503_v23, %v4503_v23 }
 0x138   :  { %v1165_v32 = vmul.f32 %v1161_v10, %v4643_v63  ;;  %984 = vadd.xlane.f32.xlu1 %v983_v29  ;;  %v486_v33 = vpop.xlane.xlu1 %485 }
 0x139   :  { %v3367_v11 = vpop.f32.mrf.mxu1  ;;  %v140_v37 = vrot.slane %v139_v46, 1  ;;  %v2922_v29 = vsel %vm101_vm1, %v2916_v1, 0.0 }
 0x13a   :  { %v1166_v13 = vsel %vm73_vm2, %v1165_v32, 0.0  ;;  %v110_v9 = vpop.xlane.xlu0 %109  ;;  %v2923_v11 = vadd.f32 %v2922_v29, %v4749_v60 }
 0x13b   :  { %v111_v31 = vrot.slane %v110_v9, 4  ;;  %v141_v62 = vadd.f32 %v140_v37, %v139_v46 }
 0x13c   :  { %1167 = vadd.xlane.f32.xlu1 %v1166_v13 }
 0x13d   :  { %v112_v54 = vadd.f32 %v111_v31, %v110_v9 }
 0x13e   :  { %v1354_v14 = vpop.f32.mrf.mxu0  ;;  %v4841_v16 = vpop.xlane.xlu0 %510 }
 0x13f   :  { %v1358_v36 = vmul.f32 %v1354_v14, %v4680_v17  ;;  %v113_v27 = vrot.slane %v112_v54, 2 }
 0x140   :  { %v3378_v19 = vpop.f32.mrf.mxu0 }
 0x141   :  { %v1537_v20 = vpop.f32.mrf.mxu1  ;;  %v1359_v56 = vsel %vm73_vm2, %v1358_v36, 0.0  ;;  %v114_v63 = vadd.f32 %v113_v27, %v112_v54 }
 0x142   :  { %v1541_v39 = vmul.f32 %v1537_v20, %v4705_v4  ;;  %1360 = vadd.xlane.f32.xlu1 %v1359_v56  ;;  %v4846_v50 = vpop.xlane.xlu0 %635 }
 0x143   :  { %v3389_v3 = vpop.f32.mrf.mxu1  ;;  %v115_v0 = vrot.slane %v114_v63, 1 }
 0x144   :  { %v1542_v8 = vsel %vm73_vm2, %v1541_v39, 0.0  ;;  %v261_v3 = vrot.slane %v4822_v53, 4 }
 0x145   :  { %v116_v52 = vadd.f32 %v115_v0, %v114_v63 }
 0x146   :  { %1543 = vadd.xlane.f32.xlu1 %v1542_v8  ;;  %v4850_v22 = vpop.xlane.xlu0 %693  ;;  %v319_v8 = vrot.slane %v4825_v49, 4 }
 0x147   :  { %3480 = vpush %v116_v52  ;;  %v294_v52 = vrot.slane %v293_v43, 4 }
 0x148   :  { %v1730_v45 = vpop.f32.mrf.mxu0  ;;  %3482 = vpush %v141_v62  ;;  %v262_v62 = vadd.f32 %v261_v3, %v4822_v53 }
 0x149   :  { %v1734_v17 = vmul.f32 %v1730_v45, %v4721_v7  ;;  %v454_v45 = vrot.slane %v4828_v44, 4 }
 0x14a   :  { %v3400_v48 = vpop.f32.mrf.mxu0  ;;  %v4857_v57 = vpop.xlane.xlu0 %828 }
 0x14b   :  { %v1913_v12 = vpop.f32.mrf.mxu1  ;;  %v1735_v59 = vsel %vm73_vm2, %v1734_v17, 0.0  ;;  %v487_v48 = vrot.slane %v486_v33, 4 }
 0x14c   :  { %v1917_v25 = vmul.f32 %v1913_v12, %v4736_v28  ;;  %1736 = vadd.xlane.f32.xlu1 %v1735_v59  ;;  %v320_v59 = vadd.f32 %v319_v8, %v4825_v49 }
 0x14d   :  { %v3411_v4 = vpop.f32.mrf.mxu1 }
 0x14e   :  { %v1918_v35 = vsel %vm73_vm2, %v1917_v25, 0.0  ;;  %v4863_v13 = vpop.xlane.xlu0 %886  ;;  %v263_v25 = vrot.slane %v262_v62, 2  ;;  %v295_v4 = vadd.f32 %v294_v52, %v293_v43 }
 0x150   :  { %1919 = vadd.xlane.f32.xlu1 %v1918_v35  ;;  %v264_v43 = vadd.f32 %v263_v25, %v262_v62 }
 0x152   :  { %v2106_v58 = vpop.f32.mrf.mxu0 }
 0x153   :  { %v2110_v26 = vmul.f32 %v2106_v58, %v4754_v6  ;;  %v512_v58 = vrot.slane %v4841_v16, 4 }
 0x154   :  { %v3422_v40 = vpop.f32.mrf.mxu0 }
 0x155   :  { %v2289_v47 = vpop.f32.mrf.mxu1  ;;  %v2111_v7 = vsel %vm73_vm2, %v2110_v26, 0.0  ;;  %v455_v26 = vadd.f32 %v454_v45, %v4828_v44 }
 0x156   :  { %v2293_v42 = vmul.f32 %v2289_v47, %v4765_v30  ;;  %2112 = vadd.xlane.f32.xlu1 %v2111_v7  ;;  %v488_v47 = vadd.f32 %v487_v48, %v486_v33  ;;  %v637_v7 = vrot.slane %v4846_v50, 4 }
 0x157   :  { %v3433_v15 = vpop.f32.mrf.mxu1 }
 0x158   :  { %v2294_v28 = vsel %vm73_vm2, %v2293_v42, 0.0  ;;  %v321_v42 = vrot.slane %v320_v59, 2  ;;  %v489_v44 = vrot.slane %v488_v47, 2 }
 0x15a   :  { %2295 = vadd.xlane.f32.xlu1 %v2294_v28  ;;  %v296_v28 = vrot.slane %v295_v4, 2  ;;  %v322_v1 = vadd.f32 %v321_v42, %v320_v59 }
 0x15c   :  { %v2482_v61 = vpop.f32.mrf.mxu0  ;;  %v297_v29 = vadd.f32 %v296_v28, %v295_v4 }
 0x15d   :  { %v2486_v51 = vmul.f32 %v2482_v61, %v4776_v34 }
 0x15e   :  { %v3444_v6 = vpop.f32.mrf.mxu0  ;;  %v298_v3 = vrot.slane %v297_v29, 1 }
 0x15f   :  { %v2665_v24 = vpop.f32.mrf.mxu1  ;;  %v2487_v2 = vsel %vm73_vm2, %v2486_v51, 0.0  ;;  %v513_v51 = vadd.f32 %v512_v58, %v4841_v16  ;;  %v456_v6 = vrot.slane %v455_v26, 2 }
 0x160   :  { %v2669_v38 = vmul.f32 %v2665_v24, %v4787_v41  ;;  %2488 = vadd.xlane.f32.xlu1 %v2487_v2  ;;  %v669_v41 = vpop.xlane.xlu1 %668  ;;  %v695_v2 = vrot.slane %v4850_v22, 4 }
 0x161   :  { %v3455_v30 = vpop.f32.mrf.mxu1  ;;  %v670_v35 = vrot.slane %v669_v41, 4 }
 0x162   :  { %v2670_v21 = vsel %vm73_vm2, %v2669_v38, 0.0  ;;  %v638_v30 = vadd.f32 %v637_v7, %v4846_v50  ;;  %v696_v16 = vadd.f32 %v695_v2, %v4850_v22  ;;  %v490_v50 = vadd.f32 %v489_v44, %v488_v47 }
 0x163   :  { %v671_v61 = vadd.f32 %v670_v35, %v669_v41 }
 0x164   :  { %2671 = vadd.xlane.f32.xlu1 %v2670_v21  ;;  %v862_v46 = vpop.xlane.xlu1 %861  ;;  %v697_v52 = vrot.slane %v696_v16, 2  ;;  %v491_v25 = vrot.slane %v490_v50, 1 }
 0x165   :  { %v2858_v34 = vpop.f32.mrf.mxu0  ;;  %v863_v40 = vrot.slane %v862_v46, 4  ;;  %v672_v33 = vrot.slane %v671_v61, 2 }
 0x166   :  { %v2862_v10 = vmul.f32 %v2858_v34, %v4798_v18  ;;  %v4867_v18 = vpop.xlane.xlu0 %1011  ;;  %v514_v34 = vrot.slane %v513_v51, 2 }
 0x167   :  { %v3466_v32 = vpop.f32.mrf.mxu0  ;;  %v864_v24 = vadd.f32 %v863_v40, %v862_v46  ;;  %v673_v62 = vadd.f32 %v672_v33, %v671_v61 }
 0x168   :  { %v2863_v55 = vsel %vm73_vm2, %v2862_v10, 0.0  ;;  %v1045_v14 = vpop.xlane.xlu1 %1044  ;;  %v265_v10 = vrot.slane %v264_v43, 1  ;;  %v515_v8 = vadd.f32 %v514_v34, %v513_v51  ;;  %s3479_s6 = spop %3478 }
 0x169   :  { %2864 = vadd.xlane.f32.xlu1 %v2863_v55  ;;  %v1046_v53 = vrot.slane %v1045_v14, 4  ;;  %v865_v32 = vrot.slane %v864_v24, 2  ;;  %v830_v55 = vrot.slane %v4857_v57, 4  ;;  %v674_v28 = vrot.slane %v673_v62, 1 }
 0x16a   :  { %v4869_v36 = vpop.xlane.xlu0 %1069  ;;  %v516_v42 = vrot.slane %v515_v8, 1 }
 0x16b   :  { %v3041_v9 = vpop.f32.mrf.mxu1  ;;  %v1047_v38 = vadd.f32 %v1046_v53, %v1045_v14  ;;  %v4914_v14 = vadd.f32 %v265_v10, %v264_v43  ;;  %v831_v22 = vadd.f32 %v830_v55, %v4857_v57  ;;  %v866_v48 = vadd.f32 %v865_v32, %v864_v24 }
 0x16c   :  { %v3045_v23 = vmul.f32 %v3041_v9, %v4809_v5  ;;  %v1238_v27 = vpop.xlane.xlu1 %1237  ;;  %v1013_v53 = vrot.slane %v4867_v18, 4  ;;  %v4927_v57 = vadd.f32 %v298_v3, %v297_v29  ;;  %v698_v43 = vadd.f32 %v697_v52, %v696_v16 }
 0x16d   :  { %2924 = vadd.xlane.f32.xlu1 %v2923_v11  ;;  %v3477_v31 = vpop.f32.mrf.mxu1  ;;  %v1239_v21 = vrot.slane %v1238_v27, 4  ;;  %v457_v11 = vadd.f32 %v456_v6, %v455_v26  ;;  %v1048_v9 = vrot.slane %v1047_v38, 2  ;;  %v888_v26 = vrot.slane %v4863_v13, 4 }
 0x16e   :  { %v3046_v54 = vsel %vm73_vm2, %v3045_v23, 0.0  ;;  %v4871_v19 = vpop.xlane.xlu0 %1204  ;;  %v639_v23 = vrot.slane %v638_v30, 2  ;;  %v832_v61 = vrot.slane %v831_v22, 2  ;;  %v867_v6 = vrot.slane %v866_v48, 1 }
 0x16f   :  { %v1240_v31 = vadd.f32 %v1239_v21, %v1238_v27  ;;  %v458_v45 = vrot.slane %v457_v11, 1  ;;  %v1049_v35 = vadd.f32 %v1048_v9, %v1047_v38  ;;  %v4931_v24 = vadd.f32 %v491_v25, %v490_v50 }
 0x170   :  { %v4873_v60 = vpop.xlane.xlu1 %1420  ;;  %v640_v4 = vadd.f32 %v639_v23, %v638_v30  ;;  %v1014_v10 = vadd.f32 %v1013_v53, %v4867_v18  ;;  %v4938_v32 = vadd.f32 %v516_v42, %v515_v8  ;;  %v4940_v16 = vadd.f32 %v674_v28, %v673_v62 }
 0x171   :  { %3047 = vadd.xlane.f32.xlu1 %v3046_v54  ;;  %v323_v54 = vrot.slane %v322_v1, 1  ;;  %v1241_v59 = vrot.slane %v1240_v31, 2  ;;  %v1422_v27 = vrot.slane %v4873_v60, 4  ;;  %v4929_v51 = vadd.f32 %v458_v45, %v457_v11 }
 0x172   :  { %v4875_v37 = vpop.xlane.xlu0 %1262  ;;  %v641_v2 = vrot.slane %v640_v4, 1  ;;  %v1050_v44 = vrot.slane %v1049_v35, 1  ;;  %v1071_v55 = vrot.slane %v4869_v36, 4  ;;  %v699_v11 = vrot.slane %v698_v43, 1 }
 0x173   :  { %v4922_v47 = vadd.f32 %v323_v54, %v322_v1  ;;  %v1242_v38 = vadd.f32 %v1241_v59, %v1240_v31  ;;  %v1423_v30 = vadd.f32 %v1422_v27, %v4873_v60  ;;  %v889_v1 = vadd.f32 %v888_v26, %v4863_v13 }
 0x174   :  { %v4877_v20 = vpop.xlane.xlu1 %1613  ;;  %v833_v9 = vadd.f32 %v832_v61, %v831_v22  ;;  %v4943_v23 = vadd.f32 %v867_v6, %v866_v48  ;;  %v4947_v13 = vadd.f32 %v641_v2, %v640_v4  ;;  %v4949_v31 = vadd.f32 %v1050_v44, %v1049_v35 }
 0x175   :  { %v1615_v58 = vrot.slane %v4877_v20, 4  ;;  %v1243_v50 = vrot.slane %v1242_v38, 1  ;;  %v1424_v18 = vrot.slane %v1423_v30, 2  ;;  %v890_v3 = vrot.slane %v889_v1, 2 }
 0x176   :  { %v4879_v5 = vpop.xlane.xlu0 %1387  ;;  %v1015_v52 = vrot.slane %v1014_v10, 2  ;;  %v1072_v59 = vadd.f32 %v1071_v55, %v4869_v36  ;;  %v1206_v25 = vrot.slane %v4871_v19, 4  ;;  %v4955_v4 = vadd.f32 %v699_v11, %v698_v43 }
 0x177   :  { %v1616_v21 = vadd.f32 %v1615_v58, %v4877_v20  ;;  %v834_v35 = vrot.slane %v833_v9, 1  ;;  %v4958_v53 = vadd.f32 %v1243_v50, %v1242_v38  ;;  %v891_v42 = vadd.f32 %v890_v3, %v889_v1 }
 0x178   :  { %v4881_v56 = vpop.xlane.xlu1 %1796  ;;  %v1425_v28 = vadd.f32 %v1424_v18, %v1423_v30  ;;  %v1016_v43 = vadd.f32 %v1015_v52, %v1014_v10  ;;  %v1264_v1 = vrot.slane %v4875_v37, 4  ;;  %s3481_s14 = spop %3480 }
 0x179   :  { %v1798_v33 = vrot.slane %v4881_v56, 4  ;;  %v1617_v54 = vrot.slane %v1616_v21, 2  ;;  %v4964_v11 = vadd.f32 %v834_v35, %v833_v9  ;;  %s3483_s7 = spop %3482 }
 0x17a   :  { %v4883_v63 = vpop.xlane.xlu0 %1445  ;;  %v1426_v50 = vrot.slane %v1425_v28, 1 }
 0x17b   :  { %v1799_v8 = vadd.f32 %v1798_v33, %v4881_v56  ;;  %v1618_v61 = vadd.f32 %v1617_v54, %v1616_v21 }
 0x17c   :  { %v4885_v39 = vpop.xlane.xlu1 %1989 }
 0x17d   :  { %v1991_v45 = vrot.slane %v4885_v39, 4  ;;  %v1800_v56 = vrot.slane %v1799_v8, 2  ;;  %v1619_v52 = vrot.slane %v1618_v61, 1 }
 0x17e   :  { %v4888_v0 = vpop.xlane.xlu0 %1580 }
 0x17f   :  { %v1992_v6 = vadd.f32 %v1991_v45, %v4885_v39  ;;  %v892_v39 = vrot.slane %v891_v42, 1  ;;  %v1801_v18 = vadd.f32 %v1800_v56, %v1799_v8 }
 0x180   :  { %v4893_v17 = vpop.xlane.xlu1 %2172 }
 0x181   :  { %v2174_v27 = vrot.slane %v4893_v17, 4  ;;  %v1993_v54 = vrot.slane %v1992_v6, 2  ;;  %v1802_v56 = vrot.slane %v1801_v18, 1 }
 0x182   :  { %v4895_v12 = vpop.xlane.xlu0 %1638 }
 0x183   :  { %v2175_v38 = vadd.f32 %v2174_v27, %v4893_v17 }
 0x184   :  { %v4901_v15 = vpop.xlane.xlu1 %2365 }
 0x186   :  { %v4904_v49 = vpop.xlane.xlu0 %1763 }
 0x188   :  { %v4910_v41 = vpop.xlane.xlu1 %2548 }
 0x18a   :  { %v4912_v46 = vpop.xlane.xlu0 %1821 }
 0x18c   :  { %v4920_v40 = vpop.xlane.xlu1 %2741 }
 0x18e   :  { %v4925_v7 = vpop.xlane.xlu0 %1956 }
 0x192   :  { %v4945_v20 = vpop.xlane.xlu0 %2014 }
 0x196   :  { %v4961_v33 = vpop.xlane.xlu0 %2139 }
 0x19a   :  { %v4972_v35 = vpop.xlane.xlu0 %2197 }
 0x1ae   :  { %v233_v34 = vpop.xlane.xlu1 %232 }
 0x1af   :  { %v234_v29 = vrot.slane %v233_v34, 4 }
 0x1b1   :  { %v235_v60 = vadd.f32 %v234_v29, %v233_v34  ;;  %v1073_v34 = vrot.slane %v1072_v59, 2  ;;  %v1207_v29 = vadd.f32 %v1206_v25, %v4871_v19  ;;  %v1265_v25 = vadd.f32 %v1264_v1, %v4875_v37 }
 0x1b2   :  { %v416_v62 = vpop.xlane.xlu1 %415  ;;  %v1994_v37 = vadd.f32 %v1993_v54, %v1992_v6 }
 0x1b3   :  { %v236_v22 = vrot.slane %v235_v60, 2  ;;  %v417_v48 = vrot.slane %v416_v62, 4  ;;  %v1208_v19 = vrot.slane %v1207_v29, 2  ;;  %v1074_v17 = vadd.f32 %v1073_v34, %v1072_v59 }
 0x1b5   :  { %v418_v58 = vadd.f32 %v417_v48, %v416_v62  ;;  %v237_v26 = vadd.f32 %v236_v22, %v235_v60  ;;  %v1017_v62 = vrot.slane %v1016_v43, 1  ;;  %v2176_v22 = vrot.slane %v2175_v38, 2 }
 0x1b6   :  { %v2367_v48 = vrot.slane %v4901_v15, 4  ;;  %v1209_v34 = vadd.f32 %v1208_v19, %v1207_v29  ;;  %v1447_v29 = vrot.slane %v4883_v63, 4 }
 0x1b7   :  { %v419_v2 = vrot.slane %v418_v58, 2  ;;  %v609_v44 = vpop.xlane.xlu1 %608  ;;  %v238_v36 = vrot.slane %v237_v26, 1  ;;  %v4979_v59 = vadd.f32 %v1017_v62, %v1016_v43  ;;  %v4999_v62 = vstv %s3479_s6 }
 0x1b8   :  { %v610_v55 = vrot.slane %v609_v44, 4  ;;  %3618 = vrsqrt.f32 %v4999_v62  ;;  %vm87_vm3 = vcmp.eq.f32.partialorder %v4999_v62, inf  ;;  %vm89_vm4 = vcmp.eq.f32.partialorder %v4999_v62, 0.0 }
 0x1b9   :  { %v239_v30 = vadd.f32 %v238_v36, %v237_v26  ;;  %v420_v21 = vadd.f32 %v419_v2, %v418_v58  ;;  %v4975_v26 = vadd.f32 %v1426_v50, %v1425_v28  ;;  %v4981_v2 = vadd.f32 %v1619_v52, %v1618_v61 }
 0x1ba   :  { %v611_v60 = vadd.f32 %v610_v55, %v609_v44  ;;  %v1075_v36 = vrot.slane %v1074_v17, 1  ;;  %v1266_v55 = vrot.slane %v1265_v25, 2  ;;  %v1389_v28 = vrot.slane %v4879_v5, 4 }
 0x1bb   :  { %v792_v3 = vpop.xlane.xlu1 %791  ;;  %3484 = vpush %v239_v30  ;;  %v421_v10 = vrot.slane %v420_v21, 1  ;;  %v4988_v30 = vadd.f32 %v1802_v56, %v1801_v18 }
 0x1bc   :  { %v612_v45 = vrot.slane %v611_v60, 2  ;;  %v793_v9 = vrot.slane %v792_v3, 4  ;;  %3486 = vpush %v4914_v14  ;;  %v4977_v14 = vadd.f32 %v892_v39, %v891_v42  ;;  %v2177_v42 = vadd.f32 %v2176_v22, %v2175_v38 }
 0x1bd   :  { %3488 = vpush %v4927_v57  ;;  %v422_v8 = vadd.f32 %v421_v10, %v420_v21  ;;  %v4993_v21 = vpop.xlane.xlu0 %2332  ;;  %v4995_v38 = vadd.f32 %v1075_v36, %v1074_v17  ;;  %v1390_v18 = vadd.f32 %v1389_v28, %v4879_v5  ;;  %v1448_v17 = vadd.f32 %v1447_v29, %v4883_v63 }
 0x1be   :  { %v794_v27 = vadd.f32 %v793_v9, %v792_v3  ;;  %3490 = vpush %v4922_v47  ;;  %v613_v58 = vadd.f32 %v612_v45, %v611_v60  ;;  %v2368_v47 = vadd.f32 %v2367_v48, %v4901_v15  ;;  %v1582_v15 = vrot.slane %v4888_v0, 4 }
 0x1bf   :  { %3492 = vpush %v422_v8  ;;  %v1995_v60 = vrot.slane %v1994_v37, 1  ;;  %v1267_v3 = vadd.f32 %v1266_v55, %v1265_v25  ;;  %v2178_v10 = vrot.slane %v2177_v42, 1 }
 0x1c0   :  { %v795_v44 = vrot.slane %v794_v27, 2  ;;  %3494 = vpush %v4929_v51  ;;  %v614_v57 = vrot.slane %v613_v58, 1  ;;  %v2550_v51 = vrot.slane %v4910_v41, 4  ;;  %v2369_v50 = vrot.slane %v2368_v47, 2 }
 0x1c1   :  { %v985_v1 = vpop.xlane.xlu1 %984  ;;  %3496 = vpush %v4931_v24  ;;  %v1583_v22 = vadd.f32 %v1582_v15, %v4888_v0  ;;  %v5006_v5 = vadd.f32 %v1995_v60, %v1994_v37  ;;  %v5012_v63 = vpop.xlane.xlu0 %2390  ;;  %v5015_v56 = vadd.f32 %v2178_v10, %v2177_v42  ;;  %v90_v37 = vand.u32 2147483648, %v4999_v62 }
 0x1c2   :  { %v986_v43 = vrot.slane %v985_v1, 4  ;;  %3498 = vpush %v4938_v32  ;;  %v615_v61 = vadd.f32 %v614_v57, %v613_v58  ;;  %v796_v6 = vadd.f32 %v795_v44, %v794_v27  ;;  %v1210_v32 = vrot.slane %v1209_v34, 1 }
 0x1c3   :  { %v2551_v9 = vadd.f32 %v2550_v51, %v4910_v41  ;;  %v2743_v27 = vrot.slane %v4920_v40, 4  ;;  %v2370_v0 = vadd.f32 %v2369_v50, %v2368_v47  ;;  %v1268_v58 = vrot.slane %v1267_v3, 1 }
 0x1c4   :  { %v987_v39 = vadd.f32 %v986_v43, %v985_v1  ;;  %3500 = vpush %v615_v61  ;;  %v797_v24 = vrot.slane %v796_v6, 1  ;;  %v1211_v8 = vadd.f32 %v1210_v32, %v1209_v34  ;;  %v1449_v57 = vrot.slane %v1448_v17, 2 }
 0x1c5   :  { %v1168_v54 = vpop.xlane.xlu1 %1167  ;;  %3502 = vpush %v4947_v13  ;;  %v1640_v13 = vrot.slane %v4895_v12, 4  ;;  %v2552_v44 = vrot.slane %v2551_v9, 2  ;;  %v1584_v36 = vrot.slane %v1583_v22, 2  ;;  %v5021_v1 = vadd.f32 %v2743_v27, %v4920_v40 }
 0x1c6   :  { %v988_v52 = vrot.slane %v987_v39, 2  ;;  %v1169_v19 = vrot.slane %v1168_v54, 4  ;;  %3504 = vpush %v4940_v16  ;;  %v798_v45 = vadd.f32 %v797_v24, %v796_v6  ;;  %v1391_v16 = vrot.slane %v1390_v18, 2 }
 0x1c7   :  { %3506 = vpush %v4955_v4  ;;  %v1823_v42 = vrot.slane %v4912_v46, 4  ;;  %v1958_v61 = vrot.slane %v4925_v7, 4  ;;  %v1450_v15 = vadd.f32 %v1449_v57, %v1448_v17  ;;  %v1585_v40 = vadd.f32 %v1584_v36, %v1583_v22 }
 0x1c8   :  { %v1170_v48 = vadd.f32 %v1169_v19, %v1168_v54  ;;  %3508 = vpush %v798_v45  ;;  %v989_v25 = vadd.f32 %v988_v52, %v987_v39  ;;  %v1392_v43 = vadd.f32 %v1391_v16, %v1390_v18  ;;  %v2371_v60 = vrot.slane %v2370_v0, 1 }
 0x1c9   :  { %3510 = vpush %v4964_v11  ;;  %v1641_v11 = vadd.f32 %v1640_v13, %v4895_v12  ;;  %v5027_v12 = vpop.xlane.xlu0 %2515  ;;  %v5029_v39 = vadd.f32 %v2552_v44, %v2551_v9  ;;  %v5032_v54 = vstv %s3481_s14  ;;  %v1824_v10 = vadd.f32 %v1823_v42, %v4912_v46 }
 0x1ca   :  { %v1171_v41 = vrot.slane %v1170_v48, 2  ;;  %3512 = vpush %v4943_v23  ;;  %v990_v4 = vrot.slane %v989_v25, 1  ;;  %v1765_v23 = vrot.slane %v4904_v49, 4  ;;  %v2745_v52 = vrot.slane %v5021_v1, 2 }
 0x1cb   :  { %v1361_v34 = vpop.xlane.xlu1 %1360  ;;  %3514 = vpush %v4977_v14  ;;  %v1269_v14 = vadd.f32 %v1268_v58, %v1267_v3  ;;  %v1642_v24 = vrot.slane %v1641_v11, 2  ;;  %v1959_v19 = vadd.f32 %v1958_v61, %v4925_v7  ;;  %v1451_v17 = vrot.slane %v1450_v15, 1 }
 0x1cc   :  { %v1362_v55 = vrot.slane %v1361_v34, 4  ;;  %v991_v28 = vadd.f32 %v990_v4, %v989_v25  ;;  %v1172_v47 = vadd.f32 %v1171_v41, %v1170_v48  ;;  %v1766_v3 = vadd.f32 %v1765_v23, %v4904_v49  ;;  %v3619_v41 = vpop.eup %3618 }
 0x1cd   :  { %v1586_v22 = vrot.slane %v1585_v40, 1  ;;  %v5041_v49 = vadd.f32 %v2371_v60, %v2370_v0  ;;  %3620 = vrsqrt.f32 %v5032_v54  ;;  %v1643_v13 = vadd.f32 %v1642_v24, %v1641_v11  ;;  %v5045_v27 = vpop.xlane.xlu0 %2573 }
 0x1ce   :  { %v1363_v6 = vadd.f32 %v1362_v55, %v1361_v34  ;;  %3516 = vpush %v991_v28  ;;  %v1173_v51 = vrot.slane %v1172_v47, 1  ;;  %v1767_v48 = vrot.slane %v1766_v3, 2  ;;  %v1825_v7 = vrot.slane %v1824_v10, 2 }
 0x1cf   :  { %v1544_v29 = vpop.xlane.xlu1 %1543  ;;  %3518 = vpush %v4979_v59  ;;  %v1393_v59 = vrot.slane %v1392_v43, 1  ;;  %v1960_v0 = vrot.slane %v1959_v19, 2  ;;  %v1452_v36 = vadd.f32 %v1451_v17, %v1450_v15  ;;  %v1587_v34 = vadd.f32 %v1586_v22, %v1585_v40 }
 0x1d0   :  { %v1364_v32 = vrot.slane %v1363_v6, 2  ;;  %v1545_v50 = vrot.slane %v1544_v29, 4  ;;  %3520 = vpush %v4949_v31  ;;  %v1174_v18 = vadd.f32 %v1173_v51, %v1172_v47  ;;  %v2016_v31 = vrot.slane %v4945_v20, 4 }
 0x1d1   :  { %3522 = vpush %v4995_v38  ;;  %v1394_v16 = vadd.f32 %v1393_v59, %v1392_v43  ;;  %v5050_v11 = vstv %s3483_s7  ;;  %v1644_v47 = vrot.slane %v1643_v13, 1  ;;  %v86_v23 = vmul.f32 %v3619_v41, %v4999_v62  ;;  %v5059_v24 = vpop.xlane.xlu0 %2708 }
 0x1d2   :  { %v1546_v45 = vadd.f32 %v1545_v50, %v1544_v29  ;;  %3524 = vpush %v1174_v18  ;;  %v1365_v9 = vadd.f32 %v1364_v32, %v1363_v6  ;;  %v2017_v57 = vadd.f32 %v2016_v31, %v4945_v20  ;;  %v2199_v42 = vrot.slane %v4972_v35, 4 }
 0x1d3   :  { %3526 = vpush %v1211_v8  ;;  %v2554_v8 = vrot.slane %v5029_v39, 1  ;;  %v1768_v61 = vadd.f32 %v1767_v48, %v1766_v3  ;;  %v1826_v6 = vadd.f32 %v1825_v7, %v1824_v10  ;;  %v1961_v29 = vadd.f32 %v1960_v0, %v1959_v19 }
 0x1d4   :  { %v1547_v46 = vrot.slane %v1546_v45, 2  ;;  %3528 = vpush %v4958_v53  ;;  %v1366_v38 = vrot.slane %v1365_v9, 1  ;;  %v2141_v53 = vrot.slane %v4961_v33, 4  ;;  %3622 = vrsqrt.f32 %v5050_v11 }
 0x1d5   :  { %v1737_v25 = vpop.xlane.xlu1 %1736  ;;  %3530 = vpush %v1269_v14  ;;  %v2018_v15 = vrot.slane %v2017_v57, 2  ;;  %v2334_v60 = vrot.slane %v4993_v21, 4  ;;  %v1645_v50 = vadd.f32 %v1644_v47, %v1643_v13  ;;  %v88_v3 = vsel %vm87_vm3, %v4999_v62, %v86_v23  ;;  %v2767_v41 = vpop.xlane.xlu0 %2766 }
 0x1d6   :  { %v1738_v4 = vrot.slane %v1737_v25, 4  ;;  %v1367_v58 = vadd.f32 %v1366_v38, %v1365_v9  ;;  %v1548_v44 = vadd.f32 %v1547_v46, %v1546_v45  ;;  %v2142_v40 = vadd.f32 %v2141_v53, %v4961_v33 }
 0x1d7   :  { %v2200_v10 = vadd.f32 %v2199_v42, %v4972_v35  ;;  %v2392_v33 = vrot.slane %v5012_v63, 4  ;;  %v1769_v59 = vrot.slane %v1768_v61, 1  ;;  %v1827_v9 = vrot.slane %v1826_v6, 1 }
 0x1d8   :  { %v1739_v55 = vadd.f32 %v1738_v4, %v1737_v25  ;;  %3532 = vpush %v1367_v58  ;;  %v1549_v28 = vrot.slane %v1548_v44, 1  ;;  %v1962_v31 = vrot.slane %v1961_v29, 1  ;;  %vm121_vm5 = vcmp.eq.f32.partialorder %v5032_v54, inf }
 0x1d9   :  { %v1920_v43 = vpop.xlane.xlu1 %1919  ;;  %3534 = vpush %v1394_v16  ;;  %v2019_v22 = vadd.f32 %v2018_v15, %v2017_v57  ;;  %v124_v35 = vand.u32 2147483648, %v5032_v54  ;;  %vm123_vm6 = vcmp.eq.f32.partialorder %v5032_v54, 0.0  ;;  %v2393_v7 = vadd.f32 %v2392_v33, %v5012_v63 }
 0x1da   :  { %v1740_v51 = vrot.slane %v1739_v55, 2  ;;  %v1921_v20 = vrot.slane %v1920_v43, 4  ;;  %3536 = vpush %v4975_v26  ;;  %v1550_v14 = vadd.f32 %v1549_v28, %v1548_v44  ;;  %v5062_v26 = vadd.f32 %v2745_v52, %v5021_v1  ;;  %v3621_v48 = vpop.eup %3620 }
 0x1db   :  { %3538 = vpush %v1452_v36  ;;  %v2143_v1 = vrot.slane %v2142_v40, 2  ;;  %v2335_v52 = vadd.f32 %v2334_v60, %v4993_v21  ;;  %v2517_v25 = vrot.slane %v5027_v12, 4  ;;  %v1770_v16 = vadd.f32 %v1769_v59, %v1768_v61 }
 0x1dc   :  { %v1922_v32 = vadd.f32 %v1921_v20, %v1920_v43  ;;  %3540 = vpush %v1550_v14  ;;  %v1741_v18 = vadd.f32 %v1740_v51, %v1739_v55  ;;  %v1828_v21 = vadd.f32 %v1827_v9, %v1826_v6  ;;  %v1963_v58 = vadd.f32 %v1962_v31, %v1961_v29 }
 0x1dd   :  { %3542 = vpush %v1587_v34  ;;  %v2336_v44 = vrot.slane %v2335_v52, 2  ;;  %v2575_v57 = vrot.slane %v5045_v27, 4  ;;  %v2020_v36 = vrot.slane %v2019_v22, 1  ;;  %v2144_v34 = vadd.f32 %v2143_v1, %v2142_v40 }
 0x1de   :  { %v1923_v19 = vrot.slane %v1922_v32, 2  ;;  %3544 = vpush %v4981_v2  ;;  %v1742_v45 = vrot.slane %v1741_v18, 1  ;;  %v2201_v2 = vrot.slane %v2200_v10, 2  ;;  %v120_v55 = vmul.f32 %v3621_v48, %v5032_v54 }
 0x1df   :  { %v2113_v17 = vpop.xlane.xlu1 %2112  ;;  %3546 = vpush %v1645_v50  ;;  %vm146_vm7 = vcmp.eq.f32.partialorder %v5050_v11, inf  ;;  %v2394_v23 = vrot.slane %v2393_v7, 2  ;;  %v2518_v42 = vadd.f32 %v2517_v25, %v5027_v12  ;;  %v2710_v43 = vrot.slane %v5059_v24, 4  ;;  %v2892_v12 = vpop.xlane.xlu0 %2891 }
 0x1e0   :  { %v2114_v46 = vrot.slane %v2113_v17, 4  ;;  %v1743_v38 = vadd.f32 %v1742_v45, %v1741_v18  ;;  %v1924_v13 = vadd.f32 %v1923_v19, %v1922_v32  ;;  %v2202_v61 = vadd.f32 %v2201_v2, %v2200_v10 }
 0x1e1   :  { %v149_v6 = vand.u32 2147483648, %v5050_v11  ;;  %v5087_v14 = vsel %vm89_vm4, %v90_v37, %v88_v3  ;;  %v2021_v29 = vadd.f32 %v2020_v36, %v2019_v22  ;;  %v2145_v15 = vrot.slane %v2144_v34, 1  ;;  %v3623_v60 = vpop.eup %3622 }
 0x1e2   :  { %v2115_v0 = vadd.f32 %v2114_v46, %v2113_v17  ;;  %3548 = vpush %v1743_v38  ;;  %v1925_v4 = vrot.slane %v1924_v13, 1  ;;  %v2337_v40 = vadd.f32 %v2336_v44, %v2335_v52  ;;  %v122_v32 = vsel %vm121_vm5, %v5032_v54, %v120_v55 }
 0x1e3   :  { %v2296_v53 = vpop.xlane.xlu1 %2295  ;;  %3550 = vpush %v1770_v16  ;;  %v2768_v18 = vrot.slane %v2767_v41, 4  ;;  %v2519_v62 = vrot.slane %v2518_v42, 2  ;;  %v2711_v37 = vadd.f32 %v2710_v43, %v5059_v24  ;;  %v2395_v33 = vadd.f32 %v2394_v23, %v2393_v7  ;;  %v2950_v2 = vpop.xlane.xlu0 %2949 }
 0x1e4   :  { %v2116_v63 = vrot.slane %v2115_v0, 2  ;;  %v2297_v28 = vrot.slane %v2296_v53, 4  ;;  %3552 = vpush %v4988_v30  ;;  %v1926_v47 = vadd.f32 %v1925_v4, %v1924_v13  ;;  %v2576_v30 = vadd.f32 %v2575_v57, %v5045_v27 }
 0x1e5   :  { %3554 = vpush %v1828_v21  ;;  %v2203_v27 = vrot.slane %v2202_v61, 1  ;;  %v2893_v19 = vrot.slane %v2892_v12, 4  ;;  %v145_v31 = vmul.f32 %v3623_v60, %v5050_v11  ;;  %v2146_v52 = vadd.f32 %v2145_v15, %v2144_v34 }
 0x1e6   :  { %v2298_v51 = vadd.f32 %v2297_v28, %v2296_v53  ;;  %3556 = vpush %v1926_v47  ;;  %v2117_v20 = vadd.f32 %v2116_v63, %v2115_v0  ;;  %v2577_v1 = vrot.slane %v2576_v30, 2  ;;  %v2338_v17 = vrot.slane %v2337_v40, 1 }
 0x1e7   :  { %3558 = vpush %v1963_v58  ;;  %v2769_v46 = vadd.f32 %v2768_v18, %v2767_v41  ;;  %v5100_v24 = vsel %vm123_vm6, %v124_v35, %v122_v32  ;;  %v2712_v38 = vrot.slane %v2711_v37, 2  ;;  %v2204_v48 = vadd.f32 %v2203_v27, %v2202_v61 }
 0x1e8   :  { %v2299_v50 = vrot.slane %v2298_v51, 2  ;;  %3560 = vpush %v5006_v5  ;;  %v2118_v10 = vrot.slane %v2117_v20, 1  ;;  %v2396_v7 = vrot.slane %v2395_v33, 1  ;;  %v2520_v25 = vadd.f32 %v2519_v62, %v2518_v42 }
 0x1e9   :  { %v2489_v3 = vpop.xlane.xlu1 %2488  ;;  %3562 = vpush %v2021_v29  ;;  %v2894_v21 = vadd.f32 %v2893_v19, %v2892_v12  ;;  %v2339_v4 = vadd.f32 %v2338_v17, %v2337_v40  ;;  %v2578_v58 = vadd.f32 %v2577_v1, %v2576_v30  ;;  %v147_v54 = vsel %vm146_vm7, %v5050_v11, %v145_v31 }
 0x1ea   :  { %v2490_v59 = vrot.slane %v2489_v3, 4  ;;  %v2119_v45 = vadd.f32 %v2118_v10, %v2117_v20  ;;  %v2300_v9 = vadd.f32 %v2299_v50, %v2298_v51  ;;  %vm148_vm8 = vcmp.eq.f32.partialorder %v5050_v11, 0.0 }
 0x1eb   :  { %v2770_v35 = vrot.slane %v2769_v46, 2  ;;  %v2951_v57 = vrot.slane %v2950_v2, 4  ;;  %v2397_v36 = vadd.f32 %v2396_v7, %v2395_v33  ;;  %v2521_v34 = vrot.slane %v2520_v25, 1 }
 0x1ec   :  { %v2491_v22 = vadd.f32 %v2490_v59, %v2489_v3  ;;  %3564 = vpush %v2119_v45  ;;  %v2301_v5 = vrot.slane %v2300_v9, 1  ;;  %v127_v55 = vadd.f32 1e-07, %v5100_v24  ;;  %v2895_v28 = vrot.slane %v2894_v21, 2  ;;  %s5110_s15 = spop %3484 }
 0x1ed   :  { %v2672_v13 = vpop.xlane.xlu1 %2671  ;;  %3566 = vpush %v2146_v52  ;;  %v2713_v42 = vadd.f32 %v2712_v38, %v2711_v37  ;;  %v2555_v61 = vadd.f32 %v2554_v8, %v5029_v39  ;;  %v2579_v51 = vrot.slane %v2578_v58, 1  ;;  %v5119_v20 = vsel %vm148_vm8, %v149_v6, %v147_v54  ;;  %s3487_s16 = spop %3486 }
 0x1ee   :  { %v2492_v16 = vrot.slane %v2491_v22, 2  ;;  %v2673_v0 = vrot.slane %v2672_v13, 4  ;;  %3568 = vpush %v5015_v56  ;;  %v2302_v41 = vadd.f32 %v2301_v5, %v2300_v9  ;;  %v93_v56 = vadd.f32 1e-07, %v5087_v14  ;;  %s3489_s17 = spop %3488 }
 0x1ef   :  { %3570 = vpush %v2204_v48  ;;  %v2952_v30 = vadd.f32 %v2951_v57, %v2950_v2  ;;  %v2771_v12 = vadd.f32 %v2770_v35, %v2769_v46  ;;  %v2522_v40 = vadd.f32 %v2521_v34, %v2520_v25  ;;  %v152_v39 = vadd.f32 1e-07, %v5119_v20  ;;  %s3491_s18 = spop %3490 }
 0x1f0   :  { %v2674_v44 = vadd.f32 %v2673_v0, %v2672_v13  ;;  %3572 = vpush %v2302_v41  ;;  %v2493_v53 = vadd.f32 %v2492_v16, %v2491_v22  ;;  %3624 = vrcp.f32 %v93_v56  ;;  %v2714_v8 = vrot.slane %v2713_v42, 1  ;;  %s5125_s19 = spop %3492 }
 0x1f1   :  { %3574 = vpush %v2339_v4  ;;  %3626 = vrcp.f32 %v127_v55  ;;  %v2896_v11 = vadd.f32 %v2895_v28, %v2894_v21  ;;  %v2580_v18 = vadd.f32 %v2579_v51, %v2578_v58  ;;  %v2953_v62 = vrot.slane %v2952_v30, 2  ;;  %s3495_s20 = spop %3494 }
 0x1f2   :  { %v2675_v63 = vrot.slane %v2674_v44, 2  ;;  %v2865_v47 = vpop.xlane.xlu1 %2864  ;;  %3576 = vpush %v5041_v49  ;;  %v2494_v23 = vrot.slane %v2493_v53, 1  ;;  %v2747_v49 = vrot.slane %v5062_v26, 1  ;;  %v5123_v37 = vstv %s3487_s16  ;;  %s3497_s21 = spop %3496 }
 0x1f3   :  { %v2866_v43 = vrot.slane %v2865_v47, 4  ;;  %3578 = vpush %v2397_v36  ;;  %v2772_v3 = vrot.slane %v2771_v12, 1  ;;  %3628 = vrcp.f32 %v152_v39  ;;  %v2715_v19 = vadd.f32 %v2714_v8, %v2713_v42  ;;  %s5132_s2 = spop %3498 }
 0x1f4   :  { %v2495_v29 = vadd.f32 %v2494_v23, %v2493_v53  ;;  %v2676_v60 = vadd.f32 %v2675_v63, %v2674_v44  ;;  %v2897_v45 = vrot.slane %v2896_v11, 1  ;;  %3630 = vrsqrt.f32 %v5123_v37 }
 0x1f5   :  { %v2867_v15 = vadd.f32 %v2866_v43, %v2865_v47  ;;  %v2748_v31 = vadd.f32 %v2747_v49, %v5062_v26  ;;  %v2954_v52 = vadd.f32 %v2953_v62, %v2952_v30  ;;  %v5129_v17 = vstv %s3489_s17  ;;  %s5136_s3 = spop %3500 }
 0x1f6   :  { %v2925_v32 = vpop.xlane.xlu1 %2924  ;;  %3580 = vpush %v2495_v29  ;;  %v2677_v10 = vrot.slane %v2676_v60, 1  ;;  %v2773_v22 = vadd.f32 %v2772_v3, %v2771_v12  ;;  %v2898_v38 = vadd.f32 %v2897_v45, %v2896_v11  ;;  %3632 = vrsqrt.f32 %v5129_v17  ;;  %s3503_s22 = spop %3502 }
 0x1f7   :  { %v2868_v6 = vrot.slane %v2867_v15, 2  ;;  %v2926_v50 = vrot.slane %v2925_v32, 4  ;;  %3582 = vpush %v2522_v40  ;;  %v5134_v13 = vstv %s3491_s18  ;;  %v2955_v48 = vrot.slane %v2954_v52, 1  ;;  %s3505_s23 = spop %3504 }
 0x1f8   :  { %3584 = vpush %v2555_v61  ;;  %v2678_v33 = vadd.f32 %v2677_v10, %v2676_v60  ;;  %v5138_v2 = vstv %s3495_s20  ;;  %vm92_vm9 = vcmp.gt.f32.partialorder %v5087_v14, 1.0  ;;  %vm126_vm10 = vcmp.gt.f32.partialorder %v5100_v24, 1.0  ;;  %s3507_s24 = spop %3506 }
 0x1f9   :  { %v2927_v27 = vadd.f32 %v2926_v50, %v2925_v32  ;;  %3586 = vpush %v2580_v18  ;;  %v2869_v59 = vadd.f32 %v2868_v6, %v2867_v15  ;;  %3634 = vrsqrt.f32 %v5134_v13  ;;  %v5143_v16 = vstv %s3497_s21  ;;  %s5158_s25 = spop %3508 }
 0x1fa   :  { %3588 = vpush %v2678_v33  ;;  %3636 = vrsqrt.f32 %v5138_v2  ;;  %v2956_v21 = vadd.f32 %v2955_v48, %v2954_v52  ;;  %v5146_v41 = vstv %s3503_s22  ;;  %vm151_vm11 = vcmp.gt.f32.partialorder %v5119_v20, 1.0  ;;  %s3511_s26 = spop %3510 }
 0x1fb   :  { %v2928_v9 = vrot.slane %v2927_v27, 2  ;;  %v2870_v1 = vrot.slane %v2869_v59, 1  ;;  %3590 = vpush %v2715_v19  ;;  %3638 = vrsqrt.f32 %v5143_v16  ;;  %v5151_v54 = vstv %s3505_s23  ;;  %s3513_s27 = spop %3512 }
 0x1fc   :  { %3592 = vpush %v2748_v31  ;;  %3640 = vrsqrt.f32 %v5146_v41  ;;  %v5154_v44 = vstv %s5132_s2  ;;  %v241_v34 = vstv %s5110_s15  ;;  %v5162_v55 = vstv %s3507_s24  ;;  %s3515_s28 = spop %3514 }
 0x1fd   :  { %v2871_v46 = vadd.f32 %v2870_v1, %v2869_v59  ;;  %v2929_v5 = vadd.f32 %v2928_v9, %v2927_v27  ;;  %3594 = vpush %v2773_v22  ;;  %v3625_v7 = vpop.eup %3624  ;;  %3642 = vrsqrt.f32 %v5151_v54  ;;  %vm271_vm12 = vcmp.eq.f32.partialorder %v5123_v37, inf }
 0x1fe   :  { %v3627_v25 = vpop.eup %3626  ;;  %v96_v4 = vsel %vm92_vm9, %v3625_v7, 1.0  ;;  %3644 = vrsqrt.f32 %v5154_v44  ;;  %v274_v42 = vand.u32 2147483648, %v5123_v37  ;;  %vm273_vm13 = vcmp.eq.f32.partialorder %v5123_v37, 0.0 }
 0x1ff   :  { %3596 = vpush %v2871_v46  ;;  %v2930_v26 = vrot.slane %v2929_v5, 1  ;;  %v130_v58 = vsel %vm126_vm10, %v3627_v25, 1.0  ;;  %3646 = vrsqrt.f32 %v5162_v55  ;;  %v5172_v61 = vstv %s3511_s26  ;;  %s5179_s29 = spop %3516 }
 0x200   :  { %3598 = vpush %v2898_v38  ;;  %v3629_v14 = vpop.eup %3628  ;;  %v131_v35 = vmul.f32 %v130_v58, %v96_v4  ;;  %vm304_vm14 = vcmp.eq.f32.partialorder %v5129_v17, inf  ;;  %v5177_v20 = vstv %s3513_s27  ;;  %vm306_vm15 = vcmp.eq.f32.partialorder %v5129_v17, 0.0  ;;  %s3519_s4 = spop %3518 }
 0x201   :  { %v2931_v0 = vadd.f32 %v2930_v26, %v2929_v5  ;;  %v3631_v24 = vpop.eup %3630  ;;  %v155_v57 = vsel %vm151_vm11, %v3629_v14, 1.0  ;;  %v307_v15 = vand.u32 2147483648, %v5129_v17  ;;  %3648 = vrsqrt.f32 %v5172_v61  ;;  %s3521_s5 = spop %3520 }
 0x202   :  { %v270_v53 = vmul.f32 %v3631_v24, %v5123_v37  ;;  %v156_v56 = vmul.f32 %v155_v57, %v131_v35  ;;  %vm329_vm0 = vcmp.eq.f32.partialorder %v5134_v13, inf  ;;  %v424_v39 = vstv %s5125_s19  ;;  %s3523_s30 = spop %3522 }
 0x203   :  { %3600 = vpush %v2931_v0  ;;  %v3633_v36 = vpop.eup %3632  ;;  %3650 = vrsqrt.f32 %v5177_v20  ;;  %v332_v8 = vand.u32 2147483648, %v5134_v13  ;;  %vm331_vm1 = vcmp.eq.f32.partialorder %v5134_v13, 0.0  ;;  %vm464_vm2 = vcmp.eq.f32.partialorder %v5138_v2, inf  ;;  %s5237_s9 = spop %3524 }
 0x204   :  { %3602 = vpush %v2956_v21  ;;  %v5165_v63 = vmul.f32 %v241_v34, %v156_v56  ;;  %v272_v28 = vsel %vm271_vm12, %v5123_v37, %v270_v53  ;;  %v303_v47 = vmul.f32 %v3633_v36, %v5129_v17  ;;  %vm466_vm3 = vcmp.eq.f32.partialorder %v5138_v2, 0.0  ;;  %s3527_s10 = spop %3526 }
 0x205   :  { %v5175_v51 = vsel %vm273_vm13, %v274_v42, %v272_v28  ;;  %v5200_v18 = vstv %s3515_s28  ;;  %v467_v37 = vand.u32 2147483648, %v5138_v2  ;;  %v5205_v27 = vstv %s3519_s4  ;;  %s3529_s11 = spop %3528 }
 0x206   :  { %v3635_v23 = vpop.eup %3634  ;;  %v243_v29 = vsub.f32 0.0, %v5165_v63  ;;  %v305_v49 = vsel %vm304_vm14, %v5129_v17, %v303_v47  ;;  %v277_v32 = vadd.f32 1e-07, %v5175_v51  ;;  %vm497_vm4 = vcmp.eq.f32.partialorder %v5143_v16, inf  ;;  %s3531_s12 = spop %3530 }
 0x207   :  { %v3637_v43 = vpop.eup %3636  ;;  %v328_v12 = vmul.f32 %v3635_v23, %v5134_v13  ;;  %v5193_v11 = vsel %vm306_vm15, %v307_v15, %v305_v49  ;;  %v5209_v19 = vstv %s3521_s5  ;;  %v500_v31 = vand.u32 2147483648, %v5143_v16 }
 0x208   :  { %v3639_v30 = vpop.eup %3638  ;;  %v463_v40 = vmul.f32 %v3637_v43, %v5138_v2  ;;  %3652 = vrcp.f32 %v277_v32  ;;  %v310_v59 = vadd.f32 1e-07, %v5193_v11  ;;  %vm647_vm5 = vcmp.eq.f32.partialorder %v5146_v41, inf }
 0x209   :  { %v3641_v60 = vpop.eup %3640  ;;  %v496_v6 = vmul.f32 %v3639_v30, %v5143_v16  ;;  %v330_v50 = vsel %vm329_vm0, %v5134_v13, %v328_v12  ;;  %3654 = vrsqrt.f32 %v5200_v18  ;;  %vm499_vm6 = vcmp.eq.f32.partialorder %v5143_v16, 0.0  ;;  %s5280_s13 = spop %3532 }
 0x20a   :  { %v3643_v10 = vpop.eup %3642  ;;  %v465_v62 = vsel %vm464_vm2, %v5138_v2, %v463_v40  ;;  %v646_v3 = vmul.f32 %v3641_v60, %v5146_v41  ;;  %v5213_v45 = vsel %vm331_vm1, %v332_v8, %v330_v50  ;;  %3656 = vrsqrt.f32 %v5205_v27  ;;  %s3535_s0 = spop %3534 }
 0x20b   :  { %v3645_v33 = vpop.eup %3644  ;;  %v498_v9 = vsel %vm497_vm4, %v5143_v16, %v496_v6  ;;  %v5220_v1 = vsel %vm466_vm3, %v467_v37, %v465_v62  ;;  %v679_v52 = vmul.f32 %v3643_v10, %v5151_v54  ;;  %3658 = vrsqrt.f32 %v5209_v19  ;;  %s3537_s1 = spop %3536 }
 0x20c   :  { %v521_v17 = vmul.f32 %v3645_v33, %v5154_v44  ;;  %v648_v22 = vsel %vm647_vm5, %v5146_v41, %v646_v3  ;;  %v3647_v46 = vpop.eup %3646  ;;  %3660 = vrcp.f32 %v310_v59  ;;  %v335_v5 = vadd.f32 1e-07, %v5213_v45  ;;  %s3539_s6 = spop %3538 }
 0x20d   :  { %v5230_v38 = vsel %vm499_vm6, %v500_v31, %v498_v9  ;;  %v650_v13 = vand.u32 2147483648, %v5146_v41  ;;  %vm522_vm7 = vcmp.eq.f32.partialorder %v5154_v44, inf  ;;  %v470_v26 = vadd.f32 1e-07, %v5220_v1  ;;  %s5357_s14 = spop %3540 }
 0x20e   :  { %vm649_vm8 = vcmp.eq.f32.partialorder %v5146_v41, 0.0  ;;  %vm680_vm9 = vcmp.eq.f32.partialorder %v5151_v54, inf  ;;  %v525_v48 = vand.u32 2147483648, %v5154_v44  ;;  %v683_v7 = vand.u32 2147483648, %v5151_v54  ;;  %v3649_v41 = vpop.eup %3648  ;;  %s3543_s7 = spop %3542 }
 0x20f   :  { %v681_v2 = vsel %vm680_vm9, %v5151_v54, %v679_v52  ;;  %v5242_v25 = vsel %vm649_vm8, %v650_v13, %v648_v22  ;;  %v503_v16 = vadd.f32 1e-07, %v5230_v38  ;;  %v523_v0 = vsel %vm522_vm7, %v5154_v44, %v521_v17  ;;  %s3545_s15 = spop %3544 }
 0x210   :  { %v704_v21 = vmul.f32 %v3647_v46, %v5162_v55  ;;  %v5247_v4 = vstv %s3523_s30  ;;  %3662 = vrcp.f32 %v335_v5  ;;  %vm524_vm10 = vcmp.eq.f32.partialorder %v5154_v44, 0.0  ;;  %v3651_v14 = vpop.eup %3650  ;;  %s3547_s16 = spop %3546 }
 0x211   :  { %v617_v58 = vstv %s5136_s3  ;;  %vm682_vm11 = vcmp.eq.f32.partialorder %v5151_v54, 0.0  ;;  %3664 = vrcp.f32 %v470_v26  ;;  %vm705_vm12 = vcmp.eq.f32.partialorder %v5162_v55, inf }
 0x212   :  { %v653_v24 = vadd.f32 1e-07, %v5242_v25  ;;  %v5254_v35 = vsel %vm682_vm11, %v683_v7, %v681_v2  ;;  %v5256_v57 = vsel %vm524_vm10, %v525_v48, %v523_v0  ;;  %v708_v53 = vand.u32 2147483648, %v5162_v55 }
 0x213   :  { %vm707_vm13 = vcmp.eq.f32.partialorder %v5162_v55, 0.0  ;;  %3666 = vrsqrt.f32 %v5247_v4  ;;  %v706_v54 = vsel %vm705_vm12, %v5162_v55, %v704_v21  ;;  %v839_v44 = vmul.f32 %v3649_v41, %v5172_v61  ;;  %s5420_s17 = spop %3548 }
 0x214   :  { %3668 = vrcp.f32 %v503_v16  ;;  %v5263_v36 = vstv %s3527_s10  ;;  %v686_v34 = vadd.f32 1e-07, %v5254_v35  ;;  %v800_v56 = vstv %s5158_s25  ;;  %s3551_s18 = spop %3550 }
 0x215   :  { %v872_v28 = vmul.f32 %v3651_v14, %v5177_v20  ;;  %v5268_v47 = vstv %s3529_s11  ;;  %v3653_v23 = vpop.eup %3652  ;;  %vm276_vm14 = vcmp.gt.f32.partialorder %v5175_v51, 1.0  ;;  %vm309_vm15 = vcmp.gt.f32.partialorder %v5193_v11, 1.0  ;;  %s3553_s19 = spop %3552 }
 0x216   :  { %v528_v42 = vadd.f32 1e-07, %v5256_v57  ;;  %3670 = vrcp.f32 %v653_v24  ;;  %v3655_v43 = vpop.eup %3654  ;;  %v5275_v30 = vsel %vm707_vm13, %v708_v53, %v706_v54  ;;  %vm840_vm0 = vcmp.eq.f32.partialorder %v5172_v61, inf  ;;  %s3555_s20 = spop %3554 }
 0x217   :  { %vm842_vm1 = vcmp.eq.f32.partialorder %v5172_v61, 0.0  ;;  %3672 = vrsqrt.f32 %v5263_v36  ;;  %v3657_v49 = vpop.eup %3656  ;;  %v841_v12 = vsel %vm840_vm0, %v5172_v61, %v839_v44  ;;  %v843_v15 = vand.u32 2147483648, %v5172_v61  ;;  %s5446_s21 = spop %3556 }
 0x218   :  { %vm873_vm2 = vcmp.eq.f32.partialorder %v5177_v20, inf  ;;  %3674 = vrsqrt.f32 %v5268_v47  ;;  %v3659_v55 = vpop.eup %3658  ;;  %v876_v60 = vand.u32 2147483648, %v5177_v20  ;;  %v993_v32 = vstv %s5179_s29  ;;  %s5459_s2 = spop %3558 }
 0x219   :  { %3676 = vrcp.f32 %v686_v34  ;;  %v874_v40 = vsel %vm873_vm2, %v5177_v20, %v872_v28  ;;  %v3661_v8 = vpop.eup %3660  ;;  %vm334_vm3 = vcmp.gt.f32.partialorder %v5213_v45, 1.0  ;;  %v711_v6 = vadd.f32 1e-07, %v5275_v30  ;;  %s3561_s3 = spop %3560 }
 0x21a   :  { %3678 = vrcp.f32 %v528_v42  ;;  %v897_v50 = vmul.f32 %v3655_v43, %v5200_v18  ;;  %v5292_v10 = vstv %s3531_s12  ;;  %vm469_vm4 = vcmp.gt.f32.partialorder %v5220_v1, 1.0  ;;  %s5479_s22 = spop %3562 }
 0x21b   :  { %vm875_vm5 = vcmp.eq.f32.partialorder %v5177_v20, 0.0  ;;  %vm898_vm6 = vcmp.eq.f32.partialorder %v5200_v18, inf  ;;  %v5299_v62 = vsel %vm842_vm1, %v843_v15, %v841_v12  ;;  %v1022_v37 = vmul.f32 %v3657_v49, %v5205_v27 }
 0x21c   :  { %v901_v3 = vand.u32 2147483648, %v5200_v18  ;;  %v5303_v33 = vsel %vm875_vm5, %v876_v60, %v874_v40  ;;  %v1055_v59 = vmul.f32 %v3659_v55, %v5209_v19  ;;  %v5306_v9 = vstv %s3535_s0 }
 0x21d   :  { %v280_v20 = vsel %vm276_vm14, %v3653_v23, 1.0  ;;  %v313_v31 = vsel %vm309_vm15, %v3661_v8, 1.0  ;;  %vm1023_vm7 = vcmp.eq.f32.partialorder %v5205_v27, inf  ;;  %3680 = vrsqrt.f32 %v5292_v10  ;;  %v3663_v61 = vpop.eup %3662  ;;  %s5484_s23 = spop %3564 }
 0x21e   :  { %3682 = vrcp.f32 %v711_v6  ;;  %v846_v52 = vadd.f32 1e-07, %v5299_v62  ;;  %v899_v17 = vsel %vm898_vm6, %v5200_v18, %v897_v50  ;;  %v5316_v22 = vstv %s3537_s1  ;;  %v3665_v46 = vpop.eup %3664  ;;  %s3567_s24 = spop %3566 }
 0x21f   :  { %v879_v5 = vadd.f32 1e-07, %v5303_v33  ;;  %v1024_v51 = vsel %vm1023_vm7, %v5205_v27, %v1022_v37  ;;  %vm1056_vm8 = vcmp.eq.f32.partialorder %v5209_v19, inf  ;;  %3684 = vrsqrt.f32 %v5306_v9  ;;  %s3569_s25 = spop %3568 }
 0x220   :  { %v3667_v11 = vpop.eup %3666  ;;  %vm900_vm9 = vcmp.eq.f32.partialorder %v5200_v18, 0.0  ;;  %vm1025_vm10 = vcmp.eq.f32.partialorder %v5205_v27, 0.0  ;;  %v1026_v13 = vand.u32 2147483648, %v5205_v27  ;;  %v1057_v26 = vsel %vm1056_vm8, %v5209_v19, %v1055_v59  ;;  %s5518_s26 = spop %3570 }
 0x221   :  { %v3669_v48 = vpop.eup %3668  ;;  %v314_v2 = vmul.f32 %v313_v31, %v280_v20  ;;  %v5326_v7 = vsel %vm900_vm9, %v901_v3, %v899_v17  ;;  %v1059_v16 = vand.u32 2147483648, %v5209_v19  ;;  %3686 = vrsqrt.f32 %v5316_v22  ;;  %s5528_s27 = spop %3572 }
 0x222   :  { %vm502_vm11 = vcmp.gt.f32.partialorder %v5230_v38, 1.0  ;;  %3688 = vrcp.f32 %v846_v52  ;;  %vm1058_vm12 = vcmp.eq.f32.partialorder %v5209_v19, 0.0  ;;  %v5332_v18 = vsel %vm1025_vm10, %v1026_v13, %v1024_v51  ;;  %s3575_s28 = spop %3574 }
 0x223   :  { %v3671_v0 = vpop.eup %3670  ;;  %v338_v27 = vsel %vm334_vm3, %v3663_v61, 1.0  ;;  %3690 = vrcp.f32 %v879_v5  ;;  %v1080_v21 = vmul.f32 %v3667_v11, %v5247_v4  ;;  %v5337_v41 = vsel %vm1058_vm12, %v1059_v16, %v1057_v26  ;;  %s5547_s29 = spop %3576 }
 0x224   :  { %v3673_v14 = vpop.eup %3672  ;;  %v473_v24 = vsel %vm469_vm4, %v3665_v46, 1.0  ;;  %v506_v53 = vsel %vm502_vm11, %v3669_v48, 1.0  ;;  %v904_v38 = vadd.f32 1e-07, %v5326_v7  ;;  %v5342_v54 = vstv %s3539_s6  ;;  %s5561_s4 = spop %3578 }
 0x225   :  { %v3675_v19 = vpop.eup %3674  ;;  %v339_v44 = vmul.f32 %v338_v27, %v314_v2  ;;  %vm527_vm13 = vcmp.gt.f32.partialorder %v5256_v57, 1.0  ;;  %vm652_vm14 = vcmp.gt.f32.partialorder %v5242_v25, 1.0  ;;  %v1029_v45 = vadd.f32 1e-07, %v5332_v18 }
 0x226   :  { %v3677_v34 = vpop.eup %3676  ;;  %vm685_vm15 = vcmp.gt.f32.partialorder %v5254_v35, 1.0  ;;  %vm710_vm0 = vcmp.gt.f32.partialorder %v5275_v30, 1.0  ;;  %vm1081_vm1 = vcmp.eq.f32.partialorder %v5247_v4, inf  ;;  %v1062_v1 = vadd.f32 1e-07, %v5337_v41 }
 0x227   :  { %v3679_v28 = vpop.eup %3678  ;;  %v507_v23 = vmul.f32 %v506_v53, %v473_v24  ;;  %v1082_v42 = vsel %vm1081_vm1, %v5247_v4, %v1080_v21  ;;  %v1215_v43 = vmul.f32 %v3673_v14, %v5263_v36  ;;  %3692 = vrsqrt.f32 %v5342_v54  ;;  %s5569_s5 = spop %3580 }
 0x228   :  { %3694 = vrcp.f32 %v904_v38  ;;  %v1084_v49 = vand.u32 2147483648, %v5247_v4  ;;  %vm1083_vm2 = vcmp.eq.f32.partialorder %v5247_v4, 0.0  ;;  %v1248_v12 = vmul.f32 %v3675_v19, %v5268_v47  ;;  %s3583_s30 = spop %3582 }
 0x229   :  { %v5361_v15 = vmul.f32 %v424_v39, %v339_v44  ;;  %v656_v55 = vsel %vm652_vm14, %v3671_v0, 1.0  ;;  %v689_v40 = vsel %vm685_vm15, %v3677_v34, 1.0  ;;  %3696 = vrcp.f32 %v1029_v45 }
 0x22a   :  { %v3681_v60 = vpop.eup %3680  ;;  %v531_v8 = vsel %vm527_vm13, %v3679_v28, 1.0  ;;  %3698 = vrcp.f32 %v1062_v1  ;;  %v5369_v4 = vsel %vm1083_vm2, %v1084_v49, %v1082_v42  ;;  %vm1216_vm3 = vcmp.eq.f32.partialorder %v5263_v36, inf }
 0x22b   :  { %v3683_v6 = vpop.eup %3682  ;;  %v532_v39 = vmul.f32 %v531_v8, %v507_v23  ;;  %vm845_vm4 = vcmp.gt.f32.partialorder %v5299_v62, 1.0  ;;  %v1217_v25 = vsel %vm1216_vm3, %v5263_v36, %v1215_v43  ;;  %vm1249_vm5 = vcmp.eq.f32.partialorder %v5268_v47, inf }
 0x22c   :  { %v3685_v35 = vpop.eup %3684  ;;  %v690_v50 = vmul.f32 %v689_v40, %v656_v55  ;;  %vm1218_vm6 = vcmp.eq.f32.partialorder %v5263_v36, 0.0  ;;  %v1219_v57 = vand.u32 2147483648, %v5263_v36  ;;  %v1250_v37 = vsel %vm1249_vm5, %v5268_v47, %v1248_v12 }
 0x22d   :  { %v1087_v3 = vadd.f32 1e-07, %v5369_v4  ;;  %v1252_v59 = vand.u32 2147483648, %v5268_v47  ;;  %v1273_v20 = vmul.f32 %v3681_v60, %v5292_v10  ;;  %v5381_v31 = vstv %s3543_s7 }
 0x22e   :  { %v3687_v61 = vpop.eup %3686  ;;  %v426_v52 = vsub.f32 0.0, %v5361_v15  ;;  %vm878_vm7 = vcmp.gt.f32.partialorder %v5303_v33, 1.0  ;;  %vm1251_vm8 = vcmp.eq.f32.partialorder %v5268_v47, 0.0  ;;  %v5386_v36 = vsel %vm1218_vm6, %v1219_v57, %v1217_v25 }
 0x22f   :  { %v3689_v17 = vpop.eup %3688  ;;  %v714_v46 = vsel %vm710_vm0, %v3683_v6, 1.0  ;;  %v5390_v5 = vsel %vm1251_vm8, %v1252_v59, %v1250_v37  ;;  %v1398_v51 = vmul.f32 %v3685_v35, %v5306_v9  ;;  %v5393_v11 = vstv %s3545_s15 }
 0x230   :  { %v3691_v13 = vpop.eup %3690  ;;  %v5397_v26 = vmul.f32 %v617_v58, %v532_v39  ;;  %v715_v48 = vmul.f32 %v714_v46, %v690_v50  ;;  %vm1274_vm9 = vcmp.eq.f32.partialorder %v5292_v10, inf  ;;  %3700 = vrsqrt.f32 %v5381_v31 }
 0x231   :  { %3702 = vrcp.f32 %v1087_v3  ;;  %v1222_v47 = vadd.f32 1e-07, %v5386_v36  ;;  %v1275_v30 = vsel %vm1274_vm9, %v5292_v10, %v1273_v20  ;;  %v1431_v2 = vmul.f32 %v3687_v61, %v5316_v22 }
 0x232   :  { %v1277_v16 = vand.u32 2147483648, %v5292_v10  ;;  %v1255_v0 = vadd.f32 1e-07, %v5390_v5  ;;  %vm1399_vm10 = vcmp.eq.f32.partialorder %v5306_v9, inf  ;;  %3704 = vrsqrt.f32 %v5393_v11 }
 0x233   :  { %v849_v58 = vsel %vm845_vm4, %v3689_v17, 1.0  ;;  %v882_v27 = vsel %vm878_vm7, %v3691_v13, 1.0  ;;  %vm1276_vm11 = vcmp.eq.f32.partialorder %v5292_v10, 0.0  ;;  %v1400_v21 = vsel %vm1399_vm10, %v5306_v9, %v1398_v51 }
 0x234   :  { %v3693_v14 = vpop.eup %3692  ;;  %v5414_v24 = vsel %vm1276_vm11, %v1277_v16, %v1275_v30  ;;  %v1402_v53 = vand.u32 2147483648, %v5306_v9  ;;  %vm1432_vm12 = vcmp.eq.f32.partialorder %v5316_v22, inf  ;;  %v5418_v38 = vstv %s3547_s16  ;;  %s3939_s16 = smov [#allocation12]  }
 0x235   :  { %v3695_v62 = vpop.eup %3694  ;;  %v801_v19 = vmul.f32 %v800_v56, %v715_v48  ;;  %3706 = vrcp.f32 %v1222_v47  ;;  %vm1401_vm13 = vcmp.eq.f32.partialorder %v5306_v9, 0.0  ;;  %v1433_v10 = vsel %vm1432_vm12, %v5316_v22, %v1431_v2 }
 0x236   :  { %v3697_v33 = vpop.eup %3696  ;;  %v883_v44 = vmul.f32 %v882_v27, %v849_v58  ;;  %3708 = vrcp.f32 %v1255_v0  ;;  %v1435_v45 = vand.u32 2147483648, %v5316_v22  ;;  %v5427_v34 = vsel %vm1401_vm13, %v1402_v53, %v1400_v21 }
 0x237   :  { %v3699_v1 = vpop.eup %3698  ;;  %v1280_v28 = vadd.f32 1e-07, %v5414_v24  ;;  %vm1434_vm14 = vcmp.eq.f32.partialorder %v5316_v22, 0.0  ;;  %v1456_v56 = vmul.f32 %v3693_v14, %v5342_v54  ;;  %3710 = vrsqrt.f32 %v5418_v38 }
 0x238   :  { %vm903_vm15 = vcmp.gt.f32.partialorder %v5326_v7, 1.0  ;;  %vm1028_vm0 = vcmp.gt.f32.partialorder %v5332_v18, 1.0  ;;  %vm1061_vm1 = vcmp.gt.f32.partialorder %v5337_v41, 1.0  ;;  %v5436_v9 = vsel %vm1434_vm14, %v1435_v45, %v1433_v10  ;;  %v3048_v7 = vpop.xlane.xlu1 %3047 }
 0x239   :  { %v802_v23 = vsub.f32 0.0, %v801_v19  ;;  %v907_v42 = vsel %vm903_vm15, %v3695_v62, 1.0  ;;  %v1405_v43 = vadd.f32 1e-07, %v5427_v34  ;;  %v5439_v49 = vstv %s3551_s18 }
 0x23a   :  { %v908_v22 = vmul.f32 %v907_v42, %v883_v44  ;;  %v1032_v12 = vsel %vm1028_vm0, %v3697_v33, 1.0  ;;  %v1065_v55 = vsel %vm1061_vm1, %v3699_v1, 1.0  ;;  %vm1457_vm2 = vcmp.eq.f32.partialorder %v5342_v54, inf }
 0x23b   :  { %3712 = vrcp.f32 %v1280_v28  ;;  %v1438_v18 = vadd.f32 1e-07, %v5436_v9  ;;  %v1458_v41 = vsel %vm1457_vm2, %v5342_v54, %v1456_v56  ;;  %v5444_v40 = vstv %s3553_s19 }
 0x23c   :  { %v5452_v60 = vsub.f32 %v243_v29, %v426_v52  ;;  %v1176_v8 = vstv %s5237_s9  ;;  %v1460_v6 = vand.u32 2147483648, %v5342_v54  ;;  %3714 = vrsqrt.f32 %v5439_v49  ;;  %s3585_s9 = spop %3584 }
 0x23d   :  { %v3701_v39 = vpop.eup %3700  ;;  %v619_v25 = vsub.f32 0.0, %v5397_v26  ;;  %3716 = vrcp.f32 %v1405_v43  ;;  %vm1459_vm3 = vcmp.eq.f32.partialorder %v5342_v54, 0.0  ;;  %v3049_v35 = vrot.slane %v3048_v7, 4  ;;  %s3587_s10 = spop %3586 }
 0x23e   :  { %v3703_v15 = vpop.eup %3702  ;;  %v1066_v63 = vmul.f32 %v1065_v55, %v1032_v12  ;;  %v1369_v29 = vstv %s5280_s13  ;;  %v5462_v50 = vsel %vm1459_vm3, %v1460_v6, %v1458_v41  ;;  %3718 = vrsqrt.f32 %v5444_v40  ;;  %s5645_s11 = spop %3588 }
 0x23f   :  { %v3705_v57 = vpop.eup %3704  ;;  %v5465_v37 = vsub.f32 %v619_v25, %v802_v23  ;;  %v5469_v3 = vmul.f32 %v993_v32, %v908_v22  ;;  %vm1086_vm4 = vcmp.gt.f32.partialorder %v5369_v4, 1.0  ;;  %3720 = vrcp.f32 %v1438_v18  ;;  %s3591_s12 = spop %3590 }
 0x240   :  { %vm1221_vm5 = vcmp.gt.f32.partialorder %v5386_v36, 1.0  ;;  %v1552_v54 = vstv %s5357_s14  ;;  %v1591_v59 = vmul.f32 %v3701_v39, %v5381_v31  ;;  %v5475_v20 = vstv %s3555_s20  ;;  %s3593_s13 = spop %3592 }
 0x241   :  { %v1090_v61 = vsel %vm1086_vm4, %v3703_v15, 1.0  ;;  %vm1254_vm6 = vcmp.gt.f32.partialorder %v5390_v5, 1.0  ;;  %v1463_v52 = vadd.f32 1e-07, %v5462_v50  ;;  %v3050_v17 = vadd.f32 %v3049_v35, %v3048_v7  ;;  %s3595_s0 = spop %3594 }
 0x242   :  { %v3707_v32 = vpop.eup %3706  ;;  %v1091_v4 = vmul.f32 %v1090_v61, %v1066_v63  ;;  %vm1592_vm7 = vcmp.eq.f32.partialorder %v5381_v31, inf  ;;  %vm1594_vm8 = vcmp.eq.f32.partialorder %v5381_v31, 0.0  ;;  %v1624_v46 = vmul.f32 %v3705_v57, %v5393_v11  ;;  %s5707_s1 = spop %3596 }
 0x243   :  { %v3709_v51 = vpop.eup %3708  ;;  %v995_v13 = vsub.f32 0.0, %v5469_v3  ;;  %v1595_v26 = vand.u32 2147483648, %v5381_v31  ;;  %3722 = vrsqrt.f32 %v5475_v20  ;;  %v5490_v48 = vstv %s5459_s2  ;;  %s3599_s6 = spop %3598 }
 0x244   :  { %v3711_v47 = vpop.eup %3710  ;;  %vm1279_vm9 = vcmp.gt.f32.partialorder %v5414_v24, 1.0  ;;  %v1593_v30 = vsel %vm1592_vm7, %v5381_v31, %v1591_v59  ;;  %vm1625_vm10 = vcmp.eq.f32.partialorder %v5393_v11, inf  ;;  %vm1627_vm11 = vcmp.eq.f32.partialorder %v5393_v11, 0.0  ;;  %s3601_s14 = spop %3600 }
 0x245   :  { %v5496_v2 = vstv %s3561_s3  ;;  %3724 = vrcp.f32 %v1463_v52  ;;  %v1628_v16 = vand.u32 2147483648, %v5393_v11  ;;  %vm1650_vm12 = vcmp.eq.f32.partialorder %v5418_v38, inf  ;;  %s3603_s7 = spop %3602 }
 0x246   :  { %v3051_v0 = vrot.slane %v3050_v17, 2  ;;  %v1177_v58 = vmul.f32 %v1176_v8, %v1091_v4  ;;  %v1225_v27 = vsel %vm1221_vm5, %v3707_v32, 1.0  ;;  %v1626_v21 = vsel %vm1625_vm10, %v5393_v11, %v1624_v46 }
 0x247   :  { %3726 = vrsqrt.f32 %v5490_v48  ;;  %v1258_v14 = vsel %vm1254_vm6, %v3709_v51, 1.0  ;;  %v1649_v53 = vmul.f32 %v3711_v47, %v5418_v38  ;;  %v5509_v62 = vsel %vm1594_vm8, %v1595_v26, %v1593_v30 }
 0x248   :  { %3728 = vrsqrt.f32 %v5496_v2  ;;  %v3713_v19 = vpop.eup %3712  ;;  %vm1404_vm13 = vcmp.gt.f32.partialorder %v5427_v34, 1.0  ;;  %v1653_v36 = vand.u32 2147483648, %v5418_v38  ;;  %vm1652_vm14 = vcmp.eq.f32.partialorder %v5418_v38, 0.0 }
 0x249   :  { %v5516_v10 = vstv %s5479_s22  ;;  %v3715_v5 = vpop.eup %3714  ;;  %vm1437_vm15 = vcmp.gt.f32.partialorder %v5436_v9, 1.0  ;;  %v5523_v31 = vsel %vm1627_vm11, %v1628_v16, %v1626_v21  ;;  %v1745_v33 = vstv %s5420_s17  ;;  %s3075_s17 = sshll.u32 %s3939_s16, 4  ;;  %s3076_s17 = int_to_ptr.vmem [resolvable:$true] %s3075_s17 }
 0x24a   :  { %v5526_v44 = vstv %s3567_s24  ;;  %v3717_v45 = vpop.eup %3716  ;;  %v1259_v1 = vmul.f32 %v1258_v14, %v1225_v27  ;;  %v1598_v28 = vadd.f32 1e-07, %v5509_v62  ;;  %vm1775_vm0 = vcmp.eq.f32.partialorder %v5439_v49, inf  ;;  %s3902_s18 = scalar_lea.vmem %s3076_s17, 16  ;;  %s3906_s19 = scalar_lea.vmem %s3076_s17, 32 }
 0x24b   :  { %v5532_v56 = vstv %s3569_s25  ;;  %v3719_v23 = vpop.eup %3718  ;;  %v1178_v42 = vsub.f32 0.0, %v1177_v58  ;;  %v3052_v43 = vadd.f32 %v3051_v0, %v3050_v17  ;;  %v1651_v11 = vsel %vm1650_vm12, %v5418_v38, %v1649_v53  ;;  %p3903_p7 = scmp.ne.s32.totalorder %s3076_s17, %s3902_s18  ;;  %p3907_p8 = scmp.lt.s32.totalorder %s3076_s17, %s3076_s17 }
 0x24c   :  { %3730 = vrsqrt.f32 %v5516_v10  ;;  %v3721_v22 = vpop.eup %3720  ;;  %v1631_v12 = vadd.f32 1e-07, %v5523_v31  ;;  %v1774_v55 = vmul.f32 %v3715_v5, %v5439_v49  ;;  %vm1777_vm1 = vcmp.eq.f32.partialorder %v5439_v49, 0.0  ;;  %p3908_p9 = scmp.lt.s32.totalorder %s3906_s19, %s3902_s18 }
 0x24d   :  { %3732 = vrsqrt.f32 %v5526_v44  ;;  %v1283_v7 = vsel %vm1279_vm9, %v3713_v19, 1.0  ;;  %vm1462_vm2 = vcmp.gt.f32.partialorder %v5462_v50, 1.0  ;;  %v1778_v18 = vand.u32 2147483648, %v5439_v49 }
 0x24e   :  { %3734 = vrsqrt.f32 %v5532_v56  ;;  %v1284_v41 = vmul.f32 %v1283_v7, %v1259_v1  ;;  %v5551_v8 = vsel %vm1652_vm14, %v1653_v36, %v1651_v11  ;;  %v1807_v6 = vmul.f32 %v3719_v23, %v5444_v40  ;;  %p3909_p10 = por %p3908_p9, %p3907_p8 }
 0x24f   :  { %3736 = vrcp.f32 %v1598_v28  ;;  %v5554_v39 = vsub.f32 %v995_v13, %v1178_v42  ;;  %v1408_v24 = vsel %vm1404_vm13, %v3717_v45, 1.0  ;;  %v1441_v25 = vsel %vm1437_vm15, %v3721_v22, 1.0 }
 0x250   :  { %vm1808_vm3 = vcmp.eq.f32.partialorder %v5444_v40, inf  ;;  %v3723_v35 = vpop.eup %3722  ;;  %3738 = vrcp.f32 %v1631_v12  ;;  %v1776_v38 = vsel %vm1775_vm0, %v5439_v49, %v1774_v55  ;;  %vm1810_vm4 = vcmp.eq.f32.partialorder %v5444_v40, 0.0  ;;  %p3910_p11 = pnand %p3909_p10, %p3903_p7 }
 0x251   :  { %v5567_v15 = vstv %s3575_s28  ;;  %v1656_v34 = vadd.f32 1e-07, %v5551_v8  ;;  %v1811_v9 = vand.u32 2147483648, %v5444_v40  ;;  %vm1833_vm5 = vcmp.eq.f32.partialorder %v5475_v20, inf }
 0x252   :  { %v1836_v63 = vand.u32 2147483648, %v5475_v20  ;;  %v3725_v57 = vpop.eup %3724  ;;  %v5577_v3 = vmul.f32 %v1369_v29, %v1284_v41  ;;  %v1442_v59 = vmul.f32 %v1441_v25, %v1408_v24  ;;  %v1809_v61 = vsel %vm1808_vm3, %v5444_v40, %v1807_v6 }
 0x253   :  { %vm1835_vm6 = vcmp.eq.f32.partialorder %v5475_v20, 0.0  ;;  %v1832_v17 = vmul.f32 %v3723_v35, %v5475_v20  ;;  %v5584_v32 = vsel %vm1777_vm1, %v1778_v18, %v1776_v38  ;;  %v5587_v4 = vstv %s5518_s26 }
 0x254   :  { %v3727_v52 = vpop.eup %3726  ;;  %3740 = vrsqrt.f32 %v5567_v15  ;;  %vm1968_vm7 = vcmp.eq.f32.partialorder %v5490_v48, inf  ;;  %vm1970_vm8 = vcmp.eq.f32.partialorder %v5490_v48, 0.0  ;;  %v5593_v29 = vstv %s5547_s29 }
 0x255   :  { %v3729_v46 = vpop.eup %3728  ;;  %v3053_v51 = vrot.slane %v3052_v43, 1  ;;  %v1466_v13 = vsel %vm1462_vm2, %v3725_v57, 1.0  ;;  %vm1597_vm9 = vcmp.gt.f32.partialorder %v5509_v62, 1.0  ;;  %3742 = vrcp.f32 %v1656_v34 }
 0x256   :  { %v5600_v49 = vsel %vm1810_vm4, %v1811_v9, %v1809_v61  ;;  %v5602_v26 = vstv %s3583_s30  ;;  %v1781_v47 = vadd.f32 1e-07, %v5584_v32  ;;  %v1967_v30 = vmul.f32 %v3727_v52, %v5490_v48 }
 0x257   :  { %3744 = vrsqrt.f32 %v5587_v4  ;;  %v3054_v16 = vadd.f32 %v3053_v51, %v3052_v43  ;;  %v1467_v0 = vmul.f32 %v1466_v13, %v1442_v59  ;;  %vm1630_vm10 = vcmp.gt.f32.partialorder %v5523_v31, 1.0 }
 0x258   :  { %v1834_v50 = vsel %vm1833_vm5, %v5475_v20, %v1832_v17  ;;  %v2000_v40 = vmul.f32 %v3729_v46, %v5496_v2  ;;  %3746 = vrsqrt.f32 %v5593_v29  ;;  %v1814_v27 = vadd.f32 1e-07, %v5600_v49 }
 0x259   :  { %v3731_v58 = vpop.eup %3730  ;;  %v1971_v21 = vand.u32 2147483648, %v5490_v48  ;;  %vm2001_vm11 = vcmp.eq.f32.partialorder %v5496_v2, inf  ;;  %3604 = vpush %v3054_v16  ;;  %3748 = vrsqrt.f32 %v5602_v26  ;;  %vm2003_vm12 = vcmp.eq.f32.partialorder %v5496_v2, 0.0 }
 0x25a   :  { %v3733_v14 = vpop.eup %3732  ;;  %v2004_v53 = vand.u32 2147483648, %v5496_v2  ;;  %vm2026_vm13 = vcmp.eq.f32.partialorder %v5516_v10, inf  ;;  %v2029_v19 = vand.u32 2147483648, %v5516_v10  ;;  %v5623_v5 = vsel %vm1835_vm6, %v1836_v63, %v1834_v50 }
 0x25b   :  { %v3735_v36 = vpop.eup %3734  ;;  %v1969_v45 = vsel %vm1968_vm7, %v5490_v48, %v1967_v30  ;;  %vm2028_vm14 = vcmp.eq.f32.partialorder %v5516_v10, 0.0  ;;  %v5630_v1 = vstv %s5561_s4  ;;  %v5634_v23 = vmul.f32 %v1552_v54, %v1467_v0 }
 0x25c   :  { %v3737_v28 = vpop.eup %3736  ;;  %3750 = vrcp.f32 %v1781_v47  ;;  %v2002_v42 = vsel %vm2001_vm11, %v5496_v2, %v2000_v40  ;;  %v2025_v20 = vmul.f32 %v3731_v58, %v5516_v10  ;;  %v2150_v43 = vmul.f32 %v3733_v14, %v5526_v44 }
 0x25d   :  { %3752 = vrcp.f32 %v1814_v27  ;;  %v5641_v11 = vstv %s3585_s9  ;;  %v5643_v22 = vstv %s3587_s10  ;;  %v3739_v12 = vpop.eup %3738  ;;  %v1839_v54 = vadd.f32 1e-07, %v5623_v5 }
 0x25e   :  { %v5650_v55 = vsel %vm1970_vm8, %v1971_v21, %v1969_v45  ;;  %v2183_v7 = vmul.f32 %v3735_v36, %v5532_v56  ;;  %3754 = vrsqrt.f32 %v5630_v1  ;;  %v1601_v18 = vsel %vm1597_vm9, %v3737_v28, 1.0 }
 0x25f   :  { %v5658_v41 = vsel %vm2003_vm12, %v2004_v53, %v2002_v42  ;;  %vm2151_vm15 = vcmp.eq.f32.partialorder %v5526_v44, inf  ;;  %3756 = vrsqrt.f32 %v5641_v11  ;;  %v2027_v48 = vsel %vm2026_vm13, %v5516_v10, %v2025_v20 }
 0x260   :  { %vm2153_vm0 = vcmp.eq.f32.partialorder %v5526_v44, 0.0  ;;  %v2154_v6 = vand.u32 2147483648, %v5526_v44  ;;  %3758 = vrsqrt.f32 %v5643_v22  ;;  %v1634_v2 = vsel %vm1630_vm10, %v3739_v12, 1.0 }
 0x261   :  { %v3741_v62 = vpop.eup %3740  ;;  %v1974_v24 = vadd.f32 1e-07, %v5650_v55  ;;  %v2152_v25 = vsel %vm2151_vm15, %v5526_v44, %v2150_v43  ;;  %vm2184_vm1 = vcmp.eq.f32.partialorder %v5532_v56, inf  ;;  %3760 = vrcp.f32 %v1839_v54 }
 0x262   :  { %v2007_v35 = vadd.f32 1e-07, %v5658_v41  ;;  %v2185_v38 = vsel %vm2184_vm1, %v5532_v56, %v2183_v7  ;;  %v5675_v34 = vstv %s3591_s12  ;;  %v5677_v9 = vpop.eup %3742  ;;  %v5681_v63 = vsel %vm2028_vm14, %v2029_v19, %v2027_v48 }
 0x263   :  { %vm2186_vm2 = vcmp.eq.f32.partialorder %v5532_v56, 0.0  ;;  %v2187_v31 = vand.u32 2147483648, %v5532_v56  ;;  %3762 = vrsqrt.f32 %v5675_v34  ;;  %v5686_v59 = vmul.f32 %v1634_v2, %v1601_v18 }
 0x264   :  { %v3745_v57 = vpop.eup %3744  ;;  %vm2209_vm3 = vcmp.eq.f32.partialorder %v5587_v4, inf  ;;  %v5691_v61 = vsel %vm2153_vm0, %v2154_v6, %v2152_v25  ;;  %v2343_v52 = vmul.f32 %v3741_v62, %v5567_v15  ;;  %3764 = vrcp.f32 %v1974_v24 }
 0x265   :  { %v3747_v10 = vpop.eup %3746  ;;  %v2212_v17 = vand.u32 2147483648, %v5587_v4  ;;  %v5695_v46 = vsel %vm2186_vm2, %v2187_v31, %v2185_v38  ;;  %vm2344_vm4 = vcmp.eq.f32.partialorder %v5567_v15, inf  ;;  %3766 = vrcp.f32 %v2007_v35 }
 0x266   :  { %v3749_v56 = vpop.eup %3748  ;;  %v5699_v51 = vadd.f32 1e-07, %v5681_v63  ;;  %vm2346_vm5 = vcmp.eq.f32.partialorder %v5567_v15, 0.0  ;;  %v2347_v44 = vand.u32 2147483648, %v5567_v15  ;;  %v2208_v13 = vmul.f32 %v3745_v57, %v5587_v4 }
 0x267   :  { %v2157_v47 = vadd.f32 1e-07, %v5691_v61  ;;  %vm2377_vm6 = vcmp.eq.f32.partialorder %v5593_v29, inf  ;;  %v2526_v30 = vmul.f32 %v3749_v56, %v5602_v26  ;;  %v2190_v16 = vadd.f32 1e-07, %v5695_v46 }
 0x268   :  { %vm2211_vm7 = vcmp.eq.f32.partialorder %v5587_v4, 0.0  ;;  %v2345_v0 = vsel %vm2344_vm4, %v5567_v15, %v2343_v52  ;;  %vm2527_vm8 = vcmp.eq.f32.partialorder %v5602_v26, inf  ;;  %v5713_v50 = vstv %s3593_s13 }
 0x269   :  { %v5715_v40 = vpop.eup %3750  ;;  %v2376_v58 = vmul.f32 %v3747_v10, %v5593_v29  ;;  %vm2379_vm9 = vcmp.eq.f32.partialorder %v5593_v29, 0.0  ;;  %v2528_v27 = vsel %vm2527_vm8, %v5602_v26, %v2526_v30  ;;  %3768 = vrsqrt.f32 %v5713_v50 }
 0x26a   :  { %v5721_v21 = vpop.eup %3752  ;;  %v2380_v14 = vand.u32 2147483648, %v5593_v29  ;;  %vm2402_vm10 = vcmp.eq.f32.partialorder %v5630_v1, inf  ;;  %v2405_v53 = vand.u32 2147483648, %v5630_v1  ;;  %v2530_v19 = vand.u32 2147483648, %v5602_v26 }
 0x26b   :  { %v3755_v36 = vpop.eup %3754  ;;  %3770 = vrcp.f32 %v2157_v47  ;;  %v2210_v45 = vsel %vm2209_vm3, %v5587_v4, %v2208_v13  ;;  %v5732_v28 = vsel %vm2346_vm5, %v2347_v44, %v2345_v0  ;;  %vm2529_vm11 = vcmp.eq.f32.partialorder %v5602_v26, 0.0 }
 0x26c   :  { %v3757_v42 = vpop.eup %3756  ;;  %3772 = vrcp.f32 %v2190_v16  ;;  %v5735_v20 = vsel %vm2529_vm11, %v2530_v19, %v2528_v27  ;;  %v5737_v43 = vstv %s3595_s0  ;;  %v5739_v12 = vstv %s3599_s6 }
 0x26d   :  { %v3759_v54 = vpop.eup %3758  ;;  %vm1780_vm12 = vcmp.gt.f32.partialorder %v5584_v32, 1.0  ;;  %v2378_v7 = vsel %vm2377_vm6, %v5593_v29, %v2376_v58  ;;  %v2559_v15 = vmul.f32 %v3757_v42, %v5641_v11  ;;  %vm2560_vm13 = vcmp.eq.f32.partialorder %v5641_v11, inf }
 0x26e   :  { %v2563_v26 = vand.u32 2147483648, %v5641_v11  ;;  %v2401_v18 = vmul.f32 %v3755_v36, %v5630_v1  ;;  %v2350_v48 = vadd.f32 1e-07, %v5732_v28  ;;  %v2584_v6 = vmul.f32 %v3759_v54, %v5643_v22  ;;  %v5752_v62 = vpop.eup %3760 }
 0x26f   :  { %3774 = vrsqrt.f32 %v5737_v43  ;;  %v2561_v2 = vsel %vm2560_vm13, %v5641_v11, %v2559_v15  ;;  %vm2562_vm14 = vcmp.eq.f32.partialorder %v5641_v11, 0.0  ;;  %v2533_v24 = vadd.f32 1e-07, %v5735_v20 }
 0x270   :  { %3776 = vrsqrt.f32 %v5739_v12  ;;  %v3763_v25 = vpop.eup %3762  ;;  %vm1813_vm15 = vcmp.gt.f32.partialorder %v5600_v49, 1.0  ;;  %v5761_v35 = vsel %vm2379_vm9, %v2380_v14, %v2378_v7  ;;  %vm2404_vm0 = vcmp.eq.f32.partialorder %v5630_v1, 0.0 }
 0x271   :  { %vm2585_vm1 = vcmp.eq.f32.partialorder %v5643_v22, inf  ;;  %v5765_v38 = vsel %vm2562_vm14, %v2563_v26, %v2561_v2  ;;  %v5771_v11 = vsel %vm2211_vm7, %v2212_v17, %v2210_v45  ;;  %v2588_v31 = vand.u32 2147483648, %v5643_v22  ;;  %v3765_v52 = vpop.eup %3764 }
 0x272   :  { %v2566_v57 = vadd.f32 1e-07, %v5765_v38  ;;  %v2586_v29 = vsel %vm2585_vm1, %v5643_v22, %v2584_v6  ;;  %vm1973_vm2 = vcmp.gt.f32.partialorder %v5650_v55, 1.0  ;;  %3778 = vrcp.f32 %v2350_v48  ;;  %v3767_v4 = vpop.eup %3766 }
 0x273   :  { %v2403_v10 = vsel %vm2402_vm10, %v5630_v1, %v2401_v18  ;;  %v2719_v56 = vmul.f32 %v3763_v25, %v5675_v34  ;;  %v5781_v44 = vstv %s3601_s14  ;;  %v2383_v17 = vadd.f32 1e-07, %v5761_v35 }
 0x274   :  { %3780 = vrcp.f32 %v2533_v24  ;;  %vm2587_vm3 = vcmp.eq.f32.partialorder %v5643_v22, 0.0  ;;  %vm2720_vm4 = vcmp.eq.f32.partialorder %v5675_v34, inf  ;;  %v2215_v13 = vadd.f32 1e-07, %v5771_v11 }
 0x275   :  { %3782 = vrcp.f32 %v2566_v57  ;;  %v5787_v47 = vsel %vm2587_vm3, %v2588_v31, %v2586_v29  ;;  %v2721_v30 = vsel %vm2720_vm4, %v5675_v34, %v2719_v56  ;;  %v5792_v16 = vsel %vm2404_vm0, %v2405_v53, %v2403_v10 }
 0x276   :  { %v2723_v0 = vand.u32 2147483648, %v5675_v34  ;;  %3784 = vrsqrt.f32 %v5781_v44  ;;  %v5796_v58 = vstv %s3603_s7  ;;  %v3769_v22 = vpop.eup %3768  ;;  %v1784_v27 = vsel %vm1780_vm12, %v5715_v40, 1.0 }
 0x277   :  { %vm2006_vm5 = vcmp.gt.f32.partialorder %v5658_v41, 1.0  ;;  %vm2722_vm6 = vcmp.eq.f32.partialorder %v5675_v34, 0.0  ;;  %3786 = vrsqrt.f32 %v5796_v58  ;;  %vm1655_vm7 = vcmp.gt.f32.partialorder %v5551_v8, 1.0 }
 0x278   :  { %vm1838_vm8 = vcmp.gt.f32.partialorder %v5623_v5, 1.0  ;;  %3788 = vrcp.f32 %v2383_v17  ;;  %v2591_v1 = vadd.f32 1e-07, %v5787_v47  ;;  %v2752_v14 = vmul.f32 %v3769_v22, %v5713_v50  ;;  %v3771_v19 = vpop.eup %3770 }
 0x279   :  { %v5808_v53 = vsel %vm2722_vm6, %v2723_v0, %v2721_v30  ;;  %3790 = vrcp.f32 %v2215_v13  ;;  %v2408_v32 = vadd.f32 1e-07, %v5792_v16  ;;  %vm2753_vm9 = vcmp.eq.f32.partialorder %v5713_v50, inf  ;;  %v3773_v40 = vpop.eup %3772 }
 0x27a   :  { %v2756_v34 = vand.u32 2147483648, %v5713_v50  ;;  %v1817_v36 = vsel %vm1813_vm15, %v5721_v21, 1.0  ;;  %3792 = vrcp.f32 %v5699_v51  ;;  %v2754_v45 = vsel %vm2753_vm9, %v5713_v50, %v2752_v14 }
 0x27b   :  { %vm2755_vm10 = vcmp.eq.f32.partialorder %v5713_v50, 0.0  ;;  %vm2156_vm11 = vcmp.gt.f32.partialorder %v5691_v61, 1.0  ;;  %vm2189_vm12 = vcmp.gt.f32.partialorder %v5695_v46, 1.0  ;;  %v2726_v42 = vadd.f32 1e-07, %v5808_v53 }
 0x27c   :  { %v5822_v54 = vsel %vm2755_vm10, %v2756_v34, %v2754_v45  ;;  %v3775_v7 = vpop.eup %3774  ;;  %v1977_v15 = vsel %vm1973_vm2, %v3765_v52, 1.0  ;;  %v2010_v49 = vsel %vm2006_vm5, %v3767_v4, 1.0  ;;  %3794 = vrcp.f32 %v2591_v1 }
 0x27d   :  { %v2759_v51 = vadd.f32 1e-07, %v5822_v54  ;;  %v3777_v21 = vpop.eup %3776  ;;  %v2160_v50 = vsel %vm2156_vm11, %v3771_v19, 1.0  ;;  %v2193_v26 = vsel %vm2189_vm12, %v3773_v40, 1.0  ;;  %3796 = vrcp.f32 %v2408_v32 }
 0x27e   :  { %v2777_v61 = vmul.f32 %v3775_v7, %v5737_v43  ;;  %vm2778_vm13 = vcmp.eq.f32.partialorder %v5737_v43, inf  ;;  %v2781_v46 = vand.u32 2147483648, %v5737_v43  ;;  %vm2780_vm14 = vcmp.eq.f32.partialorder %v5737_v43, 0.0 }
 0x27f   :  { %v2902_v55 = vmul.f32 %v3777_v21, %v5739_v12  ;;  %3798 = vrcp.f32 %v2726_v42  ;;  %vm2903_vm15 = vcmp.eq.f32.partialorder %v5739_v12, inf  ;;  %v2906_v18 = vand.u32 2147483648, %v5739_v12  ;;  %v3779_v48 = vpop.eup %3778 }
 0x280   :  { %v2779_v41 = vsel %vm2778_vm13, %v5737_v43, %v2777_v61  ;;  %3800 = vrcp.f32 %v2759_v51  ;;  %vm2905_vm0 = vcmp.eq.f32.partialorder %v5739_v12, 0.0  ;;  %v1659_v25 = vsel %vm1655_vm7, %v5677_v9, 1.0 }
 0x281   :  { %v5837_v6 = vsel %vm2780_vm14, %v2781_v46, %v2779_v41  ;;  %v2904_v2 = vsel %vm2903_vm15, %v5739_v12, %v2902_v55  ;;  %v3781_v24 = vpop.eup %3780  ;;  %v1818_v31 = vmul.f32 %v1817_v36, %v1784_v27  ;;  %v1842_v43 = vsel %vm1838_vm8, %v5752_v62, 1.0 }
 0x282   :  { %v5847_v57 = vsel %vm2905_vm0, %v2906_v18, %v2904_v2  ;;  %v3783_v29 = vpop.eup %3782  ;;  %v2011_v52 = vmul.f32 %v2010_v49, %v1977_v15  ;;  %vm2214_vm1 = vcmp.gt.f32.partialorder %v5771_v11, 1.0  ;;  %vm2349_vm2 = vcmp.gt.f32.partialorder %v5732_v28, 1.0 }
 0x283   :  { %v2784_v12 = vadd.f32 1e-07, %v5837_v6  ;;  %v3785_v10 = vpop.eup %3784  ;;  %v2194_v56 = vmul.f32 %v2193_v26, %v2160_v50  ;;  %vm2382_vm3 = vcmp.gt.f32.partialorder %v5761_v35, 1.0  ;;  %vm2532_vm4 = vcmp.gt.f32.partialorder %v5735_v20, 1.0 }
 0x284   :  { %vm2565_vm5 = vcmp.gt.f32.partialorder %v5765_v38, 1.0  ;;  %v3787_v8 = vpop.eup %3786  ;;  %v2935_v5 = vmul.f32 %v3785_v10, %v5781_v44  ;;  %vm2936_vm6 = vcmp.eq.f32.partialorder %v5781_v44, inf  ;;  %vm2938_vm7 = vcmp.eq.f32.partialorder %v5781_v44, 0.0 }
 0x285   :  { %v2909_v9 = vadd.f32 1e-07, %v5847_v57  ;;  %v3789_v62 = vpop.eup %3788  ;;  %v2939_v4 = vand.u32 2147483648, %v5781_v44  ;;  %v2960_v17 = vmul.f32 %v3787_v8, %v5796_v58  ;;  %vm2961_vm8 = vcmp.eq.f32.partialorder %v5796_v58, inf }
 0x286   :  { %v2964_v20 = vand.u32 2147483648, %v5796_v58  ;;  %v3791_v13 = vpop.eup %3790  ;;  %v2536_v38 = vsel %vm2532_vm4, %v3781_v24, 1.0  ;;  %v2569_v30 = vsel %vm2565_vm5, %v3783_v29, 1.0  ;;  %3802 = vrcp.f32 %v2784_v12 }
 0x287   :  { %v2937_v0 = vsel %vm2936_vm6, %v5781_v44, %v2935_v5  ;;  %v3793_v22 = vpop.eup %3792  ;;  %v2353_v27 = vsel %vm2349_vm2, %v3779_v48, 1.0  ;;  %v2962_v14 = vsel %vm2961_vm8, %v5796_v58, %v2960_v17  ;;  %vm2963_vm9 = vcmp.eq.f32.partialorder %v5796_v58, 0.0 }
 0x288   :  { %v5866_v1 = vsel %vm2938_vm7, %v2939_v4, %v2937_v0  ;;  %v2386_v19 = vsel %vm2382_vm3, %v3789_v62, 1.0  ;;  %3804 = vrcp.f32 %v2909_v9  ;;  %v5873_v34 = vsel %vm2963_vm9, %v2964_v20, %v2962_v14 }
 0x289   :  { %v2942_v32 = vadd.f32 1e-07, %v5866_v1  ;;  %v3795_v40 = vpop.eup %3794  ;;  %v1843_v44 = vmul.f32 %v1842_v43, %v1818_v31  ;;  %v2218_v28 = vsel %vm2214_vm1, %v3791_v13, 1.0  ;;  %v2570_v36 = vmul.f32 %v2569_v30, %v2536_v38 }
 0x28a   :  { %v2967_v45 = vadd.f32 1e-07, %v5873_v34  ;;  %v3797_v42 = vpop.eup %3796  ;;  %v1660_v58 = vmul.f32 %v1659_v25, %v5686_v59  ;;  %vm2031_vm10 = vcmp.gt.f32.partialorder %v5681_v63, 1.0  ;;  %v2219_v35 = vmul.f32 %v2218_v28, %v2194_v56  ;;  %s3605_s15 = spop %3604 }
 0x28b   :  { %3806 = vrcp.f32 %v2942_v32  ;;  %v2035_v7 = vsel %vm2031_vm10, %v3793_v22, 1.0  ;;  %v2387_v15 = vmul.f32 %v2386_v19, %v2353_v27  ;;  %vm2590_vm11 = vcmp.gt.f32.partialorder %v5787_v47, 1.0 }
 0x28c   :  { %3808 = vrcp.f32 %v2967_v45  ;;  %v3799_v11 = vpop.eup %3798  ;;  %v1371_v49 = vsub.f32 0.0, %v5577_v3  ;;  %v1928_v51 = vstv %s5446_s21  ;;  %v2036_v21 = vmul.f32 %v2035_v7, %v2011_v52 }
 0x28d   :  { %v2594_v50 = vsel %vm2590_vm11, %v3795_v40, 1.0  ;;  %v3801_v26 = vpop.eup %3800  ;;  %v1929_v59 = vmul.f32 %v1928_v51, %v1843_v44  ;;  %v2304_v61 = vstv %s5528_s27  ;;  %vm2407_vm12 = vcmp.gt.f32.partialorder %v5792_v16, 1.0 }
 0x28e   :  { %v2595_v63 = vmul.f32 %v2594_v50, %v2570_v36  ;;  %v1554_v46 = vsub.f32 0.0, %v5634_v23  ;;  %v2121_v55 = vstv %s5484_s23  ;;  %v2305_v47 = vmul.f32 %v2304_v61, %v2219_v35 }
 0x28f   :  { %v2411_v41 = vsel %vm2407_vm12, %v3797_v42, 1.0  ;;  %v1746_v18 = vmul.f32 %v1745_v33, %v1660_v58  ;;  %vm2725_vm13 = vcmp.gt.f32.partialorder %v5808_v53, 1.0  ;;  %vm2758_vm14 = vcmp.gt.f32.partialorder %v5822_v54, 1.0 }
 0x290   :  { %v2412_v48 = vmul.f32 %v2411_v41, %v2387_v15  ;;  %v2122_v3 = vmul.f32 %v2121_v55, %v2036_v21  ;;  %v2680_v2 = vstv %s5645_s11  ;;  %v2729_v24 = vsel %vm2725_vm13, %v3799_v11, 1.0 }
 0x291   :  { %v2762_v25 = vsel %vm2758_vm14, %v3801_v26, 1.0  ;;  %v1930_v31 = vsub.f32 0.0, %v1929_v59  ;;  %v2681_v16 = vmul.f32 %v2680_v2, %v2595_v63  ;;  %v804_v43 = vadd.f32 1.0, %v5465_v37 }
 0x292   :  { %v1555_v23 = vsub.f32 %v1371_v49, %v1554_v46  ;;  %v2306_v29 = vsub.f32 0.0, %v2305_v47  ;;  %v2497_v52 = vstv %s5569_s5  ;;  %v1747_v10 = vsub.f32 0.0, %v1746_v18 }
 0x293   :  { %v3803_v12 = vpop.eup %3802  ;;  %v2498_v56 = vmul.f32 %v2497_v52, %v2412_v48  ;;  %v2763_v33 = vmul.f32 %v2762_v25, %v2729_v24  ;;  %v428_v8 = vadd.f32 1.0, %v5452_v60  ;;  %v1180_v53 = vadd.f32 1.0, %v5554_v39 }
 0x294   :  { %v2123_v54 = vsub.f32 0.0, %v2122_v3  ;;  %v1931_v9 = vsub.f32 %v1747_v10, %v1930_v31  ;;  %v2682_v62 = vsub.f32 0.0, %v2681_v16  ;;  %vm2783_vm15 = vcmp.gt.f32.partialorder %v5837_v6, 1.0 }
 0x295   :  { %v3805_v5 = vpop.eup %3804  ;;  %v805_v4 = vmax.f32 %v804_v43, 0.0  ;;  %v1556_v17 = vadd.f32 1.0, %v1555_v23  ;;  %v2787_v20 = vsel %vm2783_vm15, %v3803_v12, 1.0  ;;  %v2499_v38 = vsub.f32 0.0, %v2498_v56 }
 0x296   :  { %v2307_v37 = vsub.f32 %v2123_v54, %v2306_v29  ;;  %v2788_v30 = vmul.f32 %v2787_v20, %v2763_v33  ;;  %vm2908_vm0 = vcmp.gt.f32.partialorder %v5847_v57, 1.0  ;;  %vm2941_vm1 = vcmp.gt.f32.partialorder %v5866_v1, 1.0 }
 0x297   :  { %v429_v39 = vmax.f32 %v428_v8, 0.0  ;;  %v1181_v0 = vmax.f32 %v1180_v53, 0.0  ;;  %v2912_v22 = vsel %vm2908_vm0, %v3805_v5, 1.0  ;;  %v1932_v14 = vadd.f32 1.0, %v1931_v9 }
 0x298   :  { %v3807_v13 = vpop.eup %3806  ;;  %v2683_v19 = vsub.f32 %v2499_v38, %v2682_v62  ;;  %vm2966_vm2 = vcmp.gt.f32.partialorder %v5873_v34, 1.0  ;;  %v2873_v40 = vstv %s5707_s1  ;;  %v1557_v28 = vmax.f32 %v1556_v17, 0.0 }
 0x299   :  { %v3809_v60 = vpop.eup %3808  ;;  %v2945_v27 = vsel %vm2941_vm1, %v3807_v13, 1.0  ;;  %v811_v32 = vadd.f32 %v805_v4, %v429_v39  ;;  %v2308_v36 = vadd.f32 1.0, %v2307_v37  ;;  %v2874_v45 = vmul.f32 %v2873_v40, %v2788_v30 }
 0x29a   :  { %v2946_v6 = vmul.f32 %v2945_v27, %v2912_v22  ;;  %v2970_v44 = vsel %vm2966_vm2, %v3809_v60, 1.0  ;;  %v3056_v42 = vstv %s3605_s15  ;;  %v1933_v58 = vmax.f32 %v1932_v14, 0.0 }
 0x29b   :  { %v1187_v1 = vadd.f32 %v1181_v0, %v811_v32  ;;  %v2684_v35 = vadd.f32 1.0, %v2683_v19  ;;  %v2309_v11 = vmax.f32 %v2308_v36, 0.0  ;;  %v2875_v49 = vsub.f32 0.0, %v2874_v45 }
 0x29c   :  { %v2971_v57 = vmul.f32 %v2970_v44, %v2946_v6 }
 0x29d   :  { %v1563_v15 = vadd.f32 %v1557_v28, %v1187_v1  ;;  %v2685_v50 = vmax.f32 %v2684_v35, 0.0 }
 0x29e   :  { %v3057_v7 = vmul.f32 %v3056_v42, %v2971_v57 }
 0x29f   :  { %v1939_v21 = vadd.f32 %v1933_v58, %v1563_v15 }
 0x2a0   :  { %v3058_v51 = vsub.f32 0.0, %v3057_v7 }
 0x2a1   :  { %v2315_v26 = vadd.f32 %v2309_v11, %v1939_v21 }
 0x2a2   :  { %v3059_v34 = vsub.f32 %v2875_v49, %v3058_v51 }
 0x2a3   :  { %v2691_v63 = vadd.f32 %v2685_v50, %v2315_v26 }
 0x2a4   :  { %v3060_v59 = vadd.f32 1.0, %v3059_v34 }
 0x2a6   :  { %v3061_v61 = vmax.f32 %v3060_v59, 0.0 }
 0x2a8   :  { %v3067_v46 = vadd.f32 %v3061_v61, %v2691_v63 }
 0x2aa   :  { %3068 = vst [vmem:[#allocation12] sm:$0x1] %v3067_v46 }
 0x2ab   :  { %3913 = shalt.err (!%p3910_p11)
}
 0x2ac   :  { %3078 = dma.vmem_to_hbm [thread:$0]  %s3076_s17, 16, %s5907_s8, [#allocation11]  }
 0x2ad   :  { %3926 = dma.done.wait [#allocation11], 16  }
 0x2ae   :  { %3927 = vsyncadd [#allocation11], 4294967280 }
 0x2af   :  { %3082 = vsyncpa [#allocation10], 1 }
 0x2b0   :  { %3083 = vsyncpa [#allocation11], 1 }

</bundles_post_ra>
